<compile_context>
chip_gen: v7x
topology: tpu7x:2x2x1
jax: 0.10.0
libtpu: 0.0.40
codegen_flags: <defaults>
</compile_context>

<pallas_src>
import math
import numpy as np
import jax
import jax.numpy as jnp
from jax.experimental import pallas as pl
from jax.experimental.pallas import tpu as pltpu


def gaussian_1d(window_size: int, sigma: float = 1.5) -> np.ndarray:
    # Matches Ssim_grad_L1.gaussian (window_size=11, sigma=1.5 in create_window).
    g = np.array(
        [math.exp(-((x - window_size // 2) ** 2) / (2.0 * sigma ** 2))
         for x in range(window_size)],
        dtype=np.float32,
    )
    return g / g.sum()


def _aw_matrix(W, ws, gauss):
    """Banded matrix so that the W ("valid") contraction is x @ A_w."""
    Wout = W - ws + 1
    A_w = np.zeros((W, Wout), np.float32)
    for b in range(Wout):
        A_w[b:b + ws, b] = gauss
    return A_w


def _hw_params():
    """Generation-aware VMEM limit / tiling budget / TensorCore count."""
    cap = None
    try:
        cap = int(pltpu.get_tpu_info().vmem_capacity_bytes)
    except Exception:
        cap = None
    kind = ""
    try:
        kind = jax.devices()[0].device_kind.lower()
    except Exception:
        pass
    is_v7 = "7" in kind                      # v7x: 64 MiB/TC, 2 TCs per chip
    if cap is None or cap <= 0:
        cap = (64 if is_v7 else 128) * 1024 * 1024
    n_tc = 2 if is_v7 else 1
    vmem_limit = min(int(cap * 0.6), 96 * 1024 * 1024)   # <= ~38 MiB on v7x
    budget = int(vmem_limit * 0.55)                      # headroom for scratch
    return vmem_limit, budget, n_tc


def _pick_tile(Np, H, W, Hout, Wout, budget_bytes, n_tc):
    """Largest nT (multiple of 8, dividing padded N) whose estimated working
    set fits the budget; on v7x prefer an even number of grid steps (>= 2 per
    TensorCore), on single-TC chips allow a single full-N step."""
    Wp = ((W + 127) // 128) * 128            # lane padding in VMEM
    Wop = ((Wout + 127) // 128) * 128

    def ws_bytes(nT):
        per = (8 * H * Wp                    # t,p double-buffered + d + grad/stream temps
               + 2 * H * Wop                 # y1 + dot staging
               + 12 * Hout * Wop)            # 5 conv outputs + SSIM epilogue temps
        return 4 * nT * per + 8 * W * Wop + 8 * 128 * 4

    units = Np // 8
    divisors = sorted(8 * d for d in range(1, units + 1) if units % d == 0)
    feasible = [nT for nT in divisors if ws_bytes(nT) <= budget_bytes] or [8]
    if n_tc > 1:
        for pred in (lambda nT: (Np // nT) % n_tc == 0 and (Np // nT) >= 2 * n_tc,
                     lambda nT: (Np // nT) % n_tc == 0):
            good = [nT for nT in feasible if pred(nT)]
            if good:
                return max(good)
    return max(feasible)


def _build_kernel(nT, H, W, Hout, Wout, ws, taps, C1, C2, n_valid, needs_mask):
    taps = [float(t) for t in taps]

    def kernel(t_ref, p_ref, aw_ref, o_ref):
        t = t_ref[...]                       # (H, nT, W)
        p = p_ref[...]
        d = p - t

        # ---- L1 partial: sum(|pred - true|). ----
        l1_sum = jnp.sum(jnp.abs(d))

        # ---- edge partial.  np.gradient is linear => grad(p)-grad(t) == grad(d).
        # H axis is the free leading axis: all slices are layout-free.
        gh_sum = (jnp.sum(jnp.abs(d[1] - d[0]))
                  + jnp.sum(jnp.abs(d[H - 1] - d[H - 2])))
        if H > 2:
            gh_sum = gh_sum + 0.5 * jnp.sum(jnp.abs(d[2:] - d[:H - 2]))
        # W axis (lanes): keep the exact slice formulation (verified numerics).
        # TODO(synk): a pltpu.roll-based variant would avoid the lane-offset
        # temporaries; only matters for tiny images where the conv is cheap.
        gw_sum = (jnp.sum(jnp.abs(d[:, :, 1:2] - d[:, :, 0:1]))
                  + jnp.sum(jnp.abs(d[:, :, W - 1:W] - d[:, :, W - 2:W - 1])))
        if W > 2:
            gw_sum = gw_sum + 0.5 * jnp.sum(jnp.abs(d[:, :, 2:] - d[:, :, :W - 2]))
        edge_sum = gh_sum + gw_sum

        # ---- SSIM partial: per-stream separable valid Gaussian conv. ----
        # W contraction: one weight-stationary MXU dot (A_w reused across the
        # 5 consecutive dots).  H contraction: ws shifted multiply-adds along
        # the free leading axis with constant taps (no A_h, no broadcast).
        def sep_conv(x):                     # x: (H, nT, W)
            y1 = jnp.dot(x.reshape(H * nT, W), aw_ref[...],
                         preferred_element_type=jnp.float32,
                         precision=jax.lax.Precision.HIGHEST)   # (H*nT, Wout)
            y1 = y1.reshape(H, nT, Wout)                        # free (nT%8==0)
            acc = taps[0] * y1[0:Hout]
            for k in range(1, ws):
                acc = acc + taps[k] * y1[k:k + Hout]
            return acc                       # (Hout, nT, Wout)

        mu1 = sep_conv(p)
        mu2 = sep_conv(t)
        e11 = sep_conv(p * p)
        e22 = sep_conv(t * t)
        e12 = sep_conv(p * t)

        mu1_sq = mu1 * mu1
        mu2_sq = mu2 * mu2
        mu1_mu2 = mu1 * mu2
        sigma1_sq = e11 - mu1_sq
        sigma2_sq = e22 - mu2_sq
        sigma12 = e12 - mu1_mu2
        v1 = 2.0 * sigma12 + C2
        v2 = sigma1_sq + sigma2_sq + C2
        numer = (2.0 * mu1_mu2 + C1) * v1
        denom = (mu1_sq + mu2_sq + C1) * v2
        if hasattr(pl, "reciprocal"):
            ssim_map = numer * pl.reciprocal(denom, approx=False)
        else:
            ssim_map = numer / denom
        if needs_mask:
            n_idx = (jax.lax.broadcasted_iota(jnp.int32, (Hout, nT, Wout), 1)
                     + pl.program_id(0) * nT)
            ssim_map = jnp.where(n_idx < n_valid, ssim_map, 0.0)
        ssim_sum = jnp.sum(ssim_map)

        # ---- lane-dense partial-sum row: lane0=L1, lane1=edges, lane2=ssim. ----
        lane = jax.lax.broadcasted_iota(jnp.int32, (1, 8, 128), 2)
        o_ref[...] = jnp.where(
            lane == 0, l1_sum,
            jnp.where(lane == 1, edge_sum,
                      jnp.where(lane == 2, ssim_sum, 0.0))).astype(jnp.float32)

    return kernel


def ssim_grad_l1_loss(y_true, y_pred, theta=0.1, val_range=1000.0 / 10.0):
    """Pallas TPU implementation of Ssim_grad_L1.forward (NCHW float32)."""
    assert y_true.shape == y_pred.shape, "inconsistent dimensions"
    B, C, H, W = y_true.shape
    assert H >= 2 and W >= 2, "np.gradient requires at least 2 samples per spatial axis"
    N = B * C
    ws = min(11, H, W)                       # real_size in ssim()
    gauss = gaussian_1d(ws, 1.5)
    Hout, Wout = H - ws + 1, W - ws + 1
    C1 = float((0.01 * val_range) ** 2)
    C2 = float((0.03 * val_range) ** 2)
    # TODO(synk): for tiny W (<<128) the dense A_w path leaves most MXU lanes
    # padded; a shifted-multiply-add W path (like the H path) would suit v5e.
    A_w = jnp.asarray(_aw_matrix(W, ws, gauss))

    t = jnp.asarray(y_true, jnp.float32).reshape(N, H, W)
    p = jnp.asarray(y_pred, jnp.float32).reshape(N, H, W)

    # Pad N to a multiple of 8 (zero images; only the SSIM sum needs masking).
    pad = (-N) % 8
    Np = N + pad
    if pad:
        t = jnp.pad(t, ((0, pad), (0, 0), (0, 0)))
        p = jnp.pad(p, ((0, pad), (0, 0), (0, 0)))
    # Layout plumbing: (Np, H, W) -> (H, Np, W) so H lives on the free leading
    # axis and the W-contraction reshapes are layout-free inside the kernel.
    t = jnp.transpose(t, (1, 0, 2))
    p = jnp.transpose(p, (1, 0, 2))

    vmem_limit, budget, n_tc = _hw_params()
    nT = _pick_tile(Np, H, W, Hout, Wout, budget, n_tc)
    num_tiles = Np // nT
    kernel = _build_kernel(nT, H, W, Hout, Wout, ws, list(gauss),
                           C1, C2, N, pad > 0)

    flops = int(Np * (10 * H * W * Wout + 10 * ws * Hout * Wout
                      + 50 * H * W + 20 * Hout * Wout))
    bytes_accessed = int(2 * Np * H * W * 4
                         + num_tiles * (W * Wout * 4 + 8 * 128 * 4))

    parts = pl.pallas_call(
        kernel,
        out_shape=jax.ShapeDtypeStruct((num_tiles, 8, 128), jnp.float32),
        grid=(num_tiles,),
        in_specs=[
            pl.BlockSpec((H, nT, W), lambda i: (0, i, 0)),
            pl.BlockSpec((H, nT, W), lambda i: (0, i, 0)),
            pl.BlockSpec((W, Wout), lambda i: (0, 0)),
        ],
        out_specs=pl.BlockSpec((1, 8, 128), lambda i: (i, 0, 0)),
        compiler_params=pltpu.CompilerParams(
            dimension_semantics=("parallel",),
            vmem_limit_bytes=vmem_limit,
        ),
        cost_estimate=pl.CostEstimate(
            flops=flops, transcendentals=0, bytes_accessed=bytes_accessed),
    )(t, p, A_w)

    # Final combine (+ clip) in plain JAX outside the kernel.
    sums = jnp.sum(parts[:, 0, :], axis=0)           # (128,)
    inv_elem = 1.0 / float(N * H * W)
    l_depth = sums[0] * inv_elem
    l_edges = sums[1] * inv_elem
    ssim_val = sums[2] / float(N * Hout * Wout)
    l_ssim = jnp.clip((1.0 - ssim_val) * 0.5, 0.0, 1.0)
    # w1 * l_ssim + w2 * mean(l_edges) + w3 * mean(l_depth)
    return l_ssim + 1.0 * l_edges + float(theta) * l_depth


def numpy_reference(y_true, y_pred, theta=0.1, val_range=1000.0 / 10.0):
    """Direct (non-Pallas) port of the PyTorch forward, for a smoke check."""
    yt = np.asarray(y_true, np.float64)
    yp = np.asarray(y_pred, np.float64)
    B, C, H, W = yt.shape
    l_depth = np.mean(np.abs(yp - yt), axis=-1)
    dx_t, dy_t = np.gradient(yt, axis=2), np.gradient(yt, axis=3)
    dx_p, dy_p = np.gradient(yp, axis=2), np.gradient(yp, axis=3)
    l_edges = np.mean(np.abs(dy_p - dy_t) + np.abs(dx_p - dx_t), axis=-1)

    ws = min(11, H, W)
    g = gaussian_1d(ws, 1.5).astype(np.float64)
    win = np.outer(g, g)

    def dconv(x):
        Hout, Wout = H - ws + 1, W - ws + 1
        out = np.zeros((B, C, Hout, Wout), np.float64)
        for a in range(ws):
            for b in range(ws):
                out += win[a, b] * x[:, :, a:a + Hout, b:b + Wout]
        return out

    mu1, mu2 = dconv(yp), dconv(yt)
    s1 = dconv(yp * yp) - mu1 ** 2
    s2 = dconv(yt * yt) - mu2 ** 2
    s12 = dconv(yp * yt) - mu1 * mu2
    C1 = (0.01 * val_range) ** 2
    C2 = (0.03 * val_range) ** 2
    v1 = 2.0 * s12 + C2
    v2 = s1 + s2 + C2
    ssim_map = (2.0 * mu1 * mu2 + C1) * v1 / ((mu1 ** 2 + mu2 ** 2 + C1) * v2)
    l_ssim = np.clip((1.0 - ssim_map.mean()) * 0.5, 0.0, 1.0)
    return 1.0 * l_ssim + 1.0 * np.mean(l_edges) + theta * np.mean(l_depth)


if __name__ == "__main__":
    B, C, H, W = 2, 4, 16, 16
    key = jax.random.PRNGKey(0)
    k1, k2 = jax.random.split(key)
    y_true = jax.random.uniform(k1, (B, C, H, W), jnp.float32, 0.0, 10.0)
    y_pred = y_true + 0.5 * jax.random.normal(k2, (B, C, H, W), jnp.float32)

    loss = ssim_grad_l1_loss(y_true, y_pred)
    loss = jax.block_until_ready(loss)

    ref = numpy_reference(np.array(y_true), np.array(y_pred))
    np.testing.assert_allclose(float(loss), float(ref), rtol=1e-3, atol=1e-3)
    print("KERNEL_OK")
</pallas_src>

<mosaic_0001>
module attributes {stable_mosaic.version = 11 : i64} {
  func.func @kernel(%arg0: i32, %arg1: memref<16x8x16xf32, #tpu.memory_space<vmem>>, %arg2: memref<16x8x16xf32, #tpu.memory_space<vmem>>, %arg3: memref<16x6xf32, #tpu.memory_space<vmem>>, %arg4: memref<1x8x128xf32, #tpu.memory_space<vmem>>) attributes {dimension_semantics = [#tpu.dimension_semantics<parallel>], iteration_bounds = array<i64: 1>, scalar_prefetch = 0 : i64, scratch_operands = 0 : i64, tpu.core_type = #tpu.core_type<tc>, window_params = [{transform_indices = @transform_0, window_bounds = array<i64: 16, 8, 16>}, {transform_indices = @transform_1, window_bounds = array<i64: 16, 8, 16>}, {pipeline_mode = #tpu.pipeline_mode<synchronous>, transform_indices = @transform_2, window_bounds = array<i64: 16, 6>}, {transform_indices = @transform_3, window_bounds = array<i64: 1, 8, 128>}]} {
    %c0 = arith.constant 0 : index
    %c0_0 = arith.constant 0 : index
    %c0_1 = arith.constant 0 : index
    %0 = vector.load %arg1[%c0, %c0_0, %c0_1] : memref<16x8x16xf32, #tpu.memory_space<vmem>>, vector<16x8x16xf32>
    %c0_2 = arith.constant 0 : index
    %c0_3 = arith.constant 0 : index
    %c0_4 = arith.constant 0 : index
    %1 = vector.load %arg2[%c0_2, %c0_3, %c0_4] : memref<16x8x16xf32, #tpu.memory_space<vmem>>, vector<16x8x16xf32>
    %2 = arith.subf %1, %0 : vector<16x8x16xf32>
    %3 = math.absf %2 : vector<16x8x16xf32>
    %4 = vector.shape_cast %3 : vector<16x8x16xf32> to vector<1x16x8x16xf32>
    %cst = arith.constant dense<0.000000e+00> : vector<1xf32>
    %5 = vector.multi_reduction <add>, %4, %cst [1, 2, 3] : vector<1x16x8x16xf32> to vector<1xf32>
    %6 = vector.shape_cast %5 : vector<1xf32> to vector<1x1x1x1xf32>
    %7 = vector.extract %6[0, 0, 0, 0] : f32 from vector<1x1x1x1xf32>
    %8 = vector.extract_strided_slice %2 {offsets = [1, 0, 0], sizes = [1, 8, 16], strides = [1, 1, 1]} : vector<16x8x16xf32> to vector<1x8x16xf32>
    %9 = vector.shape_cast %8 : vector<1x8x16xf32> to vector<8x16xf32>
    %10 = vector.extract_strided_slice %2 {offsets = [0, 0, 0], sizes = [1, 8, 16], strides = [1, 1, 1]} : vector<16x8x16xf32> to vector<1x8x16xf32>
    %11 = vector.shape_cast %10 : vector<1x8x16xf32> to vector<8x16xf32>
    %12 = arith.subf %9, %11 : vector<8x16xf32>
    %13 = math.absf %12 : vector<8x16xf32>
    %14 = vector.shape_cast %13 : vector<8x16xf32> to vector<1x8x16xf32>
    %cst_5 = arith.constant dense<0.000000e+00> : vector<1xf32>
    %15 = vector.multi_reduction <add>, %14, %cst_5 [1, 2] : vector<1x8x16xf32> to vector<1xf32>
    %16 = vector.shape_cast %15 : vector<1xf32> to vector<1x1x1xf32>
    %17 = vector.extract %16[0, 0, 0] : f32 from vector<1x1x1xf32>
    %18 = vector.extract_strided_slice %2 {offsets = [15, 0, 0], sizes = [1, 8, 16], strides = [1, 1, 1]} : vector<16x8x16xf32> to vector<1x8x16xf32>
    %19 = vector.shape_cast %18 : vector<1x8x16xf32> to vector<8x16xf32>
    %20 = vector.extract_strided_slice %2 {offsets = [14, 0, 0], sizes = [1, 8, 16], strides = [1, 1, 1]} : vector<16x8x16xf32> to vector<1x8x16xf32>
    %21 = vector.shape_cast %20 : vector<1x8x16xf32> to vector<8x16xf32>
    %22 = arith.subf %19, %21 : vector<8x16xf32>
    %23 = math.absf %22 : vector<8x16xf32>
    %24 = vector.shape_cast %23 : vector<8x16xf32> to vector<1x8x16xf32>
    %cst_6 = arith.constant dense<0.000000e+00> : vector<1xf32>
    %25 = vector.multi_reduction <add>, %24, %cst_6 [1, 2] : vector<1x8x16xf32> to vector<1xf32>
    %26 = vector.shape_cast %25 : vector<1xf32> to vector<1x1x1xf32>
    %27 = vector.extract %26[0, 0, 0] : f32 from vector<1x1x1xf32>
    %28 = arith.addf %17, %27 : f32
    %29 = vector.extract_strided_slice %2 {offsets = [2, 0, 0], sizes = [14, 8, 16], strides = [1, 1, 1]} : vector<16x8x16xf32> to vector<14x8x16xf32>
    %30 = vector.extract_strided_slice %2 {offsets = [0, 0, 0], sizes = [14, 8, 16], strides = [1, 1, 1]} : vector<16x8x16xf32> to vector<14x8x16xf32>
    %31 = arith.subf %29, %30 : vector<14x8x16xf32>
    %32 = math.absf %31 : vector<14x8x16xf32>
    %33 = vector.shape_cast %32 : vector<14x8x16xf32> to vector<1x14x8x16xf32>
    %cst_7 = arith.constant dense<0.000000e+00> : vector<1xf32>
    %34 = vector.multi_reduction <add>, %33, %cst_7 [1, 2, 3] : vector<1x14x8x16xf32> to vector<1xf32>
    %35 = vector.shape_cast %34 : vector<1xf32> to vector<1x1x1x1xf32>
    %36 = vector.extract %35[0, 0, 0, 0] : f32 from vector<1x1x1x1xf32>
    %cst_8 = arith.constant 5.000000e-01 : f32
    %37 = arith.mulf %cst_8, %36 : f32
    %38 = arith.addf %28, %37 : f32
    %39 = vector.extract_strided_slice %2 {offsets = [0, 0, 1], sizes = [16, 8, 1], strides = [1, 1, 1]} : vector<16x8x16xf32> to vector<16x8x1xf32>
    %40 = vector.extract_strided_slice %2 {offsets = [0, 0, 0], sizes = [16, 8, 1], strides = [1, 1, 1]} : vector<16x8x16xf32> to vector<16x8x1xf32>
    %41 = arith.subf %39, %40 : vector<16x8x1xf32>
    %42 = math.absf %41 : vector<16x8x1xf32>
    %43 = vector.shape_cast %42 : vector<16x8x1xf32> to vector<1x16x8x1xf32>
    %cst_9 = arith.constant dense<0.000000e+00> : vector<1xf32>
    %44 = vector.multi_reduction <add>, %43, %cst_9 [1, 2, 3] : vector<1x16x8x1xf32> to vector<1xf32>
    %45 = vector.shape_cast %44 : vector<1xf32> to vector<1x1x1x1xf32>
    %46 = vector.extract %45[0, 0, 0, 0] : f32 from vector<1x1x1x1xf32>
    %47 = vector.extract_strided_slice %2 {offsets = [0, 0, 15], sizes = [16, 8, 1], strides = [1, 1, 1]} : vector<16x8x16xf32> to vector<16x8x1xf32>
    %48 = vector.extract_strided_slice %2 {offsets = [0, 0, 14], sizes = [16, 8, 1], strides = [1, 1, 1]} : vector<16x8x16xf32> to vector<16x8x1xf32>
    %49 = arith.subf %47, %48 : vector<16x8x1xf32>
    %50 = math.absf %49 : vector<16x8x1xf32>
    %51 = vector.shape_cast %50 : vector<16x8x1xf32> to vector<1x16x8x1xf32>
    %cst_10 = arith.constant dense<0.000000e+00> : vector<1xf32>
    %52 = vector.multi_reduction <add>, %51, %cst_10 [1, 2, 3] : vector<1x16x8x1xf32> to vector<1xf32>
    %53 = vector.shape_cast %52 : vector<1xf32> to vector<1x1x1x1xf32>
    %54 = vector.extract %53[0, 0, 0, 0] : f32 from vector<1x1x1x1xf32>
    %55 = arith.addf %46, %54 : f32
    %56 = vector.extract_strided_slice %2 {offsets = [0, 0, 2], sizes = [16, 8, 14], strides = [1, 1, 1]} : vector<16x8x16xf32> to vector<16x8x14xf32>
    %57 = vector.extract_strided_slice %2 {offsets = [0, 0, 0], sizes = [16, 8, 14], strides = [1, 1, 1]} : vector<16x8x16xf32> to vector<16x8x14xf32>
    %58 = arith.subf %56, %57 : vector<16x8x14xf32>
    %59 = math.absf %58 : vector<16x8x14xf32>
    %60 = vector.shape_cast %59 : vector<16x8x14xf32> to vector<1x16x8x14xf32>
    %cst_11 = arith.constant dense<0.000000e+00> : vector<1xf32>
    %61 = vector.multi_reduction <add>, %60, %cst_11 [1, 2, 3] : vector<1x16x8x14xf32> to vector<1xf32>
    %62 = vector.shape_cast %61 : vector<1xf32> to vector<1x1x1x1xf32>
    %63 = vector.extract %62[0, 0, 0, 0] : f32 from vector<1x1x1x1xf32>
    %cst_12 = arith.constant 5.000000e-01 : f32
    %64 = arith.mulf %cst_12, %63 : f32
    %65 = arith.addf %55, %64 : f32
    %66 = arith.addf %38, %65 : f32
    %67 = vector.shape_cast %1 : vector<16x8x16xf32> to vector<128x16xf32>
    %c0_13 = arith.constant 0 : index
    %c0_14 = arith.constant 0 : index
    %68 = vector.load %arg3[%c0_13, %c0_14] : memref<16x6xf32, #tpu.memory_space<vmem>>, vector<16x6xf32>
    %cst_15 = arith.constant dense<0.000000e+00> : vector<128x6xf32>
    %69 = tpu.matmul %67, %68, %cst_15 {dimension_numbers = #tpu.dot_dimension_numbers<[1], [0], [0], [1], [0, 0, 1, 1], [], []>, precision = #tpu.contract_precision<fp32>} : vector<128x16xf32>, vector<16x6xf32>, vector<128x6xf32> -> vector<128x6xf32>
    %70 = vector.shape_cast %69 : vector<128x6xf32> to vector<16x8x6xf32>
    %71 = vector.extract_strided_slice %70 {offsets = [0, 0, 0], sizes = [6, 8, 6], strides = [1, 1, 1]} : vector<16x8x6xf32> to vector<6x8x6xf32>
    %cst_16 = arith.constant 0.00102838024 : f32
    %72 = vector.broadcast %cst_16 : f32 to vector<6x8x6xf32>
    %73 = arith.mulf %72, %71 : vector<6x8x6xf32>
    %74 = vector.extract_strided_slice %70 {offsets = [1, 0, 0], sizes = [6, 8, 6], strides = [1, 1, 1]} : vector<16x8x6xf32> to vector<6x8x6xf32>
    %cst_17 = arith.constant 0.00759875868 : f32
    %75 = vector.broadcast %cst_17 : f32 to vector<6x8x6xf32>
    %76 = arith.mulf %75, %74 : vector<6x8x6xf32>
    %77 = arith.addf %73, %76 : vector<6x8x6xf32>
    %78 = vector.extract_strided_slice %70 {offsets = [2, 0, 0], sizes = [6, 8, 6], strides = [1, 1, 1]} : vector<16x8x6xf32> to vector<6x8x6xf32>
    %cst_18 = arith.constant 0.0360007733 : f32
    %79 = vector.broadcast %cst_18 : f32 to vector<6x8x6xf32>
    %80 = arith.mulf %79, %78 : vector<6x8x6xf32>
    %81 = arith.addf %77, %80 : vector<6x8x6xf32>
    %82 = vector.extract_strided_slice %70 {offsets = [3, 0, 0], sizes = [6, 8, 6], strides = [1, 1, 1]} : vector<16x8x6xf32> to vector<6x8x6xf32>
    %cst_19 = arith.constant 0.109360695 : f32
    %83 = vector.broadcast %cst_19 : f32 to vector<6x8x6xf32>
    %84 = arith.mulf %83, %82 : vector<6x8x6xf32>
    %85 = arith.addf %81, %84 : vector<6x8x6xf32>
    %86 = vector.extract_strided_slice %70 {offsets = [4, 0, 0], sizes = [6, 8, 6], strides = [1, 1, 1]} : vector<16x8x6xf32> to vector<6x8x6xf32>
    %cst_20 = arith.constant 0.213005543 : f32
    %87 = vector.broadcast %cst_20 : f32 to vector<6x8x6xf32>
    %88 = arith.mulf %87, %86 : vector<6x8x6xf32>
    %89 = arith.addf %85, %88 : vector<6x8x6xf32>
    %90 = vector.extract_strided_slice %70 {offsets = [5, 0, 0], sizes = [6, 8, 6], strides = [1, 1, 1]} : vector<16x8x6xf32> to vector<6x8x6xf32>
    %cst_21 = arith.constant 0.266011745 : f32
    %91 = vector.broadcast %cst_21 : f32 to vector<6x8x6xf32>
    %92 = arith.mulf %91, %90 : vector<6x8x6xf32>
    %93 = arith.addf %89, %92 : vector<6x8x6xf32>
    %94 = vector.extract_strided_slice %70 {offsets = [6, 0, 0], sizes = [6, 8, 6], strides = [1, 1, 1]} : vector<16x8x6xf32> to vector<6x8x6xf32>
    %cst_22 = arith.constant 0.213005543 : f32
    %95 = vector.broadcast %cst_22 : f32 to vector<6x8x6xf32>
    %96 = arith.mulf %95, %94 : vector<6x8x6xf32>
    %97 = arith.addf %93, %96 : vector<6x8x6xf32>
    %98 = vector.extract_strided_slice %70 {offsets = [7, 0, 0], sizes = [6, 8, 6], strides = [1, 1, 1]} : vector<16x8x6xf32> to vector<6x8x6xf32>
    %cst_23 = arith.constant 0.109360695 : f32
    %99 = vector.broadcast %cst_23 : f32 to vector<6x8x6xf32>
    %100 = arith.mulf %99, %98 : vector<6x8x6xf32>
    %101 = arith.addf %97, %100 : vector<6x8x6xf32>
    %102 = vector.extract_strided_slice %70 {offsets = [8, 0, 0], sizes = [6, 8, 6], strides = [1, 1, 1]} : vector<16x8x6xf32> to vector<6x8x6xf32>
    %cst_24 = arith.constant 0.0360007733 : f32
    %103 = vector.broadcast %cst_24 : f32 to vector<6x8x6xf32>
    %104 = arith.mulf %103, %102 : vector<6x8x6xf32>
    %105 = arith.addf %101, %104 : vector<6x8x6xf32>
    %106 = vector.extract_strided_slice %70 {offsets = [9, 0, 0], sizes = [6, 8, 6], strides = [1, 1, 1]} : vector<16x8x6xf32> to vector<6x8x6xf32>
    %cst_25 = arith.constant 0.00759875868 : f32
    %107 = vector.broadcast %cst_25 : f32 to vector<6x8x6xf32>
    %108 = arith.mulf %107, %106 : vector<6x8x6xf32>
    %109 = arith.addf %105, %108 : vector<6x8x6xf32>
    %110 = vector.extract_strided_slice %70 {offsets = [10, 0, 0], sizes = [6, 8, 6], strides = [1, 1, 1]} : vector<16x8x6xf32> to vector<6x8x6xf32>
    %cst_26 = arith.constant 0.00102838024 : f32
    %111 = vector.broadcast %cst_26 : f32 to vector<6x8x6xf32>
    %112 = arith.mulf %111, %110 : vector<6x8x6xf32>
    %113 = arith.addf %109, %112 : vector<6x8x6xf32>
    %114 = vector.shape_cast %0 : vector<16x8x16xf32> to vector<128x16xf32>
    %c0_27 = arith.constant 0 : index
    %c0_28 = arith.constant 0 : index
    %115 = vector.load %arg3[%c0_27, %c0_28] : memref<16x6xf32, #tpu.memory_space<vmem>>, vector<16x6xf32>
    %cst_29 = arith.constant dense<0.000000e+00> : vector<128x6xf32>
    %116 = tpu.matmul %114, %115, %cst_29 {dimension_numbers = #tpu.dot_dimension_numbers<[1], [0], [0], [1], [0, 0, 1, 1], [], []>, precision = #tpu.contract_precision<fp32>} : vector<128x16xf32>, vector<16x6xf32>, vector<128x6xf32> -> vector<128x6xf32>
    %117 = vector.shape_cast %116 : vector<128x6xf32> to vector<16x8x6xf32>
    %118 = vector.extract_strided_slice %117 {offsets = [0, 0, 0], sizes = [6, 8, 6], strides = [1, 1, 1]} : vector<16x8x6xf32> to vector<6x8x6xf32>
    %cst_30 = arith.constant 0.00102838024 : f32
    %119 = vector.broadcast %cst_30 : f32 to vector<6x8x6xf32>
    %120 = arith.mulf %119, %118 : vector<6x8x6xf32>
    %121 = vector.extract_strided_slice %117 {offsets = [1, 0, 0], sizes = [6, 8, 6], strides = [1, 1, 1]} : vector<16x8x6xf32> to vector<6x8x6xf32>
    %cst_31 = arith.constant 0.00759875868 : f32
    %122 = vector.broadcast %cst_31 : f32 to vector<6x8x6xf32>
    %123 = arith.mulf %122, %121 : vector<6x8x6xf32>
    %124 = arith.addf %120, %123 : vector<6x8x6xf32>
    %125 = vector.extract_strided_slice %117 {offsets = [2, 0, 0], sizes = [6, 8, 6], strides = [1, 1, 1]} : vector<16x8x6xf32> to vector<6x8x6xf32>
    %cst_32 = arith.constant 0.0360007733 : f32
    %126 = vector.broadcast %cst_32 : f32 to vector<6x8x6xf32>
    %127 = arith.mulf %126, %125 : vector<6x8x6xf32>
    %128 = arith.addf %124, %127 : vector<6x8x6xf32>
    %129 = vector.extract_strided_slice %117 {offsets = [3, 0, 0], sizes = [6, 8, 6], strides = [1, 1, 1]} : vector<16x8x6xf32> to vector<6x8x6xf32>
    %cst_33 = arith.constant 0.109360695 : f32
    %130 = vector.broadcast %cst_33 : f32 to vector<6x8x6xf32>
    %131 = arith.mulf %130, %129 : vector<6x8x6xf32>
    %132 = arith.addf %128, %131 : vector<6x8x6xf32>
    %133 = vector.extract_strided_slice %117 {offsets = [4, 0, 0], sizes = [6, 8, 6], strides = [1, 1, 1]} : vector<16x8x6xf32> to vector<6x8x6xf32>
    %cst_34 = arith.constant 0.213005543 : f32
    %134 = vector.broadcast %cst_34 : f32 to vector<6x8x6xf32>
    %135 = arith.mulf %134, %133 : vector<6x8x6xf32>
    %136 = arith.addf %132, %135 : vector<6x8x6xf32>
    %137 = vector.extract_strided_slice %117 {offsets = [5, 0, 0], sizes = [6, 8, 6], strides = [1, 1, 1]} : vector<16x8x6xf32> to vector<6x8x6xf32>
    %cst_35 = arith.constant 0.266011745 : f32
    %138 = vector.broadcast %cst_35 : f32 to vector<6x8x6xf32>
    %139 = arith.mulf %138, %137 : vector<6x8x6xf32>
    %140 = arith.addf %136, %139 : vector<6x8x6xf32>
    %141 = vector.extract_strided_slice %117 {offsets = [6, 0, 0], sizes = [6, 8, 6], strides = [1, 1, 1]} : vector<16x8x6xf32> to vector<6x8x6xf32>
    %cst_36 = arith.constant 0.213005543 : f32
    %142 = vector.broadcast %cst_36 : f32 to vector<6x8x6xf32>
    %143 = arith.mulf %142, %141 : vector<6x8x6xf32>
    %144 = arith.addf %140, %143 : vector<6x8x6xf32>
    %145 = vector.extract_strided_slice %117 {offsets = [7, 0, 0], sizes = [6, 8, 6], strides = [1, 1, 1]} : vector<16x8x6xf32> to vector<6x8x6xf32>
    %cst_37 = arith.constant 0.109360695 : f32
    %146 = vector.broadcast %cst_37 : f32 to vector<6x8x6xf32>
    %147 = arith.mulf %146, %145 : vector<6x8x6xf32>
    %148 = arith.addf %144, %147 : vector<6x8x6xf32>
    %149 = vector.extract_strided_slice %117 {offsets = [8, 0, 0], sizes = [6, 8, 6], strides = [1, 1, 1]} : vector<16x8x6xf32> to vector<6x8x6xf32>
    %cst_38 = arith.constant 0.0360007733 : f32
    %150 = vector.broadcast %cst_38 : f32 to vector<6x8x6xf32>
    %151 = arith.mulf %150, %149 : vector<6x8x6xf32>
    %152 = arith.addf %148, %151 : vector<6x8x6xf32>
    %153 = vector.extract_strided_slice %117 {offsets = [9, 0, 0], sizes = [6, 8, 6], strides = [1, 1, 1]} : vector<16x8x6xf32> to vector<6x8x6xf32>
    %cst_39 = arith.constant 0.00759875868 : f32
    %154 = vector.broadcast %cst_39 : f32 to vector<6x8x6xf32>
    %155 = arith.mulf %154, %153 : vector<6x8x6xf32>
    %156 = arith.addf %152, %155 : vector<6x8x6xf32>
    %157 = vector.extract_strided_slice %117 {offsets = [10, 0, 0], sizes = [6, 8, 6], strides = [1, 1, 1]} : vector<16x8x6xf32> to vector<6x8x6xf32>
    %cst_40 = arith.constant 0.00102838024 : f32
    %158 = vector.broadcast %cst_40 : f32 to vector<6x8x6xf32>
    %159 = arith.mulf %158, %157 : vector<6x8x6xf32>
    %160 = arith.addf %156, %159 : vector<6x8x6xf32>
    %161 = arith.mulf %1, %1 : vector<16x8x16xf32>
    %162 = vector.shape_cast %161 : vector<16x8x16xf32> to vector<128x16xf32>
    %c0_41 = arith.constant 0 : index
    %c0_42 = arith.constant 0 : index
    %163 = vector.load %arg3[%c0_41, %c0_42] : memref<16x6xf32, #tpu.memory_space<vmem>>, vector<16x6xf32>
    %cst_43 = arith.constant dense<0.000000e+00> : vector<128x6xf32>
    %164 = tpu.matmul %162, %163, %cst_43 {dimension_numbers = #tpu.dot_dimension_numbers<[1], [0], [0], [1], [0, 0, 1, 1], [], []>, precision = #tpu.contract_precision<fp32>} : vector<128x16xf32>, vector<16x6xf32>, vector<128x6xf32> -> vector<128x6xf32>
    %165 = vector.shape_cast %164 : vector<128x6xf32> to vector<16x8x6xf32>
    %166 = vector.extract_strided_slice %165 {offsets = [0, 0, 0], sizes = [6, 8, 6], strides = [1, 1, 1]} : vector<16x8x6xf32> to vector<6x8x6xf32>
    %cst_44 = arith.constant 0.00102838024 : f32
    %167 = vector.broadcast %cst_44 : f32 to vector<6x8x6xf32>
    %168 = arith.mulf %167, %166 : vector<6x8x6xf32>
    %169 = vector.extract_strided_slice %165 {offsets = [1, 0, 0], sizes = [6, 8, 6], strides = [1, 1, 1]} : vector<16x8x6xf32> to vector<6x8x6xf32>
    %cst_45 = arith.constant 0.00759875868 : f32
    %170 = vector.broadcast %cst_45 : f32 to vector<6x8x6xf32>
    %171 = arith.mulf %170, %169 : vector<6x8x6xf32>
    %172 = arith.addf %168, %171 : vector<6x8x6xf32>
    %173 = vector.extract_strided_slice %165 {offsets = [2, 0, 0], sizes = [6, 8, 6], strides = [1, 1, 1]} : vector<16x8x6xf32> to vector<6x8x6xf32>
    %cst_46 = arith.constant 0.0360007733 : f32
    %174 = vector.broadcast %cst_46 : f32 to vector<6x8x6xf32>
    %175 = arith.mulf %174, %173 : vector<6x8x6xf32>
    %176 = arith.addf %172, %175 : vector<6x8x6xf32>
    %177 = vector.extract_strided_slice %165 {offsets = [3, 0, 0], sizes = [6, 8, 6], strides = [1, 1, 1]} : vector<16x8x6xf32> to vector<6x8x6xf32>
    %cst_47 = arith.constant 0.109360695 : f32
    %178 = vector.broadcast %cst_47 : f32 to vector<6x8x6xf32>
    %179 = arith.mulf %178, %177 : vector<6x8x6xf32>
    %180 = arith.addf %176, %179 : vector<6x8x6xf32>
    %181 = vector.extract_strided_slice %165 {offsets = [4, 0, 0], sizes = [6, 8, 6], strides = [1, 1, 1]} : vector<16x8x6xf32> to vector<6x8x6xf32>
    %cst_48 = arith.constant 0.213005543 : f32
    %182 = vector.broadcast %cst_48 : f32 to vector<6x8x6xf32>
    %183 = arith.mulf %182, %181 : vector<6x8x6xf32>
    %184 = arith.addf %180, %183 : vector<6x8x6xf32>
    %185 = vector.extract_strided_slice %165 {offsets = [5, 0, 0], sizes = [6, 8, 6], strides = [1, 1, 1]} : vector<16x8x6xf32> to vector<6x8x6xf32>
    %cst_49 = arith.constant 0.266011745 : f32
    %186 = vector.broadcast %cst_49 : f32 to vector<6x8x6xf32>
    %187 = arith.mulf %186, %185 : vector<6x8x6xf32>
    %188 = arith.addf %184, %187 : vector<6x8x6xf32>
    %189 = vector.extract_strided_slice %165 {offsets = [6, 0, 0], sizes = [6, 8, 6], strides = [1, 1, 1]} : vector<16x8x6xf32> to vector<6x8x6xf32>
    %cst_50 = arith.constant 0.213005543 : f32
    %190 = vector.broadcast %cst_50 : f32 to vector<6x8x6xf32>
    %191 = arith.mulf %190, %189 : vector<6x8x6xf32>
    %192 = arith.addf %188, %191 : vector<6x8x6xf32>
    %193 = vector.extract_strided_slice %165 {offsets = [7, 0, 0], sizes = [6, 8, 6], strides = [1, 1, 1]} : vector<16x8x6xf32> to vector<6x8x6xf32>
    %cst_51 = arith.constant 0.109360695 : f32
    %194 = vector.broadcast %cst_51 : f32 to vector<6x8x6xf32>
    %195 = arith.mulf %194, %193 : vector<6x8x6xf32>
    %196 = arith.addf %192, %195 : vector<6x8x6xf32>
    %197 = vector.extract_strided_slice %165 {offsets = [8, 0, 0], sizes = [6, 8, 6], strides = [1, 1, 1]} : vector<16x8x6xf32> to vector<6x8x6xf32>
    %cst_52 = arith.constant 0.0360007733 : f32
    %198 = vector.broadcast %cst_52 : f32 to vector<6x8x6xf32>
    %199 = arith.mulf %198, %197 : vector<6x8x6xf32>
    %200 = arith.addf %196, %199 : vector<6x8x6xf32>
    %201 = vector.extract_strided_slice %165 {offsets = [9, 0, 0], sizes = [6, 8, 6], strides = [1, 1, 1]} : vector<16x8x6xf32> to vector<6x8x6xf32>
    %cst_53 = arith.constant 0.00759875868 : f32
    %202 = vector.broadcast %cst_53 : f32 to vector<6x8x6xf32>
    %203 = arith.mulf %202, %201 : vector<6x8x6xf32>
    %204 = arith.addf %200, %203 : vector<6x8x6xf32>
    %205 = vector.extract_strided_slice %165 {offsets = [10, 0, 0], sizes = [6, 8, 6], strides = [1, 1, 1]} : vector<16x8x6xf32> to vector<6x8x6xf32>
    %cst_54 = arith.constant 0.00102838024 : f32
    %206 = vector.broadcast %cst_54 : f32 to vector<6x8x6xf32>
    %207 = arith.mulf %206, %205 : vector<6x8x6xf32>
    %208 = arith.addf %204, %207 : vector<6x8x6xf32>
    %209 = arith.mulf %0, %0 : vector<16x8x16xf32>
    %210 = vector.shape_cast %209 : vector<16x8x16xf32> to vector<128x16xf32>
    %c0_55 = arith.constant 0 : index
    %c0_56 = arith.constant 0 : index
    %211 = vector.load %arg3[%c0_55, %c0_56] : memref<16x6xf32, #tpu.memory_space<vmem>>, vector<16x6xf32>
    %cst_57 = arith.constant dense<0.000000e+00> : vector<128x6xf32>
    %212 = tpu.matmul %210, %211, %cst_57 {dimension_numbers = #tpu.dot_dimension_numbers<[1], [0], [0], [1], [0, 0, 1, 1], [], []>, precision = #tpu.contract_precision<fp32>} : vector<128x16xf32>, vector<16x6xf32>, vector<128x6xf32> -> vector<128x6xf32>
    %213 = vector.shape_cast %212 : vector<128x6xf32> to vector<16x8x6xf32>
    %214 = vector.extract_strided_slice %213 {offsets = [0, 0, 0], sizes = [6, 8, 6], strides = [1, 1, 1]} : vector<16x8x6xf32> to vector<6x8x6xf32>
    %cst_58 = arith.constant 0.00102838024 : f32
    %215 = vector.broadcast %cst_58 : f32 to vector<6x8x6xf32>
    %216 = arith.mulf %215, %214 : vector<6x8x6xf32>
    %217 = vector.extract_strided_slice %213 {offsets = [1, 0, 0], sizes = [6, 8, 6], strides = [1, 1, 1]} : vector<16x8x6xf32> to vector<6x8x6xf32>
    %cst_59 = arith.constant 0.00759875868 : f32
    %218 = vector.broadcast %cst_59 : f32 to vector<6x8x6xf32>
    %219 = arith.mulf %218, %217 : vector<6x8x6xf32>
    %220 = arith.addf %216, %219 : vector<6x8x6xf32>
    %221 = vector.extract_strided_slice %213 {offsets = [2, 0, 0], sizes = [6, 8, 6], strides = [1, 1, 1]} : vector<16x8x6xf32> to vector<6x8x6xf32>
    %cst_60 = arith.constant 0.0360007733 : f32
    %222 = vector.broadcast %cst_60 : f32 to vector<6x8x6xf32>
    %223 = arith.mulf %222, %221 : vector<6x8x6xf32>
    %224 = arith.addf %220, %223 : vector<6x8x6xf32>
    %225 = vector.extract_strided_slice %213 {offsets = [3, 0, 0], sizes = [6, 8, 6], strides = [1, 1, 1]} : vector<16x8x6xf32> to vector<6x8x6xf32>
    %cst_61 = arith.constant 0.109360695 : f32
    %226 = vector.broadcast %cst_61 : f32 to vector<6x8x6xf32>
    %227 = arith.mulf %226, %225 : vector<6x8x6xf32>
    %228 = arith.addf %224, %227 : vector<6x8x6xf32>
    %229 = vector.extract_strided_slice %213 {offsets = [4, 0, 0], sizes = [6, 8, 6], strides = [1, 1, 1]} : vector<16x8x6xf32> to vector<6x8x6xf32>
    %cst_62 = arith.constant 0.213005543 : f32
    %230 = vector.broadcast %cst_62 : f32 to vector<6x8x6xf32>
    %231 = arith.mulf %230, %229 : vector<6x8x6xf32>
    %232 = arith.addf %228, %231 : vector<6x8x6xf32>
    %233 = vector.extract_strided_slice %213 {offsets = [5, 0, 0], sizes = [6, 8, 6], strides = [1, 1, 1]} : vector<16x8x6xf32> to vector<6x8x6xf32>
    %cst_63 = arith.constant 0.266011745 : f32
    %234 = vector.broadcast %cst_63 : f32 to vector<6x8x6xf32>
    %235 = arith.mulf %234, %233 : vector<6x8x6xf32>
    %236 = arith.addf %232, %235 : vector<6x8x6xf32>
    %237 = vector.extract_strided_slice %213 {offsets = [6, 0, 0], sizes = [6, 8, 6], strides = [1, 1, 1]} : vector<16x8x6xf32> to vector<6x8x6xf32>
    %cst_64 = arith.constant 0.213005543 : f32
    %238 = vector.broadcast %cst_64 : f32 to vector<6x8x6xf32>
    %239 = arith.mulf %238, %237 : vector<6x8x6xf32>
    %240 = arith.addf %236, %239 : vector<6x8x6xf32>
    %241 = vector.extract_strided_slice %213 {offsets = [7, 0, 0], sizes = [6, 8, 6], strides = [1, 1, 1]} : vector<16x8x6xf32> to vector<6x8x6xf32>
    %cst_65 = arith.constant 0.109360695 : f32
    %242 = vector.broadcast %cst_65 : f32 to vector<6x8x6xf32>
    %243 = arith.mulf %242, %241 : vector<6x8x6xf32>
    %244 = arith.addf %240, %243 : vector<6x8x6xf32>
    %245 = vector.extract_strided_slice %213 {offsets = [8, 0, 0], sizes = [6, 8, 6], strides = [1, 1, 1]} : vector<16x8x6xf32> to vector<6x8x6xf32>
    %cst_66 = arith.constant 0.0360007733 : f32
    %246 = vector.broadcast %cst_66 : f32 to vector<6x8x6xf32>
    %247 = arith.mulf %246, %245 : vector<6x8x6xf32>
    %248 = arith.addf %244, %247 : vector<6x8x6xf32>
    %249 = vector.extract_strided_slice %213 {offsets = [9, 0, 0], sizes = [6, 8, 6], strides = [1, 1, 1]} : vector<16x8x6xf32> to vector<6x8x6xf32>
    %cst_67 = arith.constant 0.00759875868 : f32
    %250 = vector.broadcast %cst_67 : f32 to vector<6x8x6xf32>
    %251 = arith.mulf %250, %249 : vector<6x8x6xf32>
    %252 = arith.addf %248, %251 : vector<6x8x6xf32>
    %253 = vector.extract_strided_slice %213 {offsets = [10, 0, 0], sizes = [6, 8, 6], strides = [1, 1, 1]} : vector<16x8x6xf32> to vector<6x8x6xf32>
    %cst_68 = arith.constant 0.00102838024 : f32
    %254 = vector.broadcast %cst_68 : f32 to vector<6x8x6xf32>
    %255 = arith.mulf %254, %253 : vector<6x8x6xf32>
    %256 = arith.addf %252, %255 : vector<6x8x6xf32>
    %257 = arith.mulf %1, %0 : vector<16x8x16xf32>
    %258 = vector.shape_cast %257 : vector<16x8x16xf32> to vector<128x16xf32>
    %c0_69 = arith.constant 0 : index
    %c0_70 = arith.constant 0 : index
    %259 = vector.load %arg3[%c0_69, %c0_70] : memref<16x6xf32, #tpu.memory_space<vmem>>, vector<16x6xf32>
    %cst_71 = arith.constant dense<0.000000e+00> : vector<128x6xf32>
    %260 = tpu.matmul %258, %259, %cst_71 {dimension_numbers = #tpu.dot_dimension_numbers<[1], [0], [0], [1], [0, 0, 1, 1], [], []>, precision = #tpu.contract_precision<fp32>} : vector<128x16xf32>, vector<16x6xf32>, vector<128x6xf32> -> vector<128x6xf32>
    %261 = vector.shape_cast %260 : vector<128x6xf32> to vector<16x8x6xf32>
    %262 = vector.extract_strided_slice %261 {offsets = [0, 0, 0], sizes = [6, 8, 6], strides = [1, 1, 1]} : vector<16x8x6xf32> to vector<6x8x6xf32>
    %cst_72 = arith.constant 0.00102838024 : f32
    %263 = vector.broadcast %cst_72 : f32 to vector<6x8x6xf32>
    %264 = arith.mulf %263, %262 : vector<6x8x6xf32>
    %265 = vector.extract_strided_slice %261 {offsets = [1, 0, 0], sizes = [6, 8, 6], strides = [1, 1, 1]} : vector<16x8x6xf32> to vector<6x8x6xf32>
    %cst_73 = arith.constant 0.00759875868 : f32
    %266 = vector.broadcast %cst_73 : f32 to vector<6x8x6xf32>
    %267 = arith.mulf %266, %265 : vector<6x8x6xf32>
    %268 = arith.addf %264, %267 : vector<6x8x6xf32>
    %269 = vector.extract_strided_slice %261 {offsets = [2, 0, 0], sizes = [6, 8, 6], strides = [1, 1, 1]} : vector<16x8x6xf32> to vector<6x8x6xf32>
    %cst_74 = arith.constant 0.0360007733 : f32
    %270 = vector.broadcast %cst_74 : f32 to vector<6x8x6xf32>
    %271 = arith.mulf %270, %269 : vector<6x8x6xf32>
    %272 = arith.addf %268, %271 : vector<6x8x6xf32>
    %273 = vector.extract_strided_slice %261 {offsets = [3, 0, 0], sizes = [6, 8, 6], strides = [1, 1, 1]} : vector<16x8x6xf32> to vector<6x8x6xf32>
    %cst_75 = arith.constant 0.109360695 : f32
    %274 = vector.broadcast %cst_75 : f32 to vector<6x8x6xf32>
    %275 = arith.mulf %274, %273 : vector<6x8x6xf32>
    %276 = arith.addf %272, %275 : vector<6x8x6xf32>
    %277 = vector.extract_strided_slice %261 {offsets = [4, 0, 0], sizes = [6, 8, 6], strides = [1, 1, 1]} : vector<16x8x6xf32> to vector<6x8x6xf32>
    %cst_76 = arith.constant 0.213005543 : f32
    %278 = vector.broadcast %cst_76 : f32 to vector<6x8x6xf32>
    %279 = arith.mulf %278, %277 : vector<6x8x6xf32>
    %280 = arith.addf %276, %279 : vector<6x8x6xf32>
    %281 = vector.extract_strided_slice %261 {offsets = [5, 0, 0], sizes = [6, 8, 6], strides = [1, 1, 1]} : vector<16x8x6xf32> to vector<6x8x6xf32>
    %cst_77 = arith.constant 0.266011745 : f32
    %282 = vector.broadcast %cst_77 : f32 to vector<6x8x6xf32>
    %283 = arith.mulf %282, %281 : vector<6x8x6xf32>
    %284 = arith.addf %280, %283 : vector<6x8x6xf32>
    %285 = vector.extract_strided_slice %261 {offsets = [6, 0, 0], sizes = [6, 8, 6], strides = [1, 1, 1]} : vector<16x8x6xf32> to vector<6x8x6xf32>
    %cst_78 = arith.constant 0.213005543 : f32
    %286 = vector.broadcast %cst_78 : f32 to vector<6x8x6xf32>
    %287 = arith.mulf %286, %285 : vector<6x8x6xf32>
    %288 = arith.addf %284, %287 : vector<6x8x6xf32>
    %289 = vector.extract_strided_slice %261 {offsets = [7, 0, 0], sizes = [6, 8, 6], strides = [1, 1, 1]} : vector<16x8x6xf32> to vector<6x8x6xf32>
    %cst_79 = arith.constant 0.109360695 : f32
    %290 = vector.broadcast %cst_79 : f32 to vector<6x8x6xf32>
    %291 = arith.mulf %290, %289 : vector<6x8x6xf32>
    %292 = arith.addf %288, %291 : vector<6x8x6xf32>
    %293 = vector.extract_strided_slice %261 {offsets = [8, 0, 0], sizes = [6, 8, 6], strides = [1, 1, 1]} : vector<16x8x6xf32> to vector<6x8x6xf32>
    %cst_80 = arith.constant 0.0360007733 : f32
    %294 = vector.broadcast %cst_80 : f32 to vector<6x8x6xf32>
    %295 = arith.mulf %294, %293 : vector<6x8x6xf32>
    %296 = arith.addf %292, %295 : vector<6x8x6xf32>
    %297 = vector.extract_strided_slice %261 {offsets = [9, 0, 0], sizes = [6, 8, 6], strides = [1, 1, 1]} : vector<16x8x6xf32> to vector<6x8x6xf32>
    %cst_81 = arith.constant 0.00759875868 : f32
    %298 = vector.broadcast %cst_81 : f32 to vector<6x8x6xf32>
    %299 = arith.mulf %298, %297 : vector<6x8x6xf32>
    %300 = arith.addf %296, %299 : vector<6x8x6xf32>
    %301 = vector.extract_strided_slice %261 {offsets = [10, 0, 0], sizes = [6, 8, 6], strides = [1, 1, 1]} : vector<16x8x6xf32> to vector<6x8x6xf32>
    %cst_82 = arith.constant 0.00102838024 : f32
    %302 = vector.broadcast %cst_82 : f32 to vector<6x8x6xf32>
    %303 = arith.mulf %302, %301 : vector<6x8x6xf32>
    %304 = arith.addf %300, %303 : vector<6x8x6xf32>
    %305 = arith.mulf %113, %113 : vector<6x8x6xf32>
    %306 = arith.mulf %160, %160 : vector<6x8x6xf32>
    %307 = arith.mulf %113, %160 : vector<6x8x6xf32>
    %308 = arith.subf %208, %305 : vector<6x8x6xf32>
    %309 = arith.subf %256, %306 : vector<6x8x6xf32>
    %310 = arith.subf %304, %307 : vector<6x8x6xf32>
    %cst_83 = arith.constant 2.000000e+00 : f32
    %311 = vector.broadcast %cst_83 : f32 to vector<6x8x6xf32>
    %312 = arith.mulf %311, %310 : vector<6x8x6xf32>
    %cst_84 = arith.constant 9.000000e+00 : f32
    %313 = vector.broadcast %cst_84 : f32 to vector<6x8x6xf32>
    %314 = arith.addf %312, %313 : vector<6x8x6xf32>
    %315 = arith.addf %308, %309 : vector<6x8x6xf32>
    %cst_85 = arith.constant 9.000000e+00 : f32
    %316 = vector.broadcast %cst_85 : f32 to vector<6x8x6xf32>
    %317 = arith.addf %315, %316 : vector<6x8x6xf32>
    %cst_86 = arith.constant 2.000000e+00 : f32
    %318 = vector.broadcast %cst_86 : f32 to vector<6x8x6xf32>
    %319 = arith.mulf %318, %307 : vector<6x8x6xf32>
    %cst_87 = arith.constant 1.000000e+00 : f32
    %320 = vector.broadcast %cst_87 : f32 to vector<6x8x6xf32>
    %321 = arith.addf %319, %320 : vector<6x8x6xf32>
    %322 = arith.mulf %321, %314 : vector<6x8x6xf32>
    %323 = arith.addf %305, %306 : vector<6x8x6xf32>
    %cst_88 = arith.constant 1.000000e+00 : f32
    %324 = vector.broadcast %cst_88 : f32 to vector<6x8x6xf32>
    %325 = arith.addf %323, %324 : vector<6x8x6xf32>
    %326 = arith.mulf %325, %317 : vector<6x8x6xf32>
    %327 = tpu.reciprocal %326 : vector<6x8x6xf32> -> vector<6x8x6xf32>
    %328 = arith.mulf %322, %327 : vector<6x8x6xf32>
    %329 = vector.shape_cast %328 : vector<6x8x6xf32> to vector<1x6x8x6xf32>
    %cst_89 = arith.constant dense<0.000000e+00> : vector<1xf32>
    %330 = vector.multi_reduction <add>, %329, %cst_89 [1, 2, 3] : vector<1x6x8x6xf32> to vector<1xf32>
    %331 = vector.shape_cast %330 : vector<1xf32> to vector<1x1x1x1xf32>
    %332 = vector.extract %331[0, 0, 0, 0] : f32 from vector<1x1x1x1xf32>
    %333 = tpu.iota {dimensions = array<i32: 2>} : vector<1x8x128xi32>
    %c0_i32 = arith.constant 0 : i32
    %334 = vector.broadcast %c0_i32 : i32 to vector<1x8x128xi32>
    %335 = arith.cmpi eq, %333, %334 : vector<1x8x128xi32>
    %c1_i32 = arith.constant 1 : i32
    %336 = vector.broadcast %c1_i32 : i32 to vector<1x8x128xi32>
    %337 = arith.cmpi eq, %333, %336 : vector<1x8x128xi32>
    %c2_i32 = arith.constant 2 : i32
    %338 = vector.broadcast %c2_i32 : i32 to vector<1x8x128xi32>
    %339 = arith.cmpi eq, %333, %338 : vector<1x8x128xi32>
    %cst_90 = arith.constant 0.000000e+00 : f32
    %340 = vector.broadcast %332 : f32 to vector<1x8x128xf32>
    %341 = vector.broadcast %cst_90 : f32 to vector<1x8x128xf32>
    %342 = arith.select %339, %340, %341 : vector<1x8x128xi1>, vector<1x8x128xf32>
    %343 = vector.broadcast %66 : f32 to vector<1x8x128xf32>
    %344 = arith.select %337, %343, %342 : vector<1x8x128xi1>, vector<1x8x128xf32>
    %345 = vector.broadcast %7 : f32 to vector<1x8x128xf32>
    %346 = arith.select %335, %345, %344 : vector<1x8x128xi1>, vector<1x8x128xf32>
    %c0_91 = arith.constant 0 : index
    %c0_92 = arith.constant 0 : index
    %c0_93 = arith.constant 0 : index
    %347 = vector.load %arg4[%c0_91, %c0_92, %c0_93] : memref<1x8x128xf32, #tpu.memory_space<vmem>>, vector<1x8x128xf32>
    tpu.vector_store %arg4[%c0_91, %c0_92, %c0_93], %346 {strides = array<i32>} : memref<1x8x128xf32, #tpu.memory_space<vmem>>, vector<1x8x128xf32>,
    return
  }
  func.func @transform_0(%arg0: i32) -> (i32, i32, i32) {
    %c0_i32 = arith.constant 0 : i32
    %c0_i32_0 = arith.constant 0 : i32
    %c0_i32_1 = arith.constant 0 : i32
    return %c0_i32, %arg0, %c0_i32_0 : i32, i32, i32
  }
  func.func @transform_1(%arg0: i32) -> (i32, i32, i32) {
    %c0_i32 = arith.constant 0 : i32
    %c0_i32_0 = arith.constant 0 : i32
    %c0_i32_1 = arith.constant 0 : i32
    return %c0_i32, %arg0, %c0_i32_0 : i32, i32, i32
  }
  func.func @transform_2(%arg0: i32) -> (i32, i32) {
    %c0_i32 = arith.constant 0 : i32
    %c0_i32_0 = arith.constant 0 : i32
    %c0_i32_1 = arith.constant 0 : i32
    return %c0_i32, %c0_i32_0 : i32, i32
  }
  func.func @transform_3(%arg0: i32) -> (i32, i32, i32) {
    %c0_i32 = arith.constant 0 : i32
    %c0_i32_0 = arith.constant 0 : i32
    %c0_i32_1 = arith.constant 0 : i32
    return %arg0, %c0_i32, %c0_i32_0 : i32, i32, i32
  }
}

</mosaic_0001>

<bundles_post_ra>
// kernel: tpu_custom_call.1
= control target key start
LH: loop header
LB: loop body
LE: loop exit
PB: predicated region body
PF: predicated region fallthrough
CT: control target
= control target key end

     0   :  { %8 = vsyncpa [#allocation3], 0  ;;  %s12126_s0 = inlined_call_operand.hbm [shape: f32[16,8,16], index: 0, kind: input, shape index: {}]   ;;  %s12127_s1 = inlined_call_operand.hbm [shape: f32[16,8,16], index: 1, kind: input, shape index: {}]   ;;  %s12128_s2 = inlined_call_operand.hbm [shape: f32[16,6], index: 2, kind: input, shape index: {}]   ;;  %s12129_s3 = inlined_call_operand.hbm [shape: f32[1,8,128], index: 3, kind: output, shape index: {}]  }
   0x1   :  { %9 = vsyncpa [#allocation6], 0 }
   0x2   :  { %10 = vsyncpa [#allocation4], 0  ;;  %s9346_s12 = smov [#allocation5]   ;;  %s9347_s14 = smov [#allocation2]  }
   0x3   :  { %s28_s13 = sshll.u32 %s9346_s12, 4  ;;  %s16_s15 = sshll.u32 %s9347_s14, 4  ;;  %s29_s13 = int_to_ptr.vmem [resolvable:$true] %s28_s13  ;;  %s9377_s15 = int_to_ptr.vmem [resolvable:$true] %s16_s15 }
   0x4   :  { %s9252_s18 = scalar_lea.hbm %s12127_s1, 2048 }
   0x5   :  { %p9253_p0 = scmp.ne.s32.totalorder %s12127_s1, %s9252_s18  ;;  %p9256_p1 = scmp.lt.u32.totalorder %s9252_s18, %s12127_s1 }
   0x7   :  { %p9258_p2 = pnand %p9256_p1, %p9253_p0 }
   0x9   :  { %9261 = shalt.err (!%p9258_p2)
}
   0xa   :  { %s9262_s23 = scalar_lea.vmem %s29_s13, 2048  ;;  %p9267_p4 = scmp.lt.s32.totalorder %s29_s13, %s29_s13 }
   0xb   :  { %p9263_p3 = scmp.ne.s32.totalorder %s29_s13, %s9262_s23  ;;  %p9268_p5 = scmp.lt.s32.totalorder %s9262_s23, %s9262_s23 }
   0xd   :  { %p9269_p6 = por %p9268_p5, %p9267_p4 }
   0xf   :  { %p9270_p7 = pnand %p9269_p6, %p9263_p3 }
  0x11   :  { %9273 = shalt.err (!%p9270_p7)
}
  0x12   :  { %s9348_s24 = smov 128   ;;  %s9349_s25 = smov 8  }
  0x13   :  { %34 = dma.hbm_to_vmem [thread:$0]  %s12127_s1, 2048, %s29_s13, [#allocation6], %s9348_s24, %s9348_s24, %s9349_s25  }
  0x14   :  { %s9274_s30 = scalar_lea.hbm %s12126_s0, 2048 }
  0x15   :  { %p9275_p8 = scmp.ne.s32.totalorder %s12126_s0, %s9274_s30  ;;  %p9278_p9 = scmp.lt.u32.totalorder %s9274_s30, %s12126_s0 }
  0x17   :  { %p9280_p10 = pnand %p9278_p9, %p9275_p8 }
  0x19   :  { %9283 = shalt.err (!%p9280_p10)
}
  0x1a   :  { %s9284_s8 = scalar_lea.vmem %s9377_s15, 2048  ;;  %p9289_p12 = scmp.lt.s32.totalorder %s9377_s15, %s9377_s15 }
  0x1b   :  { %p9285_p11 = scmp.ne.s32.totalorder %s9377_s15, %s9284_s8  ;;  %p9290_p13 = scmp.lt.s32.totalorder %s9284_s8, %s9284_s8 }
  0x1d   :  { %p9291_p0 = por %p9290_p13, %p9289_p12 }
  0x1f   :  { %p9292_p1 = pnand %p9291_p0, %p9285_p11 }
  0x21   :  { %9295 = shalt.err (!%p9292_p1)
}
  0x22   :  { %22 = dma.hbm_to_vmem [thread:$0]  %s12126_s0, 2048, %s9377_s15, [#allocation3], %s9348_s24, %s9348_s24, %s9349_s25  }
  0x23   :  { %s9350_s10 = smov [#allocation7]   ;;  %s9296_s14 = scalar_lea.hbm %s12128_s2, 256 }
  0x24   :  { %s40_s11 = sshll.u32 %s9350_s10, 4  ;;  %p9297_p2 = scmp.ne.s32.totalorder %s12128_s2, %s9296_s14  ;;  %s41_s11 = int_to_ptr.vmem [resolvable:$true] %s40_s11 }
  0x25   :  { %p9300_p3 = scmp.lt.u32.totalorder %s9296_s14, %s12128_s2 }
  0x27   :  { %p9302_p4 = pnand %p9300_p3, %p9297_p2 }
  0x29   :  { %9305 = shalt.err (!%p9302_p4)
}
  0x2a   :  { %s9306_s20 = scalar_lea.vmem %s41_s11, 256  ;;  %p9311_p6 = scmp.lt.s32.totalorder %s41_s11, %s41_s11 }
  0x2b   :  { %p9307_p5 = scmp.ne.s32.totalorder %s41_s11, %s9306_s20  ;;  %p9312_p7 = scmp.lt.s32.totalorder %s9306_s20, %s9306_s20 }
  0x2d   :  { %p9313_p8 = por %p9312_p7, %p9311_p6 }
  0x2f   :  { %p9314_p9 = pnand %p9313_p8, %p9307_p5 }
  0x31   :  { %9317 = shalt.err (!%p9314_p9)
}
  0x32   :  { %46 = dma.hbm_to_vmem [thread:$0]  %s12128_s2, 256, %s41_s11, [#allocation6], %s9348_s24, %s9348_s24, %s9349_s25  }
  0x33   :  { %9340 = dma.done.wait [#allocation3], 2048  }
  0x34   :  { %9341 = vsyncadd [#allocation3], 4294965248 }
  0x35   :  { %9342 = dma.done.wait [#allocation6], 2304  }
  0x36   :  { %9343 = vsyncadd [#allocation6], 4294964992  ;;  %vm120_vm0 = vcmask 130048   ;;  %v730_v0 = vld [vmem:[#allocation7] sm:$0xff]  ;;  %v731_v1 = vld [vmem:[#allocation7 + $0x8] sm:$0xff]  ;;  %s9351_s2 = smov 1  }
  0x37   :  { %v9429_v2 = vld [vmem:[#allocation5] sm:$0xff]  ;;  %v781_v3 = vand.u32 4294901760, %v730_v0  ;;  %v784_v4 = vand.u32 4294901760, %v731_v1  ;;  %v9433_v6 = vld [vmem:[#allocation5 + $0x8] sm:$0xff]  ;;  %v9435_v7 = vld [vmem:[#allocation5 + $0x10] sm:$0xff]  ;;  %s9352_s21 = smov 2  }
  0x38   :  { %v733_v5 = vsel %vm120_vm0, %v9429_v2, 0  ;;  %v736_v9 = vsel %vm120_vm0, %v9433_v6, 0  ;;  %v9441_v10 = vld [vmem:[#allocation5 + $0x18] sm:$0xff]  ;;  %v9443_v11 = vld [vmem:[#allocation5 + $0x20] sm:$0xff]  ;;  %v9445_v12 = vld [vmem:[#allocation5 + $0x28] sm:$0xff]  ;;  %v739_v15 = vsel %vm120_vm0, %v9435_v7, 0 }
  0x39   :  { %v9437_v8 = vand.u32 4294901760, %v733_v5  ;;  %v9447_v13 = vpack.c.bf16 %v784_v4, %v781_v3  ;;  %v9449_v14 = vand.u32 4294901760, %v736_v9  ;;  %v9456_v17 = vand.u32 4294901760, %v739_v15  ;;  %v9502_v40 = vld [vmem:[#allocation5 + $0x30] sm:$0xff]  ;;  %v9504_v41 = vld [vmem:[#allocation5 + $0x38] sm:$0xff]  ;;  %v9510_v50 = vld [vmem:[#allocation5 + $0x40] sm:$0xff] }
  0x3a   :  { %v9458_v18 = vsub.f32 %v730_v0, %v781_v3  ;;  %v9460_v19 = vsub.f32 %v731_v1, %v784_v4  ;;  %v742_v21 = vsel %vm120_vm0, %v9441_v10, 0  ;;  %v745_v22 = vsel %vm120_vm0, %v9443_v11, 0  ;;  %v9512_v51 = vld [vmem:[#allocation5 + $0x48] sm:$0xff]  ;;  %v9525_v60 = vld [vmem:[#allocation5 + $0x50] sm:$0xff]  ;;  %v9536_v1 = vld [vmem:[#allocation5 + $0x58] sm:$0xff]  ;;  %s9353_s22 = smov 127  }
  0x3b   :  { %v9454_v16 = vsub.f32 %v733_v5, %v9437_v8  ;;  %8690 = vmatprep.subr.bf16.mxu0 %v9447_v13  ;;  %8678 = vmatprep.subr.bf16.mxu1 %v9447_v13  ;;  %v9465_v20 = vsub.f32 %v736_v9, %v9449_v14  ;;  %v748_v23 = vsel %vm120_vm0, %v9445_v12, 0  ;;  %v9477_v25 = vsub.f32 %v739_v15, %v9456_v17  ;;  %v9538_v3 = vld [vmem:[#allocation5 + $0x60] sm:$0xff]  ;;  %s9354_s23 = smov 113   ;;  %s9355_s24 = smov 126  }
  0x3c   :  { %8692 = vmatpush3.bf16.msra.mxu0 %v9447_v13  ;;  %8680 = vmatpush3.bf16.msra.mxu1 %v9447_v13  ;;  %v1010_v26 = vand.u32 4294901760, %v9458_v18  ;;  %v1017_v27 = vand.u32 4294901760, %v9460_v19  ;;  %v9482_v29 = vand.u32 4294901760, %v742_v21  ;;  %v9484_v30 = vand.u32 4294901760, %v745_v22  ;;  %s9356_s12 = smov [#allocation8]  }
  0x3d   :  { %v849_v24 = vand.u32 4294901760, %v9454_v16  ;;  %v859_v28 = vand.u32 4294901760, %v9465_v20  ;;  %v9486_v31 = vand.u32 4294901760, %v748_v23  ;;  %v869_v33 = vand.u32 4294901760, %v9477_v25  ;;  %s7287_s13 = sshll.u32 %s9356_s12, 4  ;;  %s7288_s13 = int_to_ptr.vmem [resolvable:$true] %s7287_s13 }
  0x3e   :  { %v1011_v34 = vsub.f32 %v9458_v18, %v1010_v26  ;;  %v1018_v35 = vsub.f32 %v9460_v19, %v1017_v27  ;;  %v9494_v37 = vsub.f32 %v742_v21, %v9482_v29  ;;  %v9497_v38 = vsub.f32 %v745_v22, %v9484_v30  ;;  %s9318_s14 = scalar_lea.vmem %s7288_s13, 128  ;;  %p9323_p11 = scmp.lt.s32.totalorder %s7288_s13, %s7288_s13 }
  0x3f   :  { %7925 = vmatprep.mubr.f32.mxu0 %v849_v24  ;;  %v850_v32 = vsub.f32 %v9454_v16, %v849_v24  ;;  %v860_v36 = vsub.f32 %v9465_v20, %v859_v28  ;;  %v9500_v39 = vsub.f32 %v748_v23, %v9486_v31  ;;  %v870_v45 = vsub.f32 %v9477_v25, %v869_v33  ;;  %p9319_p10 = scmp.ne.s32.totalorder %s7288_s13, %s9318_s14  ;;  %p9324_p12 = scmp.lt.s32.totalorder %s9318_s14, %s9318_s14 }
  0x40   :  { %7926 = vmatmul.mubr.f32.vlgmr.msra.gmra.mrb[0].mxu0 %v859_v28  ;;  %v1012_v43 = vand.u32 4294901760, %v1011_v34  ;;  %v1019_v44 = vand.u32 4294901760, %v1018_v35  ;;  %v879_v47 = vand.u32 4294901760, %v9494_v37  ;;  %v889_v48 = vand.u32 4294901760, %v9497_v38 }
  0x41   :  { %v851_v42 = vand.u32 4294901760, %v850_v32  ;;  %7928 = vmatprep.mubr.f32.mxu0 %v869_v33  ;;  %v861_v46 = vand.u32 4294901760, %v860_v36  ;;  %v899_v49 = vand.u32 4294901760, %v9500_v39  ;;  %v871_v53 = vand.u32 4294901760, %v870_v45  ;;  %p9325_p13 = por %p9324_p12, %p9323_p11 }
  0x42   :  { %v9514_v52 = vpack.c.bf16 %v1019_v44, %v1012_v43  ;;  %v751_v54 = vsel %vm120_vm0, %v9502_v40, 0  ;;  %v754_v55 = vsel %vm120_vm0, %v9504_v41, 0  ;;  %v880_v56 = vsub.f32 %v9494_v37, %v879_v47 }
  0x43   :  { %7841 = vmatprep.mubr.f32.mxu1 %v851_v42  ;;  %v890_v57 = vsub.f32 %v9497_v38, %v889_v48  ;;  %v9522_v58 = vand.u32 4294901760, %v751_v54  ;;  %v900_v59 = vsub.f32 %v9500_v39, %v899_v49  ;;  %v9528_v61 = vand.u32 4294901760, %v754_v55  ;;  %p9326_p0 = pnand %p9325_p13, %p9319_p10 }
  0x44   :  { %12427 = vst [vmem:[#allocation12_spill] sm:$0xff] %v9514_v52  ;;  %7842 = vmatmul.mubr.f32.vlgmr.msra.gmra.mrb[0].mxu1 %v861_v46  ;;  %7929 = vmatmul.mubr.f32.gmra.mrb[2].mxu0 %v879_v47  ;;  %v757_v62 = vsel %vm120_vm0, %v9510_v50, 0  ;;  %v9532_v63 = vpack.c.bf16 %v1017_v27, %v1010_v26  ;;  %v760_v0 = vsel %vm120_vm0, %v9512_v51, 0  ;;  %v881_v4 = vand.u32 4294901760, %v880_v56  ;;  %v9554_v26 = vld [vmem:[#allocation5 + $0x68] sm:$0xff] }
  0x45   :  { %8682 = vmatprep.subr.bf16.mxu1 %v9514_v52  ;;  %7844 = vmatprep.mubr.f32.mxu1 %v871_v53  ;;  %v891_v5 = vand.u32 4294901760, %v890_v57  ;;  %v9542_v9 = vsub.f32 %v751_v54, %v9522_v58  ;;  %v901_v15 = vand.u32 4294901760, %v900_v59  ;;  %v9545_v21 = vsub.f32 %v754_v55, %v9528_v61  ;;  %12429 = vst [vmem:[#allocation14_spill] sm:$0xff] %v9554_v26  ;;  %v9588_v54 = vld [vmem:[#allocation5 + $0x70] sm:$0xff] }
  0x46   :  { %12428 = vst [vmem:[#allocation13_spill] sm:$0xff] %v9532_v63  ;;  %8684 = vmatpush3.bf16.msra.mxu1 %v9514_v52  ;;  %7931 = vmatprep.mubr.f32.mxu0 %v889_v48  ;;  %v9547_v22 = vand.u32 4294901760, %v757_v62  ;;  %v9550_v23 = vand.u32 4294901760, %v760_v0  ;;  %v763_v24 = vsel %vm120_vm0, %v9525_v60, 0  ;;  %v766_v32 = vsel %vm120_vm0, %v9536_v1, 0  ;;  %12430 = vst [vmem:[#allocation15_spill] sm:$0xff] %v9588_v54 }
  0x47   :  { %8694 = vmatprep.subr.bf16.mxu0 %v9532_v63  ;;  %v909_v27 = vand.u32 4294901760, %v9542_v9  ;;  %v9557_v28 = vand.u32 4294901760, %v763_v24  ;;  %v769_v33 = vsel %vm120_vm0, %v9538_v3, 0  ;;  %v919_v34 = vand.u32 4294901760, %v9545_v21 }
  0x48   :  { %7845 = vmatmul.mubr.f32.gmra.mrb[2].mxu1 %v881_v4  ;;  %7932 = vmatmul.mubr.f32.gmra.mrb[4].mxu0 %v899_v49  ;;  %v9565_v35 = vsub.f32 %v757_v62, %v9547_v22  ;;  %v9568_v36 = vsub.f32 %v760_v0, %v9550_v23  ;;  %v9571_v42 = vand.u32 4294901760, %v766_v32  ;;  %v9577_v45 = vand.u32 4294901760, %v769_v33 }
  0x49   :  { %7847 = vmatprep.mubr.f32.mxu1 %v891_v5  ;;  %8696 = vmatpush3.bf16.msra.mxu0 %v9532_v63  ;;  %v910_v43 = vsub.f32 %v9542_v9, %v909_v27  ;;  %v9575_v44 = vsub.f32 %v763_v24, %v9557_v28  ;;  %v772_v46 = vsel %vm120_vm0, %v9554_v26, 0  ;;  %v920_v48 = vsub.f32 %v9545_v21, %v919_v34  ;;  %v9599_v24 = vld [vmem:[#allocation5 + $0x78] sm:$0xff] }
  0x4a   :  { %7934 = vmatprep.mubr.f32.mxu0 %v909_v27  ;;  %8698 = vmatprep.subr.bf16.mxu0 %v9447_v13  ;;  %v929_v47 = vand.u32 4294901760, %v9565_v35  ;;  %v939_v49 = vand.u32 4294901760, %v9568_v36  ;;  %v9586_v53 = vsub.f32 %v766_v32, %v9571_v42  ;;  %v9592_v57 = vsub.f32 %v769_v33, %v9577_v45  ;;  %12431 = vst [vmem:[#allocation16_spill] sm:$0xff] %v9599_v24 }
  0x4b   :  { %v911_v55 = vand.u32 4294901760, %v910_v43  ;;  %v949_v56 = vand.u32 4294901760, %v9575_v44  ;;  %v9594_v59 = vand.u32 4294901760, %v772_v46  ;;  %v921_v62 = vand.u32 4294901760, %v920_v48 }
  0x4c   :  { %7848 = vmatmul.mubr.f32.gmra.mrb[4].mxu1 %v901_v15  ;;  %7935 = vmatmul.mubr.f32.gmra.mrb[6].mxu0 %v919_v34  ;;  %v930_v0 = vsub.f32 %v9565_v35, %v929_v47  ;;  %v940_v4 = vsub.f32 %v9568_v36, %v939_v49  ;;  %v959_v5 = vand.u32 4294901760, %v9586_v53  ;;  %v969_v27 = vand.u32 4294901760, %v9592_v57 }
  0x4d   :  { %7937 = vmatprep.mubr.f32.mxu0 %v929_v47  ;;  %7850 = vmatprep.mubr.f32.mxu1 %v911_v55  ;;  %v950_v15 = vsub.f32 %v9575_v44, %v949_v56  ;;  %v9604_v32 = vsub.f32 %v772_v46, %v9594_v59  ;;  %v775_v33 = vsel %vm120_vm0, %v9588_v54, 0  ;;  %v778_v26 = vsel %vm120_vm0, %v9599_v24, 0 }
  0x4e   :  { %v931_v34 = vand.u32 4294901760, %v930_v0  ;;  %v941_v43 = vand.u32 4294901760, %v940_v4  ;;  %v9608_v47 = vand.u32 4294901760, %v775_v33  ;;  %v960_v63 = vsub.f32 %v9586_v53, %v959_v5 }
  0x4f   :  { %v951_v48 = vand.u32 4294901760, %v950_v15  ;;  %v979_v55 = vand.u32 4294901760, %v9604_v32  ;;  %v970_v46 = vsub.f32 %v9592_v57, %v969_v27  ;;  %v9618_v0 = vand.u32 4294901760, %v778_v26 }
  0x50   :  { %7851 = vmatmul.mubr.f32.gmra.mrb[6].mxu1 %v921_v62  ;;  %7938 = vmatmul.mubr.f32.gmra.mrb[8].mxu0 %v939_v49  ;;  %v9616_v54 = vsub.f32 %v775_v33, %v9608_v47  ;;  %v9622_v49 = vpack.c.bf16 %v9460_v19, %v9458_v18  ;;  %vm412_vm1 = vcmask 7168   ;;  %vm686_vm2 = vcmask 113664  }
  0x51   :  { %7853 = vmatprep.mubr.f32.mxu1 %v931_v34  ;;  %7940 = vmatprep.mubr.f32.mxu0 %v949_v56  ;;  %v9626_v4 = vsub.f32 %v778_v26, %v9618_v0  ;;  %v961_v56 = vand.u32 4294901760, %v960_v63  ;;  %v980_v15 = vsub.f32 %v9604_v32, %v979_v55  ;;  %v971_v33 = vand.u32 4294901760, %v970_v46 }
  0x52   :  { %12432 = vst [vmem:[#allocation17_spill] sm:$0xff] %v9622_v49  ;;  %v989_v62 = vand.u32 4294901760, %v9616_v54  ;;  %8686 = vmatprep.subr.bf16.mxu1 %v9622_v49  ;;  %v3279_v46 = vmul.f32 %v9441_v10, %v9441_v10  ;;  %vm7248_vm3 = vcmask 48128  }
  0x53   :  { %v999_v34 = vand.u32 4294901760, %v9626_v4  ;;  %v981_v19 = vand.u32 4294901760, %v980_v15 }
  0x54   :  { %7854 = vmatmul.mubr.f32.gmra.mrb[8].mxu1 %v941_v43  ;;  %7941 = vmatmul.mubr.f32.gmra.mrb[10].mxu0 %v959_v5  ;;  %v990_v18 = vsub.f32 %v9616_v54, %v989_v62  ;;  %v3277_v5 = vmul.f32 %v9433_v6, %v9433_v6  ;;  %v3278_v43 = vmul.f32 %v9435_v7, %v9435_v7 }
  0x55   :  { %7856 = vmatprep.mubr.f32.mxu1 %v951_v48  ;;  %7943 = vmatprep.mubr.f32.mxu0 %v969_v27  ;;  %v1000_v26 = vsub.f32 %v9626_v4, %v999_v34  ;;  %v9667_v27 = vld [vmem:[#allocation2] sm:$0xff] }
  0x56   :  { %v991_v24 = vand.u32 4294901760, %v990_v18  ;;  %12433 = vst [vmem:[#allocation18_spill] sm:$0xff] %v9667_v27  ;;  %v3296_v6 = vsel %vm120_vm0, %v3277_v5, 0 }
  0x57   :  { %v1001_v63 = vand.u32 4294901760, %v1000_v26  ;;  %v9713_v26 = vld [vmem:[#allocation2 + $0x10] sm:$0xff] }
  0x58   :  { %7857 = vmatmul.mubr.f32.gmra.mrb[10].mxu1 %v961_v56  ;;  %7944 = vmatmul.mubr.f32.gmra.mrb[12].mxu0 %v979_v55  ;;  %v9677_v55 = vld [vmem:[#allocation2 + $0x8] sm:$0xff]  ;;  %v3299_v56 = vsel %vm120_vm0, %v3278_v43, 0  ;;  %12438 = vst [vmem:[#allocation23_spill] sm:$0xff] %v9713_v26  ;;  %v9729_v43 = vld [vmem:[#allocation2 + $0x20] sm:$0xff] }
  0x59   :  { %7859 = vmatprep.mubr.f32.mxu1 %v971_v33  ;;  %7946 = vmatprep.mubr.f32.mxu0 %v989_v62  ;;  %12434 = vst [vmem:[#allocation19_spill] sm:$0xff] %v9677_v55  ;;  %v9687_v62 = vand.u32 4294901760, %v3296_v6  ;;  %v2008_v33 = vsel %vm120_vm0, %v9677_v55, 0  ;;  %v9696_v10 = vand.u32 4294901760, %v3299_v56  ;;  %12441 = vst [vmem:[#allocation26_spill] sm:$0xff] %v9729_v43  ;;  %v9795_v55 = vld [vmem:[#allocation2 + $0x30] sm:$0xff] }
  0x5a   :  { %12448 = vst [vmem:[#allocation30_spill] sm:$0xff] %v9795_v55 }
  0x5b   :  { %v9705_v18 = vsub.f32 %v3296_v6, %v9687_v62 }
  0x5c   :  { %7860 = vmatmul.mubr.f32.gmra.mrb[12].mxu1 %v981_v19  ;;  %7947 = vmatmul.mubr.f32.gmra.mrb[14].mxu0 %v999_v34  ;;  %v3302_v34 = vsel %vm120_vm0, %v3279_v46, 0 }
  0x5d   :  { %7862 = vmatprep.mubr.f32.mxu1 %v991_v24  ;;  %7953 = vmatprep.mubr.f32.mxu0 %v9437_v8  ;;  %v3276_v24 = vmul.f32 %v9429_v2, %v9429_v2  ;;  %v2005_v2 = vsel %vm120_vm0, %v9667_v27, 0  ;;  %12436 = vst [vmem:[#allocation21_spill] sm:$0xff] %v9705_v18  ;;  %v9721_v5 = vand.u32 4294901760, %v3302_v34 }
  0x5e   :  { %v9690_v15 = vand.u32 4294901760, %v2005_v2 }
  0x5f   :  { %v3293_v48 = vsel %vm120_vm0, %v3276_v24, 0  ;;  %v9727_v24 = vsub.f32 %v3299_v56, %v9696_v10  ;;  %v9750_v56 = vsub.f32 %v3302_v34, %v9721_v5  ;;  %v3283_v34 = vmul.f32 %v9504_v41, %v9504_v41 }
  0x60   :  { %7863 = vmatmul.mubr.f32.gmra.mrb[14].mxu1 %v1001_v63  ;;  %7954 = vmatmul.mubr.f32.vlgmr.msra.gmra.mrb[0].mxu0 %v9449_v14  ;;  %v9685_v7 = vand.u32 4294901760, %v3293_v48  ;;  %v9709_v19 = vsub.f32 %v2005_v2, %v9690_v15  ;;  %v9717_v63 = vld [vmem:[#allocation2 + $0x18] sm:$0xff] }
  0x61   :  { %7869 = vmatprep.mubr.f32.mxu1 %v9437_v8  ;;  %7956 = vmatprep.mubr.f32.mxu0 %v9456_v17  ;;  %12439 = vst [vmem:[#allocation24_spill] sm:$0xff] %v9717_v63  ;;  %12440 = vst [vmem:[#allocation25_spill] sm:$0xff] %v9727_v24 }
  0x62   :  { %8700 = vmatpush3.bf16.msra.mxu0 %v9447_v13  ;;  %12437 = vst [vmem:[#allocation22_spill] sm:$0xff] %v9709_v19  ;;  %12444 = vst [vmem:[#allocation29_spill] sm:$0xff] %v9750_v56 }
  0x63   :  { %8726 = vmatprep.subr.bf16.mxu0 %v9447_v13 }
  0x64   :  { %7870 = vmatmul.mubr.f32.vlgmr.msra.gmra.mrb[0].mxu1 %v9449_v14  ;;  %7957 = vmatmul.mubr.f32.gmra.mrb[2].mxu0 %v9482_v29 }
  0x65   :  { %8688 = vmatpush3.bf16.msra.mxu1 %v9622_v49  ;;  %7872 = vmatprep.mubr.f32.mxu1 %v9456_v17 }
  0x66   :  { %7959 = vmatprep.mubr.f32.mxu0 %v9484_v30  ;;  %8702 = vmatprep.subr.bf16.mxu1 %v9447_v13 }
  0x68   :  { %7873 = vmatmul.mubr.f32.gmra.mrb[2].mxu1 %v9482_v29  ;;  %7960 = vmatmul.mubr.f32.gmra.mrb[4].mxu0 %v9486_v31 }
  0x69   :  { %7875 = vmatprep.mubr.f32.mxu1 %v9484_v30  ;;  %7962 = vmatprep.mubr.f32.mxu0 %v9522_v58 }
  0x6c   :  { %7876 = vmatmul.mubr.f32.gmra.mrb[4].mxu1 %v9486_v31  ;;  %7963 = vmatmul.mubr.f32.gmra.mrb[6].mxu0 %v9528_v61 }
  0x6d   :  { %7878 = vmatprep.mubr.f32.mxu1 %v9522_v58  ;;  %7965 = vmatprep.mubr.f32.mxu0 %v9547_v22 }
  0x70   :  { %7879 = vmatmul.mubr.f32.gmra.mrb[6].mxu1 %v9528_v61  ;;  %7966 = vmatmul.mubr.f32.gmra.mrb[8].mxu0 %v9550_v23 }
  0x71   :  { %7881 = vmatprep.mubr.f32.mxu1 %v9547_v22  ;;  %7968 = vmatprep.mubr.f32.mxu0 %v9557_v28 }
  0x74   :  { %7882 = vmatmul.mubr.f32.gmra.mrb[8].mxu1 %v9550_v23  ;;  %7969 = vmatmul.mubr.f32.gmra.mrb[10].mxu0 %v9571_v42 }
  0x75   :  { %7884 = vmatprep.mubr.f32.mxu1 %v9557_v28  ;;  %7971 = vmatprep.mubr.f32.mxu0 %v9577_v45 }
  0x78   :  { %7885 = vmatmul.mubr.f32.gmra.mrb[10].mxu1 %v9571_v42  ;;  %7972 = vmatmul.mubr.f32.gmra.mrb[12].mxu0 %v9594_v59 }
  0x79   :  { %7887 = vmatprep.mubr.f32.mxu1 %v9577_v45  ;;  %7974 = vmatprep.mubr.f32.mxu0 %v9608_v47 }
  0x7c   :  { %7888 = vmatmul.mubr.f32.gmra.mrb[12].mxu1 %v9594_v59  ;;  %7975 = vmatmul.mubr.f32.gmra.mrb[14].mxu0 %v9618_v0 }
  0x7d   :  { %7890 = vmatprep.mubr.f32.mxu1 %v9608_v47  ;;  %7981 = vmatprep.mubr.f32.mxu0 %v9437_v8  ;;  %v9702_v8 = vsub.f32 %v3293_v48, %v9685_v7  ;;  %v9731_v48 = vld [vmem:[#allocation2 + $0x28] sm:$0xff] }
  0x7e   :  { %12442 = vst [vmem:[#allocation27_spill] sm:$0xff] %v9731_v48  ;;  %v2020_v6 = vsel %vm120_vm0, %v9731_v48, 0 }
  0x7f   :  { %12435 = vst [vmem:[#allocation20_spill] sm:$0xff] %v9702_v8  ;;  %v9785_v41 = vand.u32 4294901760, %v2020_v6 }
  0x80   :  { %7891 = vmatmul.mubr.f32.gmra.mrb[14].mxu1 %v9618_v0  ;;  %7982 = vmatmul.mubr.f32.vlgmr.msra.gmra.mrb[0].mxu0 %v9449_v14  ;;  %v9711_v14 = vand.u32 4294901760, %v2008_v33 }
  0x81   :  { %7897 = vmatprep.mubr.f32.mxu1 %v9454_v16  ;;  %7984 = vmatprep.mubr.f32.mxu0 %v9456_v17  ;;  %v3280_v16 = vmul.f32 %v9443_v11, %v9443_v11  ;;  %v3281_v17 = vmul.f32 %v9445_v12, %v9445_v12  ;;  %v2017_v12 = vsel %vm120_vm0, %v9729_v43, 0 }
  0x82   :  { %8728 = vmatpush3.bf16.msra.mxu0 %v9447_v13  ;;  %v9744_v2 = vsub.f32 %v2008_v33, %v9711_v14  ;;  %v12446_v33 = vand.u32 4294901760, %v9705_v18  ;;  %v9783_v43 = vand.u32 4294901760, %v2017_v12 }
  0x83   :  { %8730 = vmatprep.subr.bf16.mxu0 %v9514_v52  ;;  %v3308_v46 = vsel %vm120_vm0, %v3281_v17, 0 }
  0x84   :  { %7898 = vmatmul.mubr.f32.vlgmr.msra.gmra.mrb[0].mxu1 %v9465_v20  ;;  %7985 = vmatmul.mubr.f32.gmra.mrb[2].mxu0 %v9482_v29  ;;  %v2011_v20 = vsel %vm120_vm0, %v9713_v26, 0  ;;  %v2014_v29 = vsel %vm120_vm0, %v9717_v63, 0  ;;  %12443 = vst [vmem:[#allocation28_spill] sm:$0xff] %v9744_v2  ;;  %v9771_v11 = vand.u32 4294901760, %v3308_v46  ;;  %v9781_v48 = vsub.f32 %v9705_v18, %v12446_v33 }
  0x85   :  { %8704 = vmatpush3.bf16.msra.mxu1 %v9447_v13  ;;  %7900 = vmatprep.mubr.f32.mxu1 %v9477_v25  ;;  %v3305_v25 = vsel %vm120_vm0, %v3280_v16, 0  ;;  %v9761_v16 = vand.u32 4294901760, %v2011_v20  ;;  %v9763_v17 = vand.u32 4294901760, %v2014_v29  ;;  %v12449_v33 = vand.u32 4294901760, %v9727_v24 }
  0x86   :  { %7987 = vmatprep.mubr.f32.mxu0 %v9484_v30  ;;  %8706 = vmatprep.subr.bf16.mxu1 %v9514_v52  ;;  %v3282_v30 = vmul.f32 %v9502_v40, %v9502_v40  ;;  %v9769_v40 = vand.u32 4294901760, %v3305_v25  ;;  %v3314_v26 = vsel %vm120_vm0, %v3283_v34, 0  ;;  %v9827_v34 = vsub.f32 %v2020_v6, %v9785_v41 }
  0x87   :  { %v9802_v27 = vsub.f32 %v9727_v24, %v12449_v33  ;;  %v9808_v63 = vsub.f32 %v2014_v29, %v9763_v17  ;;  %v12457_v6 = vand.u32 4294901760, %v9750_v56 }
  0x88   :  { %7901 = vmatmul.mubr.f32.gmra.mrb[2].mxu1 %v9494_v37  ;;  %7988 = vmatmul.mubr.f32.gmra.mrb[4].mxu0 %v9486_v31  ;;  %v12445_v37 = vand.u32 4294901760, %v9702_v8  ;;  %12455 = vst [vmem:[#allocation36_spill] sm:$0xff] %v9827_v34 }
  0x89   :  { %7903 = vmatprep.mubr.f32.mxu1 %v9497_v38  ;;  %7990 = vmatprep.mubr.f32.mxu0 %v9522_v58  ;;  %v12447_v38 = vand.u32 4294901760, %v9709_v19  ;;  %12451 = vst [vmem:[#allocation32_spill] sm:$0xff] %v9808_v63 }
  0x8a   :  { %v9776_v31 = vsub.f32 %v9702_v8, %v12445_v37  ;;  %v3311_v37 = vsel %vm120_vm0, %v3282_v30, 0  ;;  %v3284_v30 = vmul.f32 %v9510_v50, %v9510_v50  ;;  %v9838_v50 = vand.u32 4294901760, %v3314_v26  ;;  %v10088_v8 = vld [vmem:[#allocation2 + $0x78] sm:$0xff] }
  0x8b   :  { %v9790_v58 = vsub.f32 %v9709_v19, %v12447_v38  ;;  %v9805_v38 = vsub.f32 %v2011_v20, %v9761_v16  ;;  %v9822_v20 = vsub.f32 %v2017_v12, %v9783_v43  ;;  %v9824_v29 = vand.u32 4294901760, %v3311_v37  ;;  %12511 = vst [vmem:[#allocation62_spill] sm:$0xff] %v10088_v8 }
  0x8c   :  { %7904 = vmatmul.mubr.f32.gmra.mrb[4].mxu1 %v9500_v39  ;;  %7991 = vmatmul.mubr.f32.gmra.mrb[6].mxu0 %v9528_v61  ;;  %v9814_v39 = vsub.f32 %v3305_v25, %v9769_v40  ;;  %v9817_v61 = vsub.f32 %v3308_v46, %v9771_v11  ;;  %v12456_v46 = vand.u32 4294901760, %v9744_v2  ;;  %v3317_v12 = vsel %vm120_vm0, %v3284_v30, 0  ;;  %v9871_v30 = vld [vmem:[#allocation2 + $0x40] sm:$0xff] }
  0x8d   :  { %12450 = vst [vmem:[#allocation31_spill] sm:$0xff] %v9805_v38  ;;  %7906 = vmatprep.mubr.f32.mxu1 %v9542_v9  ;;  %7993 = vmatprep.mubr.f32.mxu0 %v9547_v22  ;;  %12454 = vst [vmem:[#allocation35_spill] sm:$0xff] %v9822_v20  ;;  %v2023_v9 = vsel %vm120_vm0, %v9795_v55, 0  ;;  %v9846_v55 = vsub.f32 %v9750_v56, %v12457_v6  ;;  %v9862_v22 = vsub.f32 %v3311_v37, %v9824_v29 }
  0x8e   :  { %12452 = vst [vmem:[#allocation33_spill] sm:$0xff] %v9814_v39  ;;  %12453 = vst [vmem:[#allocation34_spill] sm:$0xff] %v9817_v61  ;;  %v9836_v33 = vsub.f32 %v9744_v2, %v12456_v46  ;;  %v9857_v2 = vld [vmem:[#allocation2 + $0x38] sm:$0xff]  ;;  %v9867_v46 = vsub.f32 %v3314_v26, %v9838_v50  ;;  %v3286_v6 = vmul.f32 %v9525_v60, %v9525_v60  ;;  %v12462_v37 = vand.u32 4294901760, %v9805_v38 }
  0x8f   :  { %12458 = vst [vmem:[#allocation37_spill] sm:$0xff] %v9857_v2  ;;  %12459 = vst [vmem:[#allocation38_spill] sm:$0xff] %v9862_v22  ;;  %v12463_v26 = vand.u32 4294901760, %v9808_v63  ;;  %v2026_v25 = vsel %vm120_vm0, %v9857_v2, 0  ;;  %v12467_v2 = vand.u32 4294901760, %v9822_v20  ;;  %v12468_v60 = vand.u32 4294901760, %v9827_v34 }
  0x90   :  { %7907 = vmatmul.mubr.f32.gmra.mrb[6].mxu1 %v9545_v21  ;;  %7994 = vmatmul.mubr.f32.gmra.mrb[8].mxu0 %v9550_v23  ;;  %v9854_v23 = vand.u32 4294901760, %v2023_v9  ;;  %12460 = vst [vmem:[#allocation39_spill] sm:$0xff] %v9867_v46  ;;  %v3285_v21 = vmul.f32 %v9512_v51, %v9512_v51  ;;  %12461 = vst [vmem:[#allocation40_spill] sm:$0xff] %v9871_v30  ;;  %v9887_v51 = vand.u32 4294901760, %v3317_v12  ;;  %v12494_v24 = vand.u32 4294901760, %v9790_v58  ;;  %v10036_v58 = vld [vmem:[#allocation2 + $0x68] sm:$0xff] }
  0x91   :  { %7909 = vmatprep.mubr.f32.mxu1 %v9565_v35  ;;  %7996 = vmatprep.mubr.f32.mxu0 %v9557_v28  ;;  %v9880_v35 = vsub.f32 %v9805_v38, %v12462_v37  ;;  %v9885_v28 = vsub.f32 %v9808_v63, %v12463_v26  ;;  %v12465_v37 = vand.u32 4294901760, %v9817_v61  ;;  %v3323_v38 = vsel %vm120_vm0, %v3286_v6, 0 }
  0x92   :  { %v9905_v63 = vsub.f32 %v2023_v9, %v9854_v23  ;;  %v3320_v9 = vsel %vm120_vm0, %v3285_v21, 0  ;;  %v9954_v21 = vand.u32 4294901760, %v3323_v38 }
  0x93   :  { %v9902_v26 = vsub.f32 %v9817_v61, %v12465_v37  ;;  %v9921_v61 = vand.u32 4294901760, %v2026_v25  ;;  %v3287_v37 = vmul.f32 %v9536_v1, %v9536_v1  ;;  %v12474_v1 = vand.u32 4294901760, %v9862_v22 }
  0x94   :  { %7910 = vmatmul.mubr.f32.gmra.mrb[8].mxu1 %v9568_v36  ;;  %7997 = vmatmul.mubr.f32.gmra.mrb[10].mxu0 %v9571_v42  ;;  %v12464_v36 = vand.u32 4294901760, %v9814_v39  ;;  %12466 = vst [vmem:[#allocation41_spill] sm:$0xff] %v9905_v63  ;;  %12476 = vst [vmem:[#allocation48_spill] sm:$0xff] %v9954_v21  ;;  %v12504_v18 = vand.u32 4294901760, %v9880_v35 }
  0x95   :  { %7912 = vmatprep.mubr.f32.mxu1 %v9575_v44  ;;  %7999 = vmatprep.mubr.f32.mxu0 %v9577_v45  ;;  %v9910_v44 = vsub.f32 %v9822_v20, %v12467_v2  ;;  %12469 = vst [vmem:[#allocation42_spill] sm:$0xff] %v9921_v61  ;;  %v9930_v45 = vsub.f32 %v3317_v12, %v9887_v51  ;;  %v9942_v2 = vld [vmem:[#allocation2 + $0x50] sm:$0xff] }
  0x96   :  { %v9897_v42 = vsub.f32 %v9814_v39, %v12464_v36  ;;  %v9916_v36 = vsub.f32 %v9827_v34, %v12468_v60  ;;  %v2029_v39 = vsel %vm120_vm0, %v9871_v30, 0  ;;  %12473 = vst [vmem:[#allocation46_spill] sm:$0xff] %v9942_v2  ;;  %v3288_v12 = vmul.f32 %v9538_v3, %v9538_v3 }
  0x97   :  { %12470 = vst [vmem:[#allocation43_spill] sm:$0xff] %v9930_v45  ;;  %v9938_v6 = vand.u32 4294901760, %v2029_v39  ;;  %v12477_v34 = vand.u32 4294901760, %v9867_v46  ;;  %v9964_v3 = vsub.f32 %v2026_v25, %v9921_v61  ;;  %v2035_v30 = vsel %vm120_vm0, %v9942_v2, 0 }
  0x98   :  { %7913 = vmatmul.mubr.f32.gmra.mrb[10].mxu1 %v9586_v53  ;;  %8000 = vmatmul.mubr.f32.gmra.mrb[12].mxu0 %v9594_v59  ;;  %v9940_v59 = vld [vmem:[#allocation2 + $0x48] sm:$0xff]  ;;  %v3326_v53 = vsel %vm120_vm0, %v3287_v37, 0  ;;  %v12480_v25 = vand.u32 4294901760, %v9905_v63 }
  0x99   :  { %7915 = vmatprep.mubr.f32.mxu1 %v9592_v57  ;;  %8002 = vmatprep.mubr.f32.mxu0 %v9608_v47  ;;  %12471 = vst [vmem:[#allocation44_spill] sm:$0xff] %v9938_v6  ;;  %12472 = vst [vmem:[#allocation45_spill] sm:$0xff] %v9940_v59  ;;  %v9950_v57 = vsub.f32 %v9862_v22, %v12474_v1  ;;  %v9952_v47 = vand.u32 4294901760, %v3320_v9  ;;  %v9961_v20 = vsub.f32 %v9867_v46, %v12477_v34  ;;  %v12483_v37 = vld [vmem:[#allocation14_spill] sm:$0xff] }
  0x9a   :  { %12478 = vst [vmem:[#allocation49_spill] sm:$0xff] %v9964_v3  ;;  %v2032_v60 = vsel %vm120_vm0, %v9940_v59, 0  ;;  %v12479_v34 = vand.u32 4294901760, %v9776_v31  ;;  %v3329_v1 = vsel %vm120_vm0, %v3288_v12, 0  ;;  %v9986_v59 = vld [vmem:[#allocation2 + $0x58] sm:$0xff]  ;;  %v3289_v2 = vmul.f32 %v12483_v37, %v12483_v37  ;;  %v10006_v37 = vld [vmem:[#allocation2 + $0x60] sm:$0xff] }
  0x9b   :  { %12475 = vst [vmem:[#allocation47_spill] sm:$0xff] %v9952_v47  ;;  %12482 = vst [vmem:[#allocation51_spill] sm:$0xff] %v9986_v59  ;;  %v9992_v31 = vsub.f32 %v3320_v9, %v9952_v47  ;;  %v10000_v46 = vand.u32 4294901760, %v2032_v60  ;;  %v10002_v12 = vand.u32 4294901760, %v3326_v53  ;;  %v10004_v22 = vand.u32 4294901760, %v2035_v30 }
  0x9c   :  { %7916 = vmatmul.mubr.f32.gmra.mrb[12].mxu1 %v9604_v32  ;;  %8003 = vmatmul.mubr.f32.gmra.mrb[14].mxu0 %v9618_v0  ;;  %v9980_v32 = vsub.f32 %v9905_v63, %v12480_v25  ;;  %v9983_v0 = vsub.f32 %v2029_v39, %v9938_v6  ;;  %v12486_v25 = vld [vmem:[#allocation15_spill] sm:$0xff]  ;;  %12490 = vst [vmem:[#allocation55_spill] sm:$0xff] %v10006_v37  ;;  %v12491_v9 = vand.u32 4294901760, %v9781_v48  ;;  %v10017_v39 = vand.u32 4294901760, %v3329_v1 }
  0x9d   :  { %7918 = vmatprep.mubr.f32.mxu1 %v9616_v54  ;;  %8177 = vmatprep.mubr.f32.mxu0 %v12479_v34  ;;  %v3471_v54 = vand.u32 4294901760, %v9950_v57  ;;  %12484 = vst [vmem:[#allocation14_spill] sm:$0xff] %v9992_v31  ;;  %v9995_v34 = vsub.f32 %v3323_v38, %v9954_v21  ;;  %v3290_v63 = vmul.f32 %v12486_v25, %v12486_v25  ;;  %12487 = vst [vmem:[#allocation15_spill] sm:$0xff] %v10000_v46 }
  0x9e   :  { %12481 = vst [vmem:[#allocation50_spill] sm:$0xff] %v9983_v0  ;;  %12488 = vst [vmem:[#allocation53_spill] sm:$0xff] %v10002_v12  ;;  %v12492_v38 = vand.u32 4294901760, %v9930_v45  ;;  %v2038_v56 = vsel %vm120_vm0, %v9986_v59, 0  ;;  %v12500_v59 = vand.u32 4294901760, %v9836_v33 }
  0x9f   :  { %12485 = vst [vmem:[#allocation52_spill] sm:$0xff] %v9995_v34  ;;  %12489 = vst [vmem:[#allocation54_spill] sm:$0xff] %v10004_v22  ;;  %v10047_v48 = vand.u32 4294901760, %v2038_v56  ;;  %v12510_v35 = vand.u32 4294901760, %v9995_v34 }
  0xa0   :  { %7919 = vmatmul.mubr.f32.gmra.mrb[14].mxu1 %v9626_v4  ;;  %8178 = vmatmul.mubr.f32.vlgmr.msra.gmra.mrb[16].mxu0 %v12491_v9  ;;  %v10014_v57 = vsub.f32 %v9930_v45, %v12492_v38  ;;  %12493 = vst [vmem:[#allocation56_spill] sm:$0xff] %v10017_v39  ;;  %v12495_v4 = vand.u32 4294901760, %v9802_v27  ;;  %v3332_v38 = vsel %vm120_vm0, %v3289_v2, 0  ;;  %v12496_v45 = vld [vmem:[#allocation16_spill] sm:$0xff]  ;;  %v3335_v27 = vsel %vm120_vm0, %v3290_v63, 0  ;;  %v10049_v9 = vld [vmem:[#allocation2 + $0x70] sm:$0xff] }
  0xa1   :  { %8009 = vmatprep.mubr.f32.mxu1 %v12494_v24  ;;  %v3291_v25 = vmul.f32 %v12496_v45, %v12496_v45  ;;  %8732 = vmatpush3.bf16.msra.mxu0 %v9514_v52  ;;  %v2041_v24 = vsel %vm120_vm0, %v10006_v37, 0  ;;  %12497 = vst [vmem:[#allocation16_spill] sm:$0xff] %v10036_v58  ;;  %v10042_v2 = vsub.f32 %v3326_v53, %v10002_v12  ;;  %12498 = vst [vmem:[#allocation57_spill] sm:$0xff] %v10047_v48 }
  0xa2   :  { %8180 = vmatprep.mubr.f32.mxu0 %v12495_v4  ;;  %v10039_v4 = vsub.f32 %v2032_v60, %v10000_v46  ;;  %v10045_v45 = vsub.f32 %v2035_v30, %v10004_v22  ;;  %12499 = vst [vmem:[#allocation58_spill] sm:$0xff] %v10049_v9  ;;  %8734 = vmatprep.subr.bf16.mxu0 %v9622_v49  ;;  %v12501_v63 = vand.u32 4294901760, %v9846_v55  ;;  %v3491_v60 = vand.u32 4294901760, %v10014_v57 }
  0xa3   :  { %v12502_v53 = vand.u32 4294901760, %v9964_v3  ;;  %v10061_v30 = vsub.f32 %v3329_v1, %v10017_v39  ;;  %v10063_v37 = vand.u32 4294901760, %v3332_v38  ;;  %v10068_v33 = vand.u32 4294901760, %v2041_v24 }
  0xa4   :  { %8010 = vmatmul.mubr.f32.vlgmr.msra.gmra.mrb[16].mxu1 %v12500_v59  ;;  %8181 = vmatmul.mubr.f32.gmra.mrb[18].mxu0 %v12501_v63  ;;  %v10070_v55 = vand.u32 4294901760, %v3335_v27  ;;  %v2044_v59 = vsel %vm120_vm0, %v10036_v58, 0  ;;  %v3338_v57 = vsel %vm120_vm0, %v3291_v25, 0  ;;  %v12507_v63 = vand.u32 4294901760, %v9897_v42 }
  0xa5   :  { %v2192_v19 = vsub.f32 %v9964_v3, %v12502_v53  ;;  %12503 = vst [vmem:[#allocation59_spill] sm:$0xff] %v10063_v37  ;;  %8708 = vmatpush3.bf16.msra.mxu1 %v9514_v52  ;;  %8012 = vmatprep.mubr.f32.mxu1 %v12504_v18  ;;  %12505 = vst [vmem:[#allocation60_spill] sm:$0xff] %v10068_v33  ;;  %v12508_v1 = vand.u32 4294901760, %v9992_v31  ;;  %v12509_v52 = vand.u32 4294901760, %v9983_v0  ;;  %v2047_v58 = vsel %vm120_vm0, %v10049_v9, 0 }
  0xa6   :  { %12506 = vst [vmem:[#allocation61_spill] sm:$0xff] %v10070_v55  ;;  %8183 = vmatprep.mubr.f32.mxu0 %v12507_v63  ;;  %v3510_v3 = vsub.f32 %v9995_v34, %v12510_v35  ;;  %8710 = vmatprep.subr.bf16.mxu1 %v9622_v49  ;;  %v12513_v35 = vand.u32 4294901760, %v9902_v26  ;;  %v10103_v34 = vsub.f32 %v3332_v38, %v10063_v37  ;;  %v10107_v42 = vand.u32 4294901760, %v3338_v57 }
  0xa7   :  { %v3500_v53 = vsub.f32 %v9992_v31, %v12508_v1  ;;  %v2202_v18 = vsub.f32 %v9983_v0, %v12509_v52  ;;  %v10095_v1 = vsub.f32 %v2038_v56, %v10047_v48  ;;  %v12512_v52 = vand.u32 4294901760, %v9885_v28 }
  0xa8   :  { %8184 = vmatmul.mubr.f32.gmra.mrb[20].mxu0 %v12513_v35  ;;  %v10105_v0 = vand.u32 4294901760, %v2044_v59  ;;  %12515 = vst [vmem:[#allocation64_spill] sm:$0xff] %v10107_v42  ;;  %v12516_v63 = vand.u32 4294901760, %v9910_v44  ;;  %v10112_v56 = vsub.f32 %v2041_v24, %v10068_v33  ;;  %v10115_v28 = vsub.f32 %v3335_v27, %v10070_v55 }
  0xa9   :  { %8013 = vmatmul.mubr.f32.gmra.mrb[18].mxu1 %v12512_v52  ;;  %8186 = vmatprep.mubr.f32.mxu0 %v3471_v54  ;;  %v10117_v26 = vand.u32 4294901760, %v2047_v58  ;;  %v2050_v38 = vsel %vm120_vm0, %v10088_v8, 0  ;;  %v2193_v52 = vand.u32 4294901760, %v2192_v19  ;;  %v3501_v35 = vand.u32 4294901760, %v3500_v53 }
  0xaa   :  { %12514 = vst [vmem:[#allocation63_spill] sm:$0xff] %v10105_v0  ;;  %8015 = vmatprep.mubr.f32.mxu1 %v12516_v63  ;;  %v2203_v9 = vand.u32 4294901760, %v2202_v18  ;;  %v3511_v25 = vand.u32 4294901760, %v3510_v3  ;;  %v12518_v31 = vand.u32 4294901760, %v10039_v4  ;;  %v12519_v54 = vand.u32 4294901760, %v10042_v2 }
  0xab   :  { %12517 = vst [vmem:[#allocation65_spill] sm:$0xff] %v10117_v26  ;;  %v12520_v27 = vand.u32 4294901760, %v10045_v45  ;;  %v12211_v55 = vand.u32 4294901760, %v10095_v1  ;;  %v12521_v8 = vand.u32 4294901760, %v9916_v36  ;;  %v12522_v19 = vand.u32 4294901760, %v9961_v20 }
  0xac   :  { %v2212_v44 = vsub.f32 %v10039_v4, %v12518_v31  ;;  %v3520_v24 = vsub.f32 %v10042_v2, %v12519_v54  ;;  %v10137_v31 = vsub.f32 %v2044_v59, %v10105_v0  ;;  %v10140_v53 = vsub.f32 %v3338_v57, %v10107_v42 }
  0xad   :  { %v2222_v63 = vsub.f32 %v10045_v45, %v12520_v27  ;;  %8016 = vmatmul.mubr.f32.gmra.mrb[20].mxu1 %v12521_v8  ;;  %8187 = vmatmul.mubr.f32.gmra.mrb[22].mxu0 %v12522_v19  ;;  %v10142_v18 = vand.u32 4294901760, %v2050_v38  ;;  %v12524_v54 = vand.u32 4294901760, %v9980_v32  ;;  %v12525_v36 = vand.u32 4294901760, %v10061_v30 }
  0xae   :  { %8189 = vmatprep.mubr.f32.mxu0 %v3491_v60  ;;  %v12216_v20 = vand.u32 4294901760, %v10112_v56  ;;  %v10152_v59 = vsub.f32 %v2047_v58, %v10117_v26  ;;  %v2213_v19 = vand.u32 4294901760, %v2212_v44  ;;  %v3521_v57 = vand.u32 4294901760, %v3520_v24 }
  0xaf   :  { %12523 = vst [vmem:[#allocation66_spill] sm:$0xff] %v10142_v18  ;;  %8018 = vmatprep.mubr.f32.mxu1 %v12524_v54  ;;  %v3530_v8 = vsub.f32 %v10061_v30, %v12525_v36  ;;  %v2223_v3 = vand.u32 4294901760, %v2222_v63  ;;  %v2232_v32 = vsub.f32 %v10095_v1, %v12211_v55  ;;  %v12526_v60 = vand.u32 4294901760, %v10103_v34 }
  0xb0   :  { %v12215_v36 = vand.u32 4294901760, %v10137_v31  ;;  %v12212_v27 = vand.u32 4294901760, %v10140_v53  ;;  %v10163_v58 = vsub.f32 %v2050_v38, %v10142_v18  ;;  %v2242_v24 = vsub.f32 %v10112_v56, %v12216_v20  ;;  %v12546_v20 = vld [vmem:[#allocation49_spill] sm:$0xff] }
  0xb1   :  { %8019 = vmatmul.mubr.f32.gmra.mrb[22].mxu1 %v2193_v52  ;;  %8190 = vmatmul.mubr.f32.gmra.mrb[24].mxu0 %v3501_v35  ;;  %v3540_v54 = vsub.f32 %v10103_v34, %v12526_v60  ;;  %v3531_v44 = vand.u32 4294901760, %v3530_v8  ;;  %v12527_v52 = vand.u32 4294901760, %v10115_v28  ;;  %v12214_v63 = vand.u32 4294901760, %v10152_v59 }
  0xb2   :  { %8021 = vmatprep.mubr.f32.mxu1 %v2203_v9  ;;  %8192 = vmatprep.mubr.f32.mxu0 %v3511_v25  ;;  %v2233_v60 = vand.u32 4294901760, %v2232_v32  ;;  %v2252_v9 = vsub.f32 %v10137_v31, %v12215_v36  ;;  %v3560_v25 = vsub.f32 %v10140_v53, %v12212_v27  ;;  %v12213_v38 = vand.u32 4294901760, %v10163_v58  ;;  %v12545_v36 = vld [vmem:[#allocation43_spill] sm:$0xff] }
  0xb3   :  { %v3550_v35 = vsub.f32 %v10115_v28, %v12527_v52  ;;  %v3541_v55 = vand.u32 4294901760, %v3540_v54  ;;  %v2243_v8 = vand.u32 4294901760, %v2242_v24  ;;  %v12531_v24 = vld [vmem:[#allocation22_spill] sm:$0xff] }
  0xb4   :  { %v3561_v32 = vand.u32 4294901760, %v3560_v25  ;;  %v2272_v54 = vsub.f32 %v10163_v58, %v12213_v38  ;;  %v12535_v25 = vld [vmem:[#allocation29_spill] sm:$0xff]  ;;  %v12543_v38 = vld [vmem:[#allocation39_spill] sm:$0xff] }
  0xb5   :  { %8022 = vmatmul.mubr.f32.gmra.mrb[24].mxu1 %v2213_v19  ;;  %8193 = vmatmul.mubr.f32.gmra.mrb[26].mxu0 %v3521_v57  ;;  %v3551_v52 = vand.u32 4294901760, %v3550_v35  ;;  %v2262_v19 = vsub.f32 %v10152_v59, %v12214_v63  ;;  %v2253_v57 = vand.u32 4294901760, %v2252_v9  ;;  %v12532_v35 = vld [vmem:[#allocation25_spill] sm:$0xff]  ;;  %v12534_v9 = vld [vmem:[#allocation28_spill] sm:$0xff] }
  0xb6   :  { %8024 = vmatprep.mubr.f32.mxu1 %v2223_v3  ;;  %8195 = vmatprep.mubr.f32.mxu0 %v3531_v44  ;;  %v2273_v3 = vand.u32 4294901760, %v2272_v54  ;;  %v12530_v44 = vld [vmem:[#allocation21_spill] sm:$0xff]  ;;  %v12541_v54 = vld [vmem:[#allocation38_spill] sm:$0xff] }
  0xb7   :  { %v2263_v27 = vand.u32 4294901760, %v2262_v19  ;;  %v12538_v19 = vld [vmem:[#allocation32_spill] sm:$0xff]  ;;  %v12544_v63 = vld [vmem:[#allocation41_spill] sm:$0xff] }
  0xb9   :  { %8025 = vmatmul.mubr.f32.gmra.mrb[26].mxu1 %v2233_v60  ;;  %8196 = vmatmul.mubr.f32.gmra.mrb[28].mxu0 %v3541_v55  ;;  %v12528_v55 = vld [vmem:[#allocation61_spill] sm:$0xff] }
  0xba   :  { %8027 = vmatprep.mubr.f32.mxu1 %v2243_v8  ;;  %8198 = vmatprep.mubr.f32.mxu0 %v3551_v52  ;;  %v12533_v60 = vld [vmem:[#allocation13_spill] sm:$0xff]  ;;  %v12536_v8 = vld [vmem:[#allocation31_spill] sm:$0xff] }
  0xbb   :  { %v12537_v52 = vld [vmem:[#allocation33_spill] sm:$0xff] }
  0xbd   :  { %8028 = vmatmul.mubr.f32.gmra.mrb[28].mxu1 %v2253_v57  ;;  %8199 = vmatmul.mubr.f32.gmra.mrb[30].mxu0 %v3561_v32  ;;  %v12539_v57 = vld [vmem:[#allocation34_spill] sm:$0xff]  ;;  %v12540_v32 = vld [vmem:[#allocation35_spill] sm:$0xff] }
  0xbe   :  { %8030 = vmatprep.mubr.f32.mxu1 %v2263_v27  ;;  %8205 = vmatprep.mubr.f32.mxu0 %v9685_v7  ;;  %v12529_v27 = vld [vmem:[#allocation20_spill] sm:$0xff] }
  0xc1   :  { %8031 = vmatmul.mubr.f32.gmra.mrb[30].mxu1 %v2273_v3  ;;  %8206 = vmatmul.mubr.f32.vlgmr.msra.gmra.mrb[16].mxu0 %v9687_v62  ;;  %v12542_v3 = vld [vmem:[#allocation36_spill] sm:$0xff] }
  0xc2   :  { %8037 = vmatprep.mubr.f32.mxu1 %v9690_v15  ;;  %8208 = vmatprep.mubr.f32.mxu0 %v9696_v10 }
  0xc3   :  { %8736 = vmatpush3.bf16.msra.mxu0 %v9622_v49 }
  0xc4   :  { %8738 = vmatprep.subr.bf16.mxu0 %v9447_v13 }
  0xc5   :  { %8038 = vmatmul.mubr.f32.vlgmr.msra.gmra.mrb[16].mxu1 %v9711_v14  ;;  %8209 = vmatmul.mubr.f32.gmra.mrb[18].mxu0 %v9721_v5 }
  0xc6   :  { %8712 = vmatpush3.bf16.msra.mxu1 %v9622_v49  ;;  %8040 = vmatprep.mubr.f32.mxu1 %v9761_v16  ;;  %v12547_v49 = vld [vmem:[#allocation14_spill] sm:$0xff] }
  0xc7   :  { %8211 = vmatprep.mubr.f32.mxu0 %v9769_v40  ;;  %8714 = vmatprep.subr.bf16.mxu1 %v9447_v13 }
  0xc9   :  { %8041 = vmatmul.mubr.f32.gmra.mrb[18].mxu1 %v9763_v17  ;;  %8212 = vmatmul.mubr.f32.gmra.mrb[20].mxu0 %v9771_v11 }
  0xca   :  { %8043 = vmatprep.mubr.f32.mxu1 %v9783_v43  ;;  %8214 = vmatprep.mubr.f32.mxu0 %v9824_v29 }
  0xcd   :  { %8044 = vmatmul.mubr.f32.gmra.mrb[20].mxu1 %v9785_v41  ;;  %8215 = vmatmul.mubr.f32.gmra.mrb[22].mxu0 %v9838_v50 }
  0xce   :  { %8046 = vmatprep.mubr.f32.mxu1 %v9854_v23  ;;  %8217 = vmatprep.mubr.f32.mxu0 %v9887_v51 }
  0xd1   :  { %8047 = vmatmul.mubr.f32.gmra.mrb[22].mxu1 %v9921_v61  ;;  %8218 = vmatmul.mubr.f32.gmra.mrb[24].mxu0 %v9952_v47 }
  0xd2   :  { %8049 = vmatprep.mubr.f32.mxu1 %v9938_v6  ;;  %8220 = vmatprep.mubr.f32.mxu0 %v9954_v21 }
  0xd5   :  { %8050 = vmatmul.mubr.f32.gmra.mrb[24].mxu1 %v10000_v46  ;;  %8221 = vmatmul.mubr.f32.gmra.mrb[26].mxu0 %v10002_v12 }
  0xd6   :  { %8052 = vmatprep.mubr.f32.mxu1 %v10004_v22  ;;  %8223 = vmatprep.mubr.f32.mxu0 %v10017_v39 }
  0xd9   :  { %8053 = vmatmul.mubr.f32.gmra.mrb[26].mxu1 %v10047_v48  ;;  %8224 = vmatmul.mubr.f32.gmra.mrb[28].mxu0 %v10063_v37  ;;  %v10266_v37 = vld [vmem:[#allocation5] sm:$0xff]  ;;  %v12554_v48 = vld [vmem:[#allocation18_spill] sm:$0xff] }
  0xda   :  { %8055 = vmatprep.mubr.f32.mxu1 %v10068_v33  ;;  %8226 = vmatprep.mubr.f32.mxu0 %v12528_v55  ;;  %v12552_v55 = vand.u32 4294901760, %v12531_v24  ;;  %v12553_v33 = vand.u32 4294901760, %v12532_v35  ;;  %v10270_v39 = vsub.f32 %v10266_v37, %v12554_v48 }
  0xdc   :  { %12555 = vst [vmem:[#allocation20_spill] sm:$0xff] %v10270_v39  ;;  %268 = vrot.lane.b32.xlu0 %v10270_v39, %s9351_s2  ;;  %542 = vrot.lane.b32.xlu1 %v10270_v39, %s9352_s21 }
  0xdd   :  { %8056 = vmatmul.mubr.f32.gmra.mrb[28].mxu1 %v10105_v0  ;;  %8227 = vmatmul.mubr.f32.gmra.mrb[30].mxu0 %v10107_v42  ;;  %v12550_v42 = vand.u32 4294901760, %v12529_v27  ;;  %v12551_v0 = vand.u32 4294901760, %v12530_v44 }
  0xde   :  { %8058 = vmatprep.mubr.f32.mxu1 %v10117_v26  ;;  %8233 = vmatprep.mubr.f32.mxu0 %v12529_v27  ;;  %v12549_v26 = vld [vmem:[#allocation52_spill] sm:$0xff]  ;;  %v9237_v27 = vld [vmem:[#allocation5 + $0x8] sm:$0xff] }
  0xe1   :  { %8059 = vmatmul.mubr.f32.gmra.mrb[30].mxu1 %v10142_v18  ;;  %8234 = vmatmul.mubr.f32.vlgmr.msra.gmra.mrb[16].mxu0 %v12530_v44  ;;  %v12548_v18 = vld [vmem:[#allocation50_spill] sm:$0xff]  ;;  %v12560_v44 = vld [vmem:[#allocation19_spill] sm:$0xff] }
  0xe2   :  { %8065 = vmatprep.mubr.f32.mxu1 %v12531_v24  ;;  %8236 = vmatprep.mubr.f32.mxu0 %v12532_v35  ;;  %v10284_v24 = vsub.f32 %v9237_v27, %v12560_v44  ;;  %v12562_v35 = vand.u32 4294901760, %v12538_v19 }
  0xe3   :  { %8740 = vmatpush3.bf16.msra.mxu0 %v9447_v13 }
  0xe4   :  { %8742 = vmatprep.subr.bf16.mxu0 %v12533_v60  ;;  %12561 = vst [vmem:[#allocation21_spill] sm:$0xff] %v10284_v24  ;;  %270 = vrot.lane.b32.xlu0 %v10284_v24, %s9351_s2 }
  0xe5   :  { %8066 = vmatmul.mubr.f32.vlgmr.msra.gmra.mrb[16].mxu1 %v12534_v9  ;;  %8237 = vmatmul.mubr.f32.gmra.mrb[18].mxu0 %v12535_v25 }
  0xe6   :  { %8716 = vmatpush3.bf16.msra.mxu1 %v9447_v13  ;;  %8068 = vmatprep.mubr.f32.mxu1 %v12536_v8 }
  0xe7   :  { %8239 = vmatprep.mubr.f32.mxu0 %v12537_v52  ;;  %8718 = vmatprep.subr.bf16.mxu1 %v12533_v60 }
  0xe8   :  { %544 = vrot.lane.b32.xlu1 %v10284_v24, %s9352_s21 }
  0xe9   :  { %8069 = vmatmul.mubr.f32.gmra.mrb[18].mxu1 %v12538_v19  ;;  %8240 = vmatmul.mubr.f32.gmra.mrb[20].mxu0 %v12539_v57  ;;  %v12568_v19 = vand.u32 4294901760, %v12542_v3 }
  0xea   :  { %8071 = vmatprep.mubr.f32.mxu1 %v12540_v32  ;;  %8242 = vmatprep.mubr.f32.mxu0 %v12541_v54 }
  0xed   :  { %8072 = vmatmul.mubr.f32.gmra.mrb[20].mxu1 %v12542_v3  ;;  %8243 = vmatmul.mubr.f32.gmra.mrb[22].mxu0 %v12543_v38  ;;  %v12574_v3 = vand.u32 4294901760, %v12546_v20 }
  0xee   :  { %8074 = vmatprep.mubr.f32.mxu1 %v12544_v63  ;;  %8245 = vmatprep.mubr.f32.mxu0 %v12545_v36 }
  0xf1   :  { %8075 = vmatmul.mubr.f32.gmra.mrb[22].mxu1 %v12546_v20  ;;  %8246 = vmatmul.mubr.f32.gmra.mrb[24].mxu0 %v12547_v49  ;;  %v12580_v20 = vand.u32 4294901760, %v10039_v4 }
  0xf2   :  { %8077 = vmatprep.mubr.f32.mxu1 %v12548_v18  ;;  %8248 = vmatprep.mubr.f32.mxu0 %v12549_v26 }
  0xf5   :  { %8078 = vmatmul.mubr.f32.gmra.mrb[24].mxu1 %v10039_v4  ;;  %8249 = vmatmul.mubr.f32.gmra.mrb[26].mxu0 %v10042_v2  ;;  %v12586_v4 = vand.u32 4294901760, %v10095_v1 }
  0xf6   :  { %8080 = vmatprep.mubr.f32.mxu1 %v10045_v45  ;;  %8251 = vmatprep.mubr.f32.mxu0 %v10061_v30 }
  0xf9   :  { %8081 = vmatmul.mubr.f32.gmra.mrb[26].mxu1 %v10095_v1  ;;  %8252 = vmatmul.mubr.f32.gmra.mrb[28].mxu0 %v10103_v34  ;;  %v12593_v1 = vand.u32 4294901760, %v10140_v53 }
  0xfa   :  { %8083 = vmatprep.mubr.f32.mxu1 %v10112_v56  ;;  %8254 = vmatprep.mubr.f32.mxu0 %v10115_v28 }
  0xfd   :  { %8084 = vmatmul.mubr.f32.gmra.mrb[28].mxu1 %v10137_v31  ;;  %8255 = vmatmul.mubr.f32.gmra.mrb[30].mxu0 %v10140_v53  ;;  %v5852_v53 = vmul.f32 %v10266_v37, %v12554_v48 }
  0xfe   :  { %8086 = vmatprep.mubr.f32.mxu1 %v10152_v59  ;;  %8261 = vmatprep.mubr.f32.mxu0 %v12550_v42  ;;  %v12556_v42 = vand.u32 4294901760, %v12534_v9  ;;  %v12563_v9 = vand.u32 4294901760, %v12539_v57  ;;  %v12569_v57 = vand.u32 4294901760, %v12543_v38  ;;  %v12575_v38 = vand.u32 4294901760, %v12547_v49 }
  0xff   :  { %v12581_v49 = vand.u32 4294901760, %v10042_v2  ;;  %v12587_v2 = vand.u32 4294901760, %v10103_v34  ;;  %v12592_v34 = vand.u32 4294901760, %v10137_v31  ;;  %v12597_v31 = vand.u32 4294901760, %v10163_v58 }
 0x101   :  { %8087 = vmatmul.mubr.f32.gmra.mrb[30].mxu1 %v10163_v58  ;;  %8262 = vmatmul.mubr.f32.vlgmr.msra.gmra.mrb[16].mxu0 %v12551_v0  ;;  %v12557_v0 = vand.u32 4294901760, %v12535_v25  ;;  %v12564_v25 = vand.u32 4294901760, %v12540_v32  ;;  %v12570_v32 = vand.u32 4294901760, %v12544_v63  ;;  %v12576_v63 = vand.u32 4294901760, %v12548_v18  ;;  %v10399_v58 = vld [vmem:[#allocation5 + $0x40] sm:$0xff] }
 0x102   :  { %8093 = vmatprep.mubr.f32.mxu1 %v12552_v55  ;;  %8264 = vmatprep.mubr.f32.mxu0 %v12553_v33  ;;  %v12558_v33 = vand.u32 4294901760, %v12536_v8  ;;  %v12559_v55 = vand.u32 4294901760, %v12537_v52  ;;  %v12565_v8 = vand.u32 4294901760, %v12541_v54  ;;  %v9238_v52 = vld [vmem:[#allocation5 + $0x10] sm:$0xff]  ;;  %v12571_v54 = vand.u32 4294901760, %v12545_v36 }
 0x103   :  { %8744 = vmatpush3.bf16.msra.mxu0 %v12533_v60  ;;  %v12577_v36 = vand.u32 4294901760, %v12549_v26  ;;  %v12582_v18 = vand.u32 4294901760, %v10045_v45  ;;  %v12583_v26 = vand.u32 4294901760, %v10061_v30  ;;  %v12588_v45 = vand.u32 4294901760, %v10112_v56 }
 0x104   :  { %8746 = vmatprep.subr.bf16.mxu0 %v9447_v13  ;;  %v12589_v30 = vand.u32 4294901760, %v10115_v28  ;;  %v12594_v56 = vand.u32 4294901760, %v10152_v59  ;;  %v10378_v28 = vld [vmem:[#allocation5 + $0x38] sm:$0xff]  ;;  %v5853_v59 = vmul.f32 %v9237_v27, %v12560_v44  ;;  %v4565_v27 = vmul.f32 %v12560_v44, %v12560_v44 }
 0x105   :  { %8094 = vmatmul.mubr.f32.vlgmr.msra.gmra.mrb[16].mxu1 %v12556_v42  ;;  %8265 = vmatmul.mubr.f32.gmra.mrb[18].mxu0 %v12557_v0  ;;  %v12566_v42 = vld [vmem:[#allocation23_spill] sm:$0xff] }
 0x106   :  { %8720 = vmatpush3.bf16.msra.mxu1 %v12533_v60  ;;  %8096 = vmatprep.mubr.f32.mxu1 %v12558_v33  ;;  %v10299_v0 = vsub.f32 %v9238_v52, %v12566_v42  ;;  %v9239_v33 = vld [vmem:[#allocation5 + $0x18] sm:$0xff]  ;;  %v5854_v37 = vmul.f32 %v9238_v52, %v12566_v42  ;;  %v5872_v52 = vsel %vm120_vm0, %v5853_v59, 0  ;;  %v4566_v44 = vmul.f32 %v12566_v42, %v12566_v42 }
 0x107   :  { %8267 = vmatprep.mubr.f32.mxu0 %v12559_v55  ;;  %8722 = vmatprep.subr.bf16.mxu1 %v9447_v13  ;;  %v12572_v55 = vld [vmem:[#allocation24_spill] sm:$0xff] }
 0x108   :  { %12567 = vst [vmem:[#allocation22_spill] sm:$0xff] %v10299_v0  ;;  %272 = vrot.lane.b32.xlu0 %v10299_v0, %s9351_s2  ;;  %546 = vrot.lane.b32.xlu1 %v10299_v0, %s9352_s21  ;;  %v4587_v60 = vsel %vm120_vm0, %v4566_v44, 0  ;;  %v12615_v0 = vld [vmem:[#allocation55_spill] sm:$0xff] }
 0x109   :  { %8097 = vmatmul.mubr.f32.gmra.mrb[18].mxu1 %v12562_v35  ;;  %8268 = vmatmul.mubr.f32.gmra.mrb[20].mxu0 %v12563_v9  ;;  %v10314_v35 = vsub.f32 %v9239_v33, %v12572_v55  ;;  %v9240_v9 = vld [vmem:[#allocation5 + $0x20] sm:$0xff] }
 0x10a   :  { %8099 = vmatprep.mubr.f32.mxu1 %v12564_v25  ;;  %8270 = vmatprep.mubr.f32.mxu0 %v12565_v8  ;;  %v12578_v25 = vld [vmem:[#allocation26_spill] sm:$0xff] }
 0x10b   :  { %12573 = vst [vmem:[#allocation25_spill] sm:$0xff] %v10314_v35  ;;  %v10329_v8 = vsub.f32 %v9240_v9, %v12578_v25 }
 0x10c   :  { %274 = vrot.lane.b32.xlu0 %v10314_v35, %s9351_s2  ;;  %548 = vrot.lane.b32.xlu1 %v10314_v35, %s9352_s21 }
 0x10d   :  { %8100 = vmatmul.mubr.f32.gmra.mrb[20].mxu1 %v12568_v19  ;;  %8271 = vmatmul.mubr.f32.gmra.mrb[22].mxu0 %v12569_v57  ;;  %12579 = vst [vmem:[#allocation28_spill] sm:$0xff] %v10329_v8  ;;  %v10343_v19 = vld [vmem:[#allocation5 + $0x28] sm:$0xff]  ;;  %v12584_v57 = vld [vmem:[#allocation27_spill] sm:$0xff] }
 0x10e   :  { %8102 = vmatprep.mubr.f32.mxu1 %v12570_v32  ;;  %8273 = vmatprep.mubr.f32.mxu0 %v12571_v54  ;;  %v10347_v32 = vsub.f32 %v10343_v19, %v12584_v57  ;;  %v10361_v54 = vld [vmem:[#allocation5 + $0x30] sm:$0xff]  ;;  %v4569_v39 = vmul.f32 %v12584_v57, %v12584_v57 }
 0x110   :  { %12585 = vst [vmem:[#allocation29_spill] sm:$0xff] %v10347_v32  ;;  %276 = vrot.lane.b32.xlu0 %v10329_v8, %s9351_s2  ;;  %550 = vrot.lane.b32.xlu1 %v10329_v8, %s9352_s21  ;;  %v10485_v8 = vld [vmem:[#allocation5 + $0x58] sm:$0xff] }
 0x111   :  { %8103 = vmatmul.mubr.f32.gmra.mrb[22].mxu1 %v12574_v3  ;;  %8274 = vmatmul.mubr.f32.gmra.mrb[24].mxu0 %v12575_v38  ;;  %v12590_v3 = vld [vmem:[#allocation30_spill] sm:$0xff] }
 0x112   :  { %8105 = vmatprep.mubr.f32.mxu1 %v12576_v63  ;;  %8276 = vmatprep.mubr.f32.mxu0 %v12577_v36  ;;  %v10365_v38 = vsub.f32 %v10361_v54, %v12590_v3  ;;  %v12595_v63 = vld [vmem:[#allocation37_spill] sm:$0xff] }
 0x113   :  { %v10382_v36 = vsub.f32 %v10378_v28, %v12595_v63 }
 0x114   :  { %12591 = vst [vmem:[#allocation31_spill] sm:$0xff] %v10365_v38  ;;  %278 = vrot.lane.b32.xlu0 %v10347_v32, %s9351_s2  ;;  %552 = vrot.lane.b32.xlu1 %v10347_v32, %s9352_s21 }
 0x115   :  { %8106 = vmatmul.mubr.f32.gmra.mrb[24].mxu1 %v12580_v20  ;;  %8277 = vmatmul.mubr.f32.gmra.mrb[26].mxu0 %v12581_v49  ;;  %12596 = vst [vmem:[#allocation33_spill] sm:$0xff] %v10382_v36  ;;  %v4564_v20 = vmul.f32 %v12554_v48, %v12554_v48  ;;  %v12598_v49 = vld [vmem:[#allocation40_spill] sm:$0xff]  ;;  %v5869_v48 = vsel %vm120_vm0, %v5852_v53, 0  ;;  %v4567_v53 = vmul.f32 %v12572_v55, %v12572_v55 }
 0x116   :  { %8108 = vmatprep.mubr.f32.mxu1 %v12582_v18  ;;  %8279 = vmatprep.mubr.f32.mxu0 %v12583_v26  ;;  %v10403_v18 = vsub.f32 %v10399_v58, %v12598_v49 }
 0x117   :  { %v4581_v26 = vsel %vm120_vm0, %v4564_v20, 0 }
 0x118   :  { %280 = vrot.lane.b32.xlu0 %v10365_v38, %s9351_s2  ;;  %554 = vrot.lane.b32.xlu1 %v10365_v38, %s9352_s21  ;;  %12599 = vst [vmem:[#allocation32_spill] sm:$0xff] %v10403_v18  ;;  %v10443_v42 = vand.u32 4294901760, %v4581_v26  ;;  %v5857_v38 = vmul.f32 %v10343_v19, %v12584_v57  ;;  %v4568_v19 = vmul.f32 %v12578_v25, %v12578_v25 }
 0x119   :  { %8109 = vmatmul.mubr.f32.gmra.mrb[26].mxu1 %v12586_v4  ;;  %8280 = vmatmul.mubr.f32.gmra.mrb[28].mxu0 %v12587_v2  ;;  %v5855_v4 = vmul.f32 %v9239_v33, %v12572_v55  ;;  %v10421_v2 = vld [vmem:[#allocation5 + $0x48] sm:$0xff]  ;;  %v10436_v33 = vand.u32 4294901760, %v5869_v48 }
 0x11a   :  { %8111 = vmatprep.mubr.f32.mxu1 %v12588_v45  ;;  %8282 = vmatprep.mubr.f32.mxu0 %v12589_v30  ;;  %v12600_v45 = vld [vmem:[#allocation45_spill] sm:$0xff]  ;;  %12604 = vst [vmem:[#allocation36_spill] sm:$0xff] %v10443_v42 }
 0x11b   :  { %v10425_v30 = vsub.f32 %v10421_v2, %v12600_v45  ;;  %12602 = vst [vmem:[#allocation35_spill] sm:$0xff] %v10436_v33  ;;  %v5878_v20 = vsel %vm120_vm0, %v5855_v4, 0  ;;  %v10467_v55 = vsub.f32 %v5869_v48, %v10436_v33  ;;  %v4590_v48 = vsel %vm120_vm0, %v4567_v53, 0 }
 0x11c   :  { %282 = vrot.lane.b32.xlu0 %v10382_v36, %s9351_s2  ;;  %556 = vrot.lane.b32.xlu1 %v10382_v36, %s9352_s21  ;;  %v10482_v32 = vand.u32 4294901760, %v5878_v20  ;;  %v5884_v53 = vsel %vm120_vm0, %v5857_v38, 0 }
 0x11d   :  { %8112 = vmatmul.mubr.f32.gmra.mrb[28].mxu1 %v12592_v34  ;;  %8283 = vmatmul.mubr.f32.gmra.mrb[30].mxu0 %v12593_v1  ;;  %12601 = vst [vmem:[#allocation34_spill] sm:$0xff] %v10425_v30  ;;  %v5875_v34 = vsel %vm120_vm0, %v5854_v37, 0  ;;  %v5856_v1 = vmul.f32 %v9240_v9, %v12578_v25  ;;  %v10451_v37 = vld [vmem:[#allocation5 + $0x50] sm:$0xff]  ;;  %v12606_v9 = vld [vmem:[#allocation46_spill] sm:$0xff]  ;;  %12608 = vst [vmem:[#allocation43_spill] sm:$0xff] %v10467_v55  ;;  %v10541_v57 = vand.u32 4294901760, %v5884_v53 }
 0x11e   :  { %8114 = vmatprep.mubr.f32.mxu1 %v12594_v56  ;;  %8289 = vmatprep.mubr.f32.mxu0 %v9685_v7  ;;  %v10441_v56 = vand.u32 4294901760, %v5872_v52  ;;  %v10448_v59 = vand.u32 4294901760, %v5875_v34  ;;  %v10455_v36 = vsub.f32 %v10451_v37, %v12606_v9  ;;  %12612 = vst [vmem:[#allocation52_spill] sm:$0xff] %v10482_v32  ;;  %v10491_v25 = vld [vmem:[#allocation5 + $0x60] sm:$0xff]  ;;  %v10527_v33 = vsub.f32 %v5878_v20, %v10482_v32 }
 0x11f   :  { %v5881_v4 = vsel %vm120_vm0, %v5856_v1, 0  ;;  %v12613_v1 = vld [vmem:[#allocation51_spill] sm:$0xff]  ;;  %v10495_v24 = vsub.f32 %v10491_v25, %v12615_v0  ;;  %12626 = vst [vmem:[#allocation46_spill] sm:$0xff] %v10541_v57  ;;  %v4596_v32 = vsel %vm120_vm0, %v4569_v39, 0 }
 0x120   :  { %284 = vrot.lane.b32.xlu0 %v10403_v18, %s9351_s2  ;;  %12603 = vst [vmem:[#allocation38_spill] sm:$0xff] %v10441_v56  ;;  %12605 = vst [vmem:[#allocation39_spill] sm:$0xff] %v10448_v59  ;;  %558 = vrot.lane.b32.xlu1 %v10403_v18, %s9352_s21  ;;  %v10477_v44 = vsub.f32 %v5872_v52, %v10441_v56  ;;  %v10480_v18 = vsub.f32 %v4581_v26, %v10443_v42  ;;  %v10500_v26 = vand.u32 4294901760, %v4587_v60 }
 0x121   :  { %8115 = vmatmul.mubr.f32.gmra.mrb[30].mxu1 %v12597_v31  ;;  %8290 = vmatmul.mubr.f32.vlgmr.msra.gmra.mrb[16].mxu0 %v9687_v62  ;;  %v4584_v31 = vsel %vm120_vm0, %v4565_v27, 0  ;;  %12607 = vst [vmem:[#allocation41_spill] sm:$0xff] %v10455_v36  ;;  %v10489_v35 = vsub.f32 %v10485_v8, %v12613_v1  ;;  %12616 = vst [vmem:[#allocation19_spill] sm:$0xff] %v10495_v24  ;;  %v10498_v52 = vsub.f32 %v5875_v34, %v10448_v59 }
 0x122   :  { %8121 = vmatprep.mubr.f32.mxu1 %v9690_v15  ;;  %8292 = vmatprep.mubr.f32.mxu0 %v9696_v10  ;;  %v10469_v27 = vand.u32 4294901760, %v4584_v31  ;;  %12610 = vst [vmem:[#allocation14_spill] sm:$0xff] %v10477_v44  ;;  %12611 = vst [vmem:[#allocation50_spill] sm:$0xff] %v10480_v18  ;;  %v10502_v42 = vand.u32 4294901760, %v5881_v4  ;;  %v5858_v56 = vmul.f32 %v10361_v54, %v12590_v3  ;;  %v10519_v59 = vand.u32 4294901760, %v4590_v48 }
 0x123   :  { %8748 = vmatpush3.bf16.msra.mxu0 %v9447_v13  ;;  %12614 = vst [vmem:[#allocation18_spill] sm:$0xff] %v10489_v35  ;;  %12617 = vst [vmem:[#allocation23_spill] sm:$0xff] %v10498_v52  ;;  %v4593_v54 = vsel %vm120_vm0, %v4568_v19, 0  ;;  %v5859_v34 = vmul.f32 %v10378_v28, %v12595_v63  ;;  %v10554_v19 = vld [vmem:[#allocation5 + $0x70] sm:$0xff] }
 0x124   :  { %8774 = vmatprep.subr.bf16.mxu0 %v9447_v13  ;;  %286 = vrot.lane.b32.xlu0 %v10425_v30, %s9351_s2  ;;  %12609 = vst [vmem:[#allocation49_spill] sm:$0xff] %v10469_v27  ;;  %12618 = vst [vmem:[#allocation24_spill] sm:$0xff] %v10500_v26  ;;  %v10517_v38 = vsub.f32 %v4584_v31, %v10469_v27  ;;  %v10531_v31 = vld [vmem:[#allocation5 + $0x68] sm:$0xff]  ;;  %v12623_v27 = vld [vmem:[#allocation16_spill] sm:$0xff]  ;;  %v10546_v20 = vand.u32 4294901760, %v4593_v54  ;;  %v5887_v28 = vsel %vm120_vm0, %v5858_v56, 0 }
 0x125   :  { %8122 = vmatmul.mubr.f32.vlgmr.msra.gmra.mrb[16].mxu1 %v9711_v14  ;;  %8293 = vmatmul.mubr.f32.gmra.mrb[18].mxu0 %v9721_v5  ;;  %12619 = vst [vmem:[#allocation26_spill] sm:$0xff] %v10502_v42  ;;  %12621 = vst [vmem:[#allocation30_spill] sm:$0xff] %v10519_v59  ;;  %v12631_v56 = vand.u32 4294901760, %v10467_v55 }
 0x126   :  { %8724 = vmatpush3.bf16.msra.mxu1 %v9447_v13  ;;  %8124 = vmatprep.mubr.f32.mxu1 %v9761_v16  ;;  %12620 = vst [vmem:[#allocation27_spill] sm:$0xff] %v10517_v38  ;;  %12622 = vst [vmem:[#allocation37_spill] sm:$0xff] %v10527_v33 }
 0x127   :  { %8295 = vmatprep.mubr.f32.mxu0 %v9769_v40  ;;  %8750 = vmatprep.subr.bf16.mxu1 %v9447_v13  ;;  %12628 = vst [vmem:[#allocation55_spill] sm:$0xff] %v10546_v20  ;;  %v10565_v39 = vsub.f32 %v10467_v55, %v12631_v56  ;;  %v10588_v55 = vand.u32 4294901760, %v5887_v28  ;;  %v12645_v56 = vand.u32 4294901760, %v10517_v38 }
 0x128   :  { %560 = vrot.lane.b32.xlu1 %v10425_v30, %s9352_s21  ;;  %288 = vrot.lane.b32.xlu0 %v10455_v36, %s9351_s2  ;;  %v10544_v30 = vsub.f32 %v5881_v4, %v10502_v42  ;;  %v12633_v42 = vld [vmem:[#allocation56_spill] sm:$0xff]  ;;  %v5890_v4 = vsel %vm120_vm0, %v5859_v34, 0  ;;  %v10602_v34 = vsub.f32 %v4593_v54, %v10546_v20 }
 0x129   :  { %8125 = vmatmul.mubr.f32.gmra.mrb[18].mxu1 %v9763_v17  ;;  %8296 = vmatmul.mubr.f32.gmra.mrb[20].mxu0 %v9771_v11  ;;  %v10619_v54 = vsub.f32 %v10517_v38, %v12645_v56  ;;  %v12647_v20 = vld [vmem:[#allocation60_spill] sm:$0xff] }
 0x12a   :  { %8127 = vmatprep.mubr.f32.mxu1 %v9783_v43  ;;  %8298 = vmatprep.mubr.f32.mxu0 %v9824_v29  ;;  %12627 = vst [vmem:[#allocation51_spill] sm:$0xff] %v10544_v30  ;;  %12639 = vst [vmem:[#allocation69_spill] sm:$0xff] %v10602_v34 }
 0x12c   :  { %562 = vrot.lane.b32.xlu1 %v10455_v36, %s9352_s21  ;;  %290 = vrot.lane.b32.xlu0 %v10489_v35, %s9351_s2  ;;  %v10569_v36 = vsub.f32 %v4590_v48, %v10519_v59  ;;  %v10586_v48 = vsub.f32 %v5884_v53, %v10541_v57  ;;  %v10590_v59 = vand.u32 4294901760, %v4596_v32  ;;  %v10608_v53 = vld [vmem:[#allocation5 + $0x78] sm:$0xff]  ;;  %v12648_v57 = vld [vmem:[#allocation61_spill] sm:$0xff] }
 0x12d   :  { %8128 = vmatmul.mubr.f32.gmra.mrb[20].mxu1 %v9785_v41  ;;  %8299 = vmatmul.mubr.f32.gmra.mrb[22].mxu0 %v9838_v50  ;;  %12640 = vst [vmem:[#allocation70_spill] sm:$0xff] %v10608_v53 }
 0x12e   :  { %8130 = vmatprep.mubr.f32.mxu1 %v9854_v23  ;;  %8301 = vmatprep.mubr.f32.mxu0 %v9887_v51  ;;  %12636 = vst [vmem:[#allocation67_spill] sm:$0xff] %v10586_v48  ;;  %12637 = vst [vmem:[#allocation68_spill] sm:$0xff] %v10590_v59  ;;  %v10639_v38 = vsub.f32 %v4596_v32, %v10590_v59  ;;  %v12654_v32 = vld [vmem:[#allocation63_spill] sm:$0xff] }
 0x130   :  { %564 = vrot.lane.b32.xlu1 %v10489_v35, %s9352_s21  ;;  %292 = vrot.lane.b32.xlu0 %v10495_v24, %s9351_s2  ;;  %v10636_v35 = vsub.f32 %v5887_v28, %v10588_v55  ;;  %12651 = vst [vmem:[#allocation73_spill] sm:$0xff] %v10639_v38  ;;  %v5860_v28 = vmul.f32 %v10399_v58, %v12598_v49 }
 0x131   :  { %8131 = vmatmul.mubr.f32.gmra.mrb[22].mxu1 %v9921_v61  ;;  %8302 = vmatmul.mubr.f32.gmra.mrb[24].mxu0 %v9952_v47  ;;  %v10535_v47 = vsub.f32 %v10531_v31, %v12623_v27 }
 0x132   :  { %8133 = vmatprep.mubr.f32.mxu1 %v9938_v6  ;;  %8304 = vmatprep.mubr.f32.mxu0 %v9954_v21  ;;  %v10539_v21 = vsub.f32 %v4587_v60, %v10500_v26  ;;  %v12629_v60 = vld [vmem:[#allocation58_spill] sm:$0xff]  ;;  %v12634_v6 = vand.u32 4294901760, %v10477_v44  ;;  %12650 = vst [vmem:[#allocation60_spill] sm:$0xff] %v10636_v35 }
 0x133   :  { %12624 = vst [vmem:[#allocation40_spill] sm:$0xff] %v10535_v47  ;;  %v10558_v26 = vsub.f32 %v10554_v19, %v12629_v60  ;;  %12632 = vst [vmem:[#allocation58_spill] sm:$0xff] %v10569_v36 }
 0x134   :  { %12625 = vst [vmem:[#allocation45_spill] sm:$0xff] %v10539_v21  ;;  %566 = vrot.lane.b32.xlu1 %v10495_v24, %s9352_s21  ;;  %294 = vrot.lane.b32.xlu0 %v10535_v47, %s9351_s2  ;;  %v12658_v24 = vld [vmem:[#allocation65_spill] sm:$0xff] }
 0x135   :  { %12630 = vst [vmem:[#allocation16_spill] sm:$0xff] %v10558_v26  ;;  %8134 = vmatmul.mubr.f32.gmra.mrb[24].mxu1 %v10000_v46  ;;  %8305 = vmatmul.mubr.f32.gmra.mrb[26].mxu0 %v10002_v12  ;;  %v10576_v46 = vsub.f32 %v10477_v44, %v12634_v6  ;;  %v12635_v12 = vand.u32 4294901760, %v10480_v18  ;;  %v4570_v6 = vmul.f32 %v12590_v3, %v12590_v3  ;;  %v12638_v44 = vand.u32 4294901760, %v10498_v52  ;;  %v12641_v3 = vld [vmem:[#allocation62_spill] sm:$0xff] }
 0x136   :  { %8136 = vmatprep.mubr.f32.mxu1 %v10004_v22  ;;  %8307 = vmatprep.mubr.f32.mxu0 %v12633_v42  ;;  %v12656_v22 = vand.u32 4294901760, %v10569_v36 }
 0x137   :  { %v10581_v61 = vsub.f32 %v10480_v18, %v12635_v12  ;;  %v10597_v42 = vsub.f32 %v10498_v52, %v12638_v44  ;;  %v10612_v18 = vsub.f32 %v10608_v53, %v12641_v3  ;;  %v12643_v44 = vld [vmem:[#allocation57_spill] sm:$0xff]  ;;  %v12644_v12 = vld [vmem:[#allocation59_spill] sm:$0xff]  ;;  %v10622_v52 = vand.u32 4294901760, %v5890_v4 }
 0x138   :  { %v12652_v53 = vand.u32 4294901760, %v10539_v21  ;;  %v10664_v56 = vsub.f32 %v10569_v36, %v12656_v22  ;;  %v5861_v22 = vmul.f32 %v10421_v2, %v12600_v45  ;;  %568 = vrot.lane.b32.xlu1 %v10535_v47, %s9352_s21  ;;  %296 = vrot.lane.b32.xlu0 %v10558_v26, %s9351_s2  ;;  %v4574_v47 = vmul.f32 %v12606_v9, %v12606_v9 }
 0x139   :  { %12642 = vst [vmem:[#allocation71_spill] sm:$0xff] %v10612_v18  ;;  %8137 = vmatmul.mubr.f32.gmra.mrb[26].mxu1 %v12643_v44  ;;  %8308 = vmatmul.mubr.f32.gmra.mrb[28].mxu0 %v12644_v12  ;;  %12646 = vst [vmem:[#allocation72_spill] sm:$0xff] %v10622_v52  ;;  %v12649_v12 = vand.u32 4294901760, %v10527_v33 }
 0x13a   :  { %8139 = vmatprep.mubr.f32.mxu1 %v12647_v20  ;;  %8310 = vmatprep.mubr.f32.mxu0 %v12648_v57  ;;  %v4599_v57 = vsel %vm120_vm0, %v4570_v6, 0  ;;  %v10646_v44 = vsub.f32 %v10539_v21, %v12652_v53  ;;  %v12655_v6 = vld [vmem:[#allocation64_spill] sm:$0xff]  ;;  %v4571_v53 = vmul.f32 %v12595_v63, %v12595_v63  ;;  %v12660_v63 = vand.u32 4294901760, %v10602_v34 }
 0x13b   :  { %v10632_v3 = vsub.f32 %v10527_v33, %v12649_v12  ;;  %v12653_v12 = vand.u32 4294901760, %v10544_v30  ;;  %v10674_v21 = vand.u32 4294901760, %v4599_v57 }
 0x13c   :  { %v10694_v2 = vsub.f32 %v10602_v34, %v12660_v63  ;;  %v5893_v63 = vsel %vm120_vm0, %v5860_v28, 0  ;;  %v4602_v58 = vsel %vm120_vm0, %v4571_v53, 0  ;;  %570 = vrot.lane.b32.xlu1 %v10558_v26, %s9352_s21  ;;  %298 = vrot.lane.b32.xlu0 %v10612_v18, %s9351_s2 }
 0x13d   :  { %v10651_v33 = vsub.f32 %v10544_v30, %v12653_v12  ;;  %8140 = vmatmul.mubr.f32.gmra.mrb[28].mxu1 %v12654_v32  ;;  %8311 = vmatmul.mubr.f32.gmra.mrb[30].mxu0 %v12655_v6  ;;  %v10667_v12 = vsub.f32 %v5890_v4, %v10622_v52  ;;  %v12659_v4 = vand.u32 4294901760, %v10586_v48  ;;  %v12661_v52 = vld [vmem:[#allocation66_spill] sm:$0xff]  ;;  %v4573_v30 = vmul.f32 %v12600_v45, %v12600_v45 }
 0x13e   :  { %8142 = vmatprep.mubr.f32.mxu1 %v12658_v24  ;;  %8317 = vmatprep.mubr.f32.mxu0 %v9685_v7  ;;  %v4572_v7 = vmul.f32 %v12598_v49, %v12598_v49  ;;  %v5863_v49 = vmul.f32 %v10485_v8, %v12613_v1  ;;  %v12663_v45 = vand.u32 4294901760, %v10636_v35  ;;  %v10732_v59 = vand.u32 4294901760, %v5893_v63  ;;  %v12665_v8 = vld [vmem:[#allocation12_spill] sm:$0xff] }
 0x13f   :  { %12657 = vst [vmem:[#allocation63_spill] sm:$0xff] %v10667_v12  ;;  %v10683_v36 = vsub.f32 %v10586_v48, %v12659_v4  ;;  %v5862_v4 = vmul.f32 %v10451_v37, %v12606_v9  ;;  %v10712_v37 = vsub.f32 %v4599_v57, %v10674_v21  ;;  %v12666_v9 = vand.u32 4294901760, %v10667_v12 }
 0x140   :  { %v4605_v53 = vsel %vm120_vm0, %v4572_v7, 0  ;;  %v5902_v26 = vsel %vm120_vm0, %v5863_v49, 0  ;;  %v4611_v49 = vsel %vm120_vm0, %v4574_v47, 0  ;;  %572 = vrot.lane.b32.xlu1 %v10612_v18, %s9352_s21 }
 0x141   :  { %8143 = vmatmul.mubr.f32.gmra.mrb[30].mxu1 %v12661_v52  ;;  %8318 = vmatmul.mubr.f32.vlgmr.msra.gmra.mrb[16].mxu0 %v9687_v62  ;;  %12662 = vst [vmem:[#allocation64_spill] sm:$0xff] %v10712_v37  ;;  %v5896_v62 = vsel %vm120_vm0, %v5861_v22, 0  ;;  %v5899_v28 = vsel %vm120_vm0, %v5862_v4, 0  ;;  %v5864_v22 = vmul.f32 %v10491_v25, %v12615_v0  ;;  %v10754_v4 = vsub.f32 %v10667_v12, %v12666_v9 }
 0x142   :  { %8149 = vmatprep.mubr.f32.mxu1 %v9690_v15  ;;  %8320 = vmatprep.mubr.f32.mxu0 %v9696_v10  ;;  %v10723_v15 = vsub.f32 %v10636_v35, %v12663_v45  ;;  %v12664_v10 = vand.u32 4294901760, %v10639_v38  ;;  %v10742_v45 = vand.u32 4294901760, %v4602_v58  ;;  %v10744_v7 = vand.u32 4294901760, %v5896_v62  ;;  %v12696_v35 = vld [vmem:[#allocation70_spill] sm:$0xff] }
 0x143   :  { %8776 = vmatpush3.bf16.msra.mxu0 %v9447_v13  ;;  %v10763_v25 = vand.u32 4294901760, %v5899_v28  ;;  %v5865_v9 = vmul.f32 %v10531_v31, %v12623_v27  ;;  %v10789_v47 = vand.u32 4294901760, %v5902_v26 }
 0x144   :  { %v10728_v57 = vsub.f32 %v10639_v38, %v12664_v10  ;;  %8778 = vmatprep.subr.bf16.mxu0 %v12665_v8  ;;  %v4608_v10 = vsel %vm120_vm0, %v4573_v30, 0  ;;  %v10787_v31 = vsub.f32 %v5896_v62, %v10744_v7  ;;  %v5866_v62 = vmul.f32 %v10554_v19, %v12629_v60  ;;  %v12686_v19 = vld [vmem:[#allocation42_spill] sm:$0xff] }
 0x145   :  { %8150 = vmatmul.mubr.f32.vlgmr.msra.gmra.mrb[16].mxu1 %v9711_v14  ;;  %8321 = vmatmul.mubr.f32.gmra.mrb[18].mxu0 %v9721_v5  ;;  %v10757_v5 = vand.u32 4294901760, %v4605_v53  ;;  %12668 = vst [vmem:[#allocation66_spill] sm:$0xff] %v10763_v25  ;;  %v10770_v14 = vsub.f32 %v5893_v63, %v10732_v59  ;;  %v10772_v12 = vand.u32 4294901760, %v4608_v10  ;;  %12673 = vst [vmem:[#allocation77_spill] sm:$0xff] %v10789_v47 }
 0x146   :  { %8752 = vmatpush3.bf16.msra.mxu1 %v9447_v13  ;;  %8152 = vmatprep.mubr.f32.mxu1 %v9761_v16  ;;  %v4575_v16 = vmul.f32 %v12613_v1, %v12613_v1  ;;  %v10784_v1 = vsub.f32 %v4602_v58, %v10742_v45  ;;  %12672 = vst [vmem:[#allocation76_spill] sm:$0xff] %v10787_v31 }
 0x147   :  { %12667 = vst [vmem:[#allocation65_spill] sm:$0xff] %v10757_v5  ;;  %8323 = vmatprep.mubr.f32.mxu0 %v9769_v40  ;;  %8754 = vmatprep.subr.bf16.mxu1 %v12665_v8  ;;  %12669 = vst [vmem:[#allocation12_spill] sm:$0xff] %v10770_v14  ;;  %v4576_v40 = vmul.f32 %v12615_v0, %v12615_v0  ;;  %v5905_v0 = vsel %vm120_vm0, %v5864_v22, 0  ;;  %v10801_v58 = vsub.f32 %v4605_v53, %v10757_v5 }
 0x148   :  { %12670 = vst [vmem:[#allocation74_spill] sm:$0xff] %v10772_v12  ;;  %12671 = vst [vmem:[#allocation75_spill] sm:$0xff] %v10784_v1  ;;  %v10806_v30 = vsub.f32 %v5899_v28, %v10763_v25  ;;  %v10808_v22 = vand.u32 4294901760, %v4611_v49  ;;  %v12326_v63 = vand.u32 4294901760, %v10770_v14  ;;  %v10816_v18 = vand.u32 4294901760, %v5905_v0 }
 0x149   :  { %8153 = vmatmul.mubr.f32.gmra.mrb[18].mxu1 %v9763_v17  ;;  %8324 = vmatmul.mubr.f32.gmra.mrb[20].mxu0 %v9771_v11  ;;  %v12674_v17 = vand.u32 4294901760, %v10712_v37  ;;  %12675 = vst [vmem:[#allocation78_spill] sm:$0xff] %v10801_v58  ;;  %v4617_v53 = vsel %vm120_vm0, %v4576_v40, 0 }
 0x14a   :  { %8155 = vmatprep.mubr.f32.mxu1 %v9783_v43  ;;  %8326 = vmatprep.mubr.f32.mxu0 %v9824_v29  ;;  %12676 = vst [vmem:[#allocation79_spill] sm:$0xff] %v10806_v30  ;;  %12677 = vst [vmem:[#allocation80_spill] sm:$0xff] %v10808_v22  ;;  %v4614_v43 = vsel %vm120_vm0, %v4575_v16, 0  ;;  %v5908_v29 = vsel %vm120_vm0, %v5865_v9, 0  ;;  %v10825_v9 = vsub.f32 %v5902_v26, %v10789_v47  ;;  %v10841_v28 = vand.u32 4294901760, %v4617_v53  ;;  %v12687_v16 = vld [vmem:[#allocation47_spill] sm:$0xff] }
 0x14b   :  { %v10798_v11 = vsub.f32 %v10712_v37, %v12674_v17  ;;  %v10814_v17 = vsub.f32 %v4608_v10, %v10772_v12  ;;  %12679 = vst [vmem:[#allocation82_spill] sm:$0xff] %v10816_v18  ;;  %v10829_v10 = vand.u32 4294901760, %v4614_v43  ;;  %v10831_v40 = vand.u32 4294901760, %v5908_v29 }
 0x14c   :  { %12680 = vst [vmem:[#allocation83_spill] sm:$0xff] %v10825_v9  ;;  %v10839_v26 = vsub.f32 %v4611_v49, %v10808_v22  ;;  %12684 = vst [vmem:[#allocation87_spill] sm:$0xff] %v10841_v28  ;;  %v12688_v49 = vand.u32 4294901760, %v10784_v1 }
 0x14d   :  { %12678 = vst [vmem:[#allocation81_spill] sm:$0xff] %v10814_v17  ;;  %8156 = vmatmul.mubr.f32.gmra.mrb[20].mxu1 %v9785_v41  ;;  %8327 = vmatmul.mubr.f32.gmra.mrb[22].mxu0 %v9838_v50  ;;  %12681 = vst [vmem:[#allocation84_spill] sm:$0xff] %v10829_v10  ;;  %v5911_v41 = vsel %vm120_vm0, %v5866_v62, 0  ;;  %v4577_v50 = vmul.f32 %v12623_v27, %v12623_v27  ;;  %v10851_v27 = vsub.f32 %v5905_v0, %v10816_v18  ;;  %v12691_v0 = vld [vmem:[#allocation44_spill] sm:$0xff] }
 0x14e   :  { %8158 = vmatprep.mubr.f32.mxu1 %v9854_v23  ;;  %8329 = vmatprep.mubr.f32.mxu0 %v9887_v51  ;;  %12682 = vst [vmem:[#allocation85_spill] sm:$0xff] %v10831_v40  ;;  %12683 = vst [vmem:[#allocation86_spill] sm:$0xff] %v10839_v26  ;;  %v10847_v51 = vsub.f32 %v10770_v14, %v12326_v63  ;;  %v10858_v37 = vsub.f32 %v10784_v1, %v12688_v49  ;;  %v12689_v23 = vand.u32 4294901760, %v10787_v31  ;;  %v12692_v14 = vld [vmem:[#allocation48_spill] sm:$0xff]  ;;  %v12695_v1 = vld [vmem:[#allocation62_spill] sm:$0xff] }
 0x14f   :  { %12685 = vst [vmem:[#allocation88_spill] sm:$0xff] %v10851_v27  ;;  %v10866_v62 = vand.u32 4294901760, %v5911_v41  ;;  %v4620_v49 = vsel %vm120_vm0, %v4577_v50, 0 }
 0x150   :  { %v10863_v38 = vsub.f32 %v10787_v31, %v12689_v23  ;;  %v5867_v23 = vmul.f32 %v12696_v35, %v12695_v1  ;;  %v12697_v31 = vand.u32 4294901760, %v10801_v58  ;;  %v12700_v35 = vand.u32 4294901760, %v10814_v17 }
 0x151   :  { %8159 = vmatmul.mubr.f32.gmra.mrb[22].mxu1 %v12686_v19  ;;  %8330 = vmatmul.mubr.f32.gmra.mrb[24].mxu0 %v12687_v16  ;;  %12690 = vst [vmem:[#allocation42_spill] sm:$0xff] %v10866_v62  ;;  %v10871_v19 = vsub.f32 %v4614_v43, %v10829_v10  ;;  %v10874_v16 = vsub.f32 %v5908_v29, %v10831_v40  ;;  %v12702_v43 = vld [vmem:[#allocation53_spill] sm:$0xff]  ;;  %v10909_v40 = vand.u32 4294901760, %v4620_v49 }
 0x152   :  { %8161 = vmatprep.mubr.f32.mxu1 %v12691_v0  ;;  %8332 = vmatprep.mubr.f32.mxu0 %v12692_v14  ;;  %v10882_v63 = vsub.f32 %v10801_v58, %v12697_v31  ;;  %v12698_v0 = vand.u32 4294901760, %v10806_v30  ;;  %v10891_v29 = vsub.f32 %v4617_v53, %v10841_v28  ;;  %v10897_v48 = vsub.f32 %v10814_v17, %v12700_v35  ;;  %v12705_v35 = vld [vmem:[#allocation54_spill] sm:$0xff]  ;;  %v12706_v31 = vld [vmem:[#allocation56_spill] sm:$0xff] }
 0x153   :  { %12693 = vst [vmem:[#allocation47_spill] sm:$0xff] %v10871_v19  ;;  %12694 = vst [vmem:[#allocation44_spill] sm:$0xff] %v10874_v16  ;;  %v7983_v34 = vpop.f32.mrb[0].mxu0  ;;  %v4578_v58 = vmul.f32 %v12629_v60, %v12629_v60  ;;  %v10907_v50 = vsub.f32 %v5911_v41, %v10866_v62  ;;  %v12707_v60 = vand.u32 4294901760, %v10825_v9  ;;  %v5914_v28 = vsel %vm120_vm0, %v5867_v23, 0 }
 0x154   :  { %v10887_v14 = vsub.f32 %v10806_v30, %v12698_v0  ;;  %12699 = vst [vmem:[#allocation48_spill] sm:$0xff] %v10891_v29  ;;  %v1790_v0 = vpop.f32.mrb[1].mxu0  ;;  %v12701_v30 = vld [vmem:[#allocation15_spill] sm:$0xff]  ;;  %12704 = vst [vmem:[#allocation70_spill] sm:$0xff] %v10909_v40  ;;  %v12708_v62 = vand.u32 4294901760, %v10839_v26  ;;  %v4579_v53 = vmul.f32 %v12695_v1, %v12695_v1  ;;  %v10944_v47 = vand.u32 4294901760, %v5914_v28 }
 0x155   :  { %8162 = vmatmul.mubr.f32.gmra.mrb[24].mxu1 %v12701_v30  ;;  %8333 = vmatmul.mubr.f32.gmra.mrb[26].mxu0 %v12702_v43  ;;  %12703 = vst [vmem:[#allocation62_spill] sm:$0xff] %v10907_v50  ;;  %v10916_v17 = vsub.f32 %v10825_v9, %v12707_v60  ;;  %v12709_v30 = vand.u32 4294901760, %v10851_v27  ;;  %v4623_v23 = vsel %vm120_vm0, %v4578_v58, 0  ;;  %v10942_v9 = vsub.f32 %v4620_v49, %v10909_v40  ;;  %v12714_v58 = vld [vmem:[#allocation61_spill] sm:$0xff] }
 0x156   :  { %8164 = vmatprep.mubr.f32.mxu1 %v12705_v35  ;;  %8335 = vmatprep.mubr.f32.mxu0 %v12706_v31  ;;  %v10926_v35 = vsub.f32 %v10839_v26, %v12708_v62  ;;  %v12710_v26 = vld [vmem:[#allocation57_spill] sm:$0xff]  ;;  %v12711_v31 = vld [vmem:[#allocation59_spill] sm:$0xff]  ;;  %12713 = vst [vmem:[#allocation53_spill] sm:$0xff] %v10944_v47  ;;  %v12715_v1 = vand.u32 4294901760, %v10871_v19  ;;  %v12719_v22 = vand.u32 4294901760, %v10907_v50 }
 0x157   :  { %v7899_v10 = vpop.f32.mrb[0].mxu1  ;;  %v7986_v60 = vpop.f32.mrb[2].mxu0  ;;  %v10933_v43 = vsub.f32 %v10851_v27, %v12709_v30  ;;  %12712 = vst [vmem:[#allocation15_spill] sm:$0xff] %v10942_v9 }
 0x158   :  { %v8797_v41 = vadd.f32 %v7983_v34, %v7899_v10  ;;  %v1250_v18 = vpop.f32.mrb[1].mxu1  ;;  %v1802_v62 = vpop.f32.mrb[3].mxu0  ;;  %v10952_v10 = vsub.f32 %v10871_v19, %v12715_v1  ;;  %v4626_v19 = vsel %vm120_vm0, %v4579_v53, 0  ;;  %v12721_v53 = vand.u32 4294901760, %v10565_v39 }
 0x159   :  { %8165 = vmatmul.mubr.f32.gmra.mrb[26].mxu1 %v12710_v26  ;;  %8336 = vmatmul.mubr.f32.gmra.mrb[28].mxu0 %v12711_v31  ;;  %v8798_v30 = vadd.f32 %v1790_v0, %v1250_v18  ;;  %v12716_v26 = vand.u32 4294901760, %v10874_v16  ;;  %v12717_v18 = vand.u32 4294901760, %v10891_v29  ;;  %v10965_v0 = vand.u32 4294901760, %v4623_v23 }
 0x15a   :  { %8167 = vmatprep.mubr.f32.mxu1 %v12647_v20  ;;  %8338 = vmatprep.mubr.f32.mxu0 %v12714_v58  ;;  %v1890_v49 = vmul.f32 0.0075987587, %v8797_v41  ;;  %v12724_v39 = vand.u32 4294901760, %v10576_v46  ;;  %v12727_v46 = vand.u32 4294901760, %v10597_v42 }
 0x15b   :  { %v10957_v31 = vsub.f32 %v10874_v16, %v12716_v26  ;;  %v10963_v20 = vsub.f32 %v10891_v29, %v12717_v18  ;;  %12718 = vst [vmem:[#allocation54_spill] sm:$0xff] %v10965_v0  ;;  %v1884_v58 = vmul.f32 0.0010283802, %v8798_v30  ;;  %v7902_v34 = vpop.f32.mrb[2].mxu1  ;;  %v7989_v27 = vpop.f32.mrb[4].mxu0  ;;  %v10974_v18 = vsub.f32 %v10907_v50, %v12719_v22 }
 0x15c   :  { %v8799_v40 = vadd.f32 %v7986_v60, %v7902_v34  ;;  %v1264_v26 = vpop.f32.mrb[3].mxu1  ;;  %v1814_v16 = vpop.f32.mrb[5].mxu0  ;;  %v10978_v29 = vsub.f32 %v5914_v28, %v10944_v47  ;;  %v10987_v34 = vsub.f32 %v4623_v23, %v10965_v0  ;;  %v10989_v30 = vand.u32 4294901760, %v4626_v19 }
 0x15d   :  { %8168 = vmatmul.mubr.f32.gmra.mrb[28].mxu1 %v12654_v32  ;;  %8339 = vmatmul.mubr.f32.gmra.mrb[30].mxu0 %v12655_v6  ;;  %v1896_v1 = vadd.f32 %v1890_v49, %v1884_v58  ;;  %v8800_v12 = vadd.f32 %v1802_v62, %v1264_v26  ;;  %v1885_v28 = vmul.f32 0.0010283802, %v8797_v41  ;;  %v12725_v22 = vand.u32 4294901760, %v10942_v9 }
 0x15e   :  { %12720 = vst [vmem:[#allocation56_spill] sm:$0xff] %v10978_v29  ;;  %8170 = vmatprep.mubr.f32.mxu1 %v12658_v24  ;;  %8513 = vmatprep.mubr.f32.mxu0 %v12721_v53  ;;  %v1892_v60 = vmul.f32 0.0075987587, %v8799_v40  ;;  %12722 = vst [vmem:[#allocation57_spill] sm:$0xff] %v10987_v34  ;;  %v1903_v41 = vmul.f32 0.036000773, %v8799_v40 }
 0x15f   :  { %12723 = vst [vmem:[#allocation59_spill] sm:$0xff] %v10989_v30  ;;  %v1886_v49 = vmul.f32 0.0010283802, %v8800_v12  ;;  %v1891_v62 = vmul.f32 0.0075987587, %v8800_v12  ;;  %v7905_v24 = vpop.f32.mrb[4].mxu1  ;;  %v10998_v23 = vsub.f32 %v10942_v9, %v12725_v22 }
 0x160   :  { %v1902_v58 = vmul.f32 0.036000773, %v8800_v12  ;;  %v7992_v26 = vpop.f32.mrb[6].mxu0  ;;  %v11001_v12 = vadd.f32 %v7989_v27, %v7905_v24  ;;  %v1278_v0 = vpop.f32.mrb[5].mxu1  ;;  %v1887_v6 = vmul.f32 0.0010283802, %v8799_v40 }
 0x161   :  { %8171 = vmatmul.mubr.f32.gmra.mrb[30].mxu1 %v12661_v52  ;;  %8514 = vmatmul.mubr.f32.vlgmr.msra.gmra.mrb[32].mxu0 %v12724_v39  ;;  %v1897_v32 = vadd.f32 %v1891_v62, %v1885_v28  ;;  %v1898_v50 = vadd.f32 %v1892_v60, %v1886_v49  ;;  %v1826_v47 = vpop.f32.mrb[7].mxu0  ;;  %v12726_v52 = vand.u32 4294901760, %v10581_v61  ;;  %v1914_v39 = vmul.f32 0.109360695, %v8799_v40  ;;  %v12729_v61 = vld [vmem:[#allocation17_spill] sm:$0xff] }
 0x162   :  { %8516 = vmatprep.mubr.f32.mxu0 %v12727_v46  ;;  %v1908_v53 = vadd.f32 %v1902_v58, %v1896_v1  ;;  %v8802_v25 = vadd.f32 %v1814_v16, %v1278_v0  ;;  %8780 = vmatpush3.bf16.msra.mxu0 %v12665_v8  ;;  %v1894_v27 = vmul.f32 0.0075987587, %v11001_v12  ;;  %v11011_v62 = vsub.f32 %v4626_v19, %v10989_v30 }
 0x163   :  { %8345 = vmatprep.mubr.f32.mxu1 %v12726_v52  ;;  %v1909_v28 = vadd.f32 %v1903_v41, %v1897_v32  ;;  %v7908_v60 = vpop.f32.mrb[6].mxu1  ;;  %v7995_v49 = vpop.f32.mrb[8].mxu0  ;;  %8782 = vmatprep.subr.bf16.mxu0 %v12729_v61  ;;  %v12730_v16 = vand.u32 4294901760, %v10619_v54  ;;  %v12731_v0 = vand.u32 4294901760, %v10632_v3  ;;  %v12732_v19 = vand.u32 4294901760, %v10646_v44 }
 0x164   :  { %12728 = vst [vmem:[#allocation61_spill] sm:$0xff] %v11011_v62  ;;  %v1920_v42 = vadd.f32 %v1914_v39, %v1908_v53  ;;  %v1888_v24 = vmul.f32 0.0010283802, %v8802_v25  ;;  %v1893_v52 = vmul.f32 0.0075987587, %v8802_v25  ;;  %v8803_v58 = vadd.f32 %v7992_v26, %v7908_v60  ;;  %v1292_v41 = vpop.f32.mrb[7].mxu1 }
 0x165   :  { %v1904_v1 = vmul.f32 0.036000773, %v8802_v25  ;;  %8346 = vmatmul.mubr.f32.vlgmr.msra.gmra.mrb[32].mxu1 %v12730_v16  ;;  %8517 = vmatmul.mubr.f32.gmra.mrb[34].mxu0 %v12731_v0  ;;  %v1915_v40 = vmul.f32 0.109360695, %v8802_v25  ;;  %v1926_v32 = vmul.f32 0.21300554, %v8802_v25  ;;  %v8804_v9 = vadd.f32 %v1826_v47, %v1292_v41 }
 0x166   :  { %v1838_v46 = vpop.f32.mrb[9].mxu0  ;;  %8756 = vmatpush3.bf16.msra.mxu1 %v12665_v8  ;;  %8348 = vmatprep.mubr.f32.mxu1 %v12732_v19  ;;  %v1899_v53 = vadd.f32 %v1893_v52, %v1887_v6  ;;  %v1900_v39 = vadd.f32 %v1894_v27, %v1888_v24  ;;  %v12733_v54 = vand.u32 4294901760, %v10651_v33  ;;  %v12734_v26 = vand.u32 4294901760, %v10978_v29 }
 0x167   :  { %v1910_v22 = vadd.f32 %v1904_v1, %v1898_v50  ;;  %v1921_v16 = vadd.f32 %v1915_v40, %v1909_v28  ;;  %v1932_v3 = vadd.f32 %v1926_v32, %v1920_v42  ;;  %v7911_v0 = vpop.f32.mrb[8].mxu1  ;;  %v7998_v30 = vpop.f32.mrb[10].mxu0  ;;  %8758 = vmatprep.subr.bf16.mxu1 %v12729_v61  ;;  %v1895_v44 = vmul.f32 0.0075987587, %v8804_v9 }
 0x168   :  { %8519 = vmatprep.mubr.f32.mxu0 %v12733_v54  ;;  %v11027_v8 = vsub.f32 %v10978_v29, %v12734_v26  ;;  %v11030_v6 = vadd.f32 %v7995_v49, %v7911_v0  ;;  %v1889_v47 = vmul.f32 0.0010283802, %v11001_v12  ;;  %v12735_v33 = vand.u32 4294901760, %v10664_v56 }
 0x169   :  { %v12736_v50 = vand.u32 4294901760, %v10683_v36  ;;  %v12387_v28 = vand.u32 4294901760, %v11011_v62  ;;  %v1907_v27 = vmul.f32 0.036000773, %v8803_v58  ;;  %v11038_v60 = vmul.f32 0.109360695, %v8803_v58 }
 0x16a   :  { %8349 = vmatmul.mubr.f32.gmra.mrb[34].mxu1 %v12735_v33  ;;  %v1906_v42 = vmul.f32 0.036000773, %v8804_v9  ;;  %v12737_v24 = vand.u32 4294901760, %v10694_v2  ;;  %v12738_v49 = vand.u32 4294901760, %v10723_v15  ;;  %v12739_v52 = vand.u32 4294901760, %v10987_v34  ;;  %v1306_v2 = vpop.f32.mrb[9].mxu1 }
 0x16b   :  { %8520 = vmatmul.mubr.f32.gmra.mrb[36].mxu0 %v12736_v50  ;;  %v1929_v1 = vmul.f32 0.21300554, %v8803_v58  ;;  %v1940_v36 = vmul.f32 0.26601174, %v8803_v58  ;;  %v1917_v40 = vmul.f32 0.109360695, %v8804_v9  ;;  %v1901_v32 = vadd.f32 %v1895_v44, %v1889_v47 }
 0x16c   :  { %8351 = vmatprep.mubr.f32.mxu1 %v12737_v24  ;;  %8522 = vmatprep.mubr.f32.mxu0 %v12738_v49  ;;  %v11047_v56 = vsub.f32 %v10987_v34, %v12739_v52  ;;  %v1928_v41 = vmul.f32 0.21300554, %v8804_v9  ;;  %v1939_v19 = vmul.f32 0.26601174, %v8804_v9  ;;  %v11050_v54 = vmul.f32 0.21300554, %v11030_v6 }
 0x16d   :  { %v1912_v0 = vadd.f32 %v1906_v42, %v1900_v39  ;;  %v1905_v26 = vmul.f32 0.036000773, %v11001_v12  ;;  %v1913_v15 = vadd.f32 %v1907_v27, %v1901_v32  ;;  %v1916_v33 = vmul.f32 0.109360695, %v11001_v12  ;;  %v1850_v50 = vpop.f32.mrb[11].mxu0  ;;  %v7914_v42 = vpop.f32.mrb[10].mxu1 }
 0x16e   :  { %v12740_v24 = vand.u32 4294901760, %v10728_v57  ;;  %v12741_v58 = vand.u32 4294901760, %v10754_v4  ;;  %v11061_v9 = vsub.f32 %v11011_v62, %v12387_v28  ;;  %v1942_v39 = vmul.f32 0.26601174, %v11030_v6  ;;  %v8001_v49 = vpop.f32.mrb[12].mxu0  ;;  %v1320_v28 = vpop.f32.mrb[11].mxu1 }
 0x16f   :  { %v8806_v44 = vadd.f32 %v1838_v46, %v1306_v2  ;;  %v1924_v47 = vadd.f32 %v11038_v60, %v1912_v0  ;;  %v1927_v27 = vmul.f32 0.21300554, %v11001_v12  ;;  %v12742_v57 = vand.u32 4294901760, %v10798_v11  ;;  %v1862_v46 = vpop.f32.mrb[13].mxu0  ;;  %v7917_v5 = vpop.f32.mrb[12].mxu1 }
 0x170   :  { %8352 = vmatmul.mubr.f32.gmra.mrb[36].mxu1 %v12740_v24  ;;  %8523 = vmatmul.mubr.f32.gmra.mrb[38].mxu0 %v12741_v58  ;;  %v12743_v4 = vand.u32 4294901760, %v10847_v51  ;;  %v1911_v52 = vadd.f32 %v1905_v26, %v1899_v53  ;;  %v1922_v32 = vadd.f32 %v1916_v33, %v1910_v22  ;;  %v1938_v24 = vmul.f32 0.26601174, %v11001_v12  ;;  %v8004_v51 = vpop.f32.mrb[14].mxu0 }
 0x171   :  { %8354 = vmatprep.mubr.f32.mxu1 %v12742_v57  ;;  %v11071_v58 = vadd.f32 %v7998_v30, %v7914_v42  ;;  %v1958_v0 = vmul.f32 0.109360695, %v11030_v6  ;;  %v1919_v2 = vmul.f32 0.109360695, %v8806_v44  ;;  %v1930_v25 = vmul.f32 0.21300554, %v8806_v44 }
 0x172   :  { %8525 = vmatprep.mubr.f32.mxu0 %v12743_v4  ;;  %v1933_v62 = vadd.f32 %v1927_v27, %v1921_v16  ;;  %v1923_v34 = vadd.f32 %v1917_v40, %v1911_v52  ;;  %v1934_v29 = vadd.f32 %v1928_v41, %v1922_v32  ;;  %v1941_v11 = vmul.f32 0.26601174, %v8806_v44  ;;  %v1334_v42 = vpop.f32.mrb[13].mxu1  ;;  %v1874_v4 = vpop.f32.mrb[15].mxu0 }
 0x173   :  { %v1944_v57 = vadd.f32 %v1938_v24, %v1932_v3  ;;  %v12744_v53 = vand.u32 4294901760, %v10858_v37  ;;  %v12745_v12 = vand.u32 4294901760, %v10863_v38  ;;  %v1969_v30 = vmul.f32 0.036000773, %v11030_v6 }
 0x174   :  { %v1925_v22 = vadd.f32 %v1919_v2, %v1913_v15  ;;  %v1936_v26 = vadd.f32 %v1930_v25, %v1924_v47  ;;  %v1945_v33 = vadd.f32 %v1939_v19, %v1933_v62  ;;  %v12746_v16 = vand.u32 4294901760, %v10882_v63  ;;  %v7920_v47 = vpop.f32.mrb[14].mxu1 }
 0x175   :  { %8355 = vmatmul.mubr.f32.gmra.mrb[38].mxu1 %v12744_v53  ;;  %8526 = vmatmul.mubr.f32.gmra.mrb[40].mxu0 %v12745_v12  ;;  %v12747_v3 = vand.u32 4294901760, %v10887_v14  ;;  %v1935_v40 = vadd.f32 %v1929_v1, %v1923_v34  ;;  %v1946_v27 = vadd.f32 %v1940_v36, %v1934_v29  ;;  %v1952_v37 = vadd.f32 %v1944_v57, %v1928_v41  ;;  %v1348_v12 = vpop.f32.mrb[15].mxu1 }
 0x176   :  { %8357 = vmatprep.mubr.f32.mxu1 %v12746_v16  ;;  %v1968_v52 = vmul.f32 0.036000773, %v8806_v44  ;;  %v1980_v38 = vmul.f32 0.0075987587, %v11030_v6  ;;  %v1937_v32 = vadd.f32 %v11050_v54, %v1925_v22  ;;  %v1948_v24 = vadd.f32 %v1942_v39, %v1936_v26 }
 0x177   :  { %8528 = vmatprep.mubr.f32.mxu0 %v12747_v3  ;;  %v1953_v15 = vadd.f32 %v1945_v33, %v1929_v1  ;;  %v1947_v62 = vadd.f32 %v1941_v11, %v1935_v40  ;;  %v1954_v19 = vadd.f32 %v1946_v27, %v1930_v25  ;;  %v1962_v53 = vadd.f32 %v1952_v37, %v11038_v60 }
 0x178   :  { %v8808_v63 = vadd.f32 %v1850_v50, %v1320_v28  ;;  %v12748_v14 = vand.u32 4294901760, %v10897_v48  ;;  %v8809_v29 = vadd.f32 %v8001_v49, %v7917_v5  ;;  %v8810_v36 = vadd.f32 %v1862_v46, %v1334_v42 }
 0x179   :  { %v1963_v34 = vadd.f32 %v1953_v15, %v1919_v2  ;;  %v11088_v41 = vadd.f32 %v8004_v51, %v7920_v47  ;;  %v12749_v6 = vand.u32 4294901760, %v10916_v17  ;;  %v1955_v1 = vadd.f32 %v1947_v62, %v11050_v54 }
 0x17a   :  { %8358 = vmatmul.mubr.f32.gmra.mrb[40].mxu1 %v12748_v14  ;;  %v1964_v39 = vadd.f32 %v1958_v0, %v1954_v19  ;;  %v1974_v44 = vadd.f32 %v1968_v52, %v1962_v53  ;;  %v1981_v25 = vmul.f32 0.0075987587, %v8808_v63  ;;  %v12750_v60 = vand.u32 4294901760, %v10926_v35  ;;  %v543_v52 = vpop.permute.xlu1 %542  ;;  %v12757_v53 = vld [vmem:[#allocation35_spill] sm:$0xff]  ;;  %v12759_v14 = vld [vmem:[#allocation21_spill] sm:$0xff] }
 0x17b   :  { %8529 = vmatmul.mubr.f32.gmra.mrb[42].mxu0 %v12749_v6  ;;  %v12751_v28 = vand.u32 4294901760, %v10933_v43  ;;  %v1975_v48 = vadd.f32 %v1969_v30, %v1963_v34  ;;  %v6137_v5 = vand.u32 4294901760, %v11027_v8  ;;  %v4839_v50 = vand.u32 4294901760, %v11047_v56 }
 0x17c   :  { %8360 = vmatprep.mubr.f32.mxu1 %v12750_v60  ;;  %v4849_v49 = vand.u32 4294901760, %v11061_v9  ;;  %v1986_v17 = vadd.f32 %v1980_v38, %v1974_v44  ;;  %v1971_v46 = vmul.f32 0.036000773, %v11071_v58  ;;  %v1982_v54 = vmul.f32 0.0075987587, %v11071_v58  ;;  %v269_v9 = vpop.permute.xlu0 %268 }
 0x17d   :  { %8531 = vmatprep.mubr.f32.mxu0 %v12751_v28  ;;  %v1959_v0 = vmul.f32 0.109360695, %v8808_v63  ;;  %v12752_v2 = vand.u32 4294901760, %v10952_v10  ;;  %v1993_v35 = vmul.f32 0.0010283802, %v11071_v58  ;;  %v1987_v43 = vadd.f32 %v1981_v25, %v1975_v48  ;;  %v12763_v48 = vld [vmem:[#allocation38_spill] sm:$0xff] }
 0x17e   :  { %v1992_v11 = vmul.f32 0.0010283802, %v8808_v63  ;;  %v1970_v57 = vmul.f32 0.036000773, %v8808_v63  ;;  %v12753_v8 = vand.u32 4294901760, %v10957_v31  ;;  %v12754_v56 = vand.u32 4294901760, %v10963_v20 }
 0x17f   :  { %8361 = vmatmul.mubr.f32.gmra.mrb[42].mxu1 %v12752_v2  ;;  %v1973_v51 = vmul.f32 0.036000773, %v8809_v29  ;;  %v1965_v30 = vadd.f32 %v1959_v0, %v1955_v1  ;;  %v1983_v22 = vmul.f32 0.0075987587, %v8810_v36  ;;  %v8812_v26 = vadd.f32 %v1874_v4, %v1348_v12  ;;  %v12767_v2 = vld [vmem:[#allocation49_spill] sm:$0xff] }
 0x180   :  { %8532 = vmatmul.mubr.f32.gmra.mrb[44].mxu0 %v12753_v8  ;;  %8363 = vmatprep.mubr.f32.mxu1 %v12754_v56  ;;  %v12755_v33 = vand.u32 4294901760, %v10974_v18  ;;  %v1976_v10 = vadd.f32 %v1970_v57, %v1964_v39  ;;  %v1994_v42 = vmul.f32 0.0010283802, %v8810_v36  ;;  %v1943_v16 = vmul.f32 0.26601174, %v8808_v63  ;;  %v271_v18 = vpop.permute.xlu0 %270  ;;  %v12769_v8 = vld [vmem:[#allocation52_spill] sm:$0xff] }
 0x181   :  { %v1950_v3 = vmul.f32 0.21300554, %v8808_v63  ;;  %v1961_v40 = vmul.f32 0.109360695, %v8810_v36  ;;  %v1972_v27 = vmul.f32 0.036000773, %v8810_v36  ;;  %v1977_v37 = vadd.f32 %v1971_v46, %v1965_v30 }
 0x182   :  { %8534 = vmatprep.mubr.f32.mxu0 %v12755_v33  ;;  %v1951_v31 = vmul.f32 0.21300554, %v11071_v58  ;;  %v12756_v20 = vand.u32 4294901760, %v10998_v23  ;;  %v1988_v38 = vadd.f32 %v1982_v54, %v1976_v10  ;;  %v1949_v15 = vadd.f32 %v1943_v16, %v1937_v32  ;;  %v12758_v63 = vld [vmem:[#allocation20_spill] sm:$0xff]  ;;  %v12765_v46 = vld [vmem:[#allocation39_spill] sm:$0xff]  ;;  %v12774_v33 = vld [vmem:[#allocation30_spill] sm:$0xff] }
 0x183   :  { %v1956_v47 = vadd.f32 %v1950_v3, %v1948_v24  ;;  %v1960_v4 = vmul.f32 0.109360695, %v11071_v58  ;;  %v1995_v62 = vmul.f32 0.0010283802, %v8809_v29  ;;  %v1989_v19 = vadd.f32 %v1983_v22, %v1977_v37  ;;  %v12770_v56 = vld [vmem:[#allocation24_spill] sm:$0xff]  ;;  %v12778_v37 = vld [vmem:[#allocation25_spill] sm:$0xff] }
 0x184   :  { %8364 = vmatmul.mubr.f32.gmra.mrb[44].mxu1 %v12756_v20  ;;  %8535 = vmatmul.mubr.f32.gmra.mrb[46].mxu0 %v6137_v5  ;;  %v316_v12 = vsub.f32 %v12758_v63, %v269_v9  ;;  %v317_v34 = vsub.f32 %v12759_v14, %v271_v18  ;;  %v11118_v36 = vadd.f32 %v1994_v42, %v1988_v38  ;;  %v1984_v32 = vmul.f32 0.0075987587, %v8809_v29  ;;  %v12764_v5 = vld [vmem:[#allocation36_spill] sm:$0xff]  ;;  %v273_v0 = vpop.permute.xlu0 %272  ;;  %v12771_v9 = vld [vmem:[#allocation26_spill] sm:$0xff]  ;;  %v12776_v42 = vld [vmem:[#allocation55_spill] sm:$0xff] }
 0x185   :  { %8366 = vmatprep.mubr.f32.mxu1 %v4839_v50  ;;  %8541 = vmatprep.mubr.f32.mxu0 %v12757_v53  ;;  %v1957_v23 = vadd.f32 %v1951_v31, %v1949_v15  ;;  %v1966_v6 = vadd.f32 %v1960_v4, %v1956_v47  ;;  %v11120_v1 = vadd.f32 %v1992_v11, %v1986_v17  ;;  %v1985_v60 = vmul.f32 0.0075987587, %v8812_v26  ;;  %v545_v50 = vpop.permute.xlu1 %544  ;;  %v12779_v20 = vld [vmem:[#allocation72_spill] sm:$0xff]  ;;  %v12780_v18 = vld [vmem:[#allocation65_spill] sm:$0xff] }
 0x186   :  { %12760 = vst [vmem:[#allocation17_spill] sm:$0xff] %v11118_v36  ;;  %v11122_v24 = vadd.f32 %v1995_v62, %v1989_v19  ;;  %v332_v58 = vand.u32 2147483647, %v316_v12  ;;  %v333_v39 = vand.u32 2147483647, %v317_v34  ;;  %v11128_v17 = vadd.f32 %v1993_v35, %v1987_v43  ;;  %v12781_v62 = vld [vmem:[#allocation66_spill] sm:$0xff] }
 0x187   :  { %12761 = vst [vmem:[#allocation35_spill] sm:$0xff] %v11120_v1  ;;  %v1967_v44 = vadd.f32 %v1961_v40, %v1957_v23  ;;  %v1978_v25 = vadd.f32 %v1972_v27, %v1966_v6  ;;  %v1996_v28 = vmul.f32 0.0010283802, %v8812_v26  ;;  %v591_v11 = vsub.f32 %v12759_v14, %v545_v50  ;;  %v12777_v27 = vld [vmem:[#allocation68_spill] sm:$0xff]  ;;  %v12783_v23 = vld [vmem:[#allocation74_spill] sm:$0xff]  ;;  %v12788_v50 = vld [vmem:[#allocation29_spill] sm:$0xff] }
 0x188   :  { %12762 = vst [vmem:[#allocation20_spill] sm:$0xff] %v11122_v24  ;;  %8367 = vmatmul.mubr.f32.gmra.mrb[46].mxu1 %v4849_v49  ;;  %8542 = vmatmul.mubr.f32.vlgmr.msra.gmra.mrb[32].mxu0 %v12763_v48  ;;  %12766 = vst [vmem:[#allocation21_spill] sm:$0xff] %v11128_v17  ;;  %v590_v49 = vsub.f32 %v12758_v63, %v543_v52  ;;  %v1997_v57 = vmul.f32 0.0010283802, %v11088_v41  ;;  %v12773_v41 = vld [vmem:[#allocation22_spill] sm:$0xff]  ;;  %v275_v16 = vpop.permute.xlu0 %274  ;;  %v12782_v19 = vld [vmem:[#allocation28_spill] sm:$0xff] }
 0x189   :  { %8373 = vmatprep.mubr.f32.mxu1 %v12764_v5  ;;  %8544 = vmatprep.mubr.f32.mxu0 %v12765_v46  ;;  %v1979_v29 = vadd.f32 %v1973_v51, %v1967_v44  ;;  %v1990_v54 = vadd.f32 %v1984_v32, %v1978_v25  ;;  %v318_v22 = vsub.f32 %v12773_v41, %v273_v0  ;;  %v547_v26 = vpop.permute.xlu1 %546  ;;  %v607_v10 = vand.u32 2147483647, %v591_v11  ;;  %v12784_v32 = vld [vmem:[#allocation77_spill] sm:$0xff]  ;;  %v12786_v44 = vld [vmem:[#allocation82_spill] sm:$0xff]  ;;  %v12811_v36 = vld [vmem:[#allocation32_spill] sm:$0xff] }
 0x18a   :  { %8784 = vmatpush3.bf16.msra.mxu0 %v12729_v61  ;;  %364 = vrot.lane.b32.xlu0 %v332_v58, %s9353_s22  ;;  %v606_v30 = vand.u32 2147483647, %v590_v49  ;;  %v592_v40 = vsub.f32 %v12773_v41, %v547_v26  ;;  %v319_v31 = vsub.f32 %v12778_v37, %v275_v16  ;;  %v12790_v49 = vld [vmem:[#allocation87_spill] sm:$0xff]  ;;  %v12791_v11 = vld [vmem:[#allocation42_spill] sm:$0xff]  ;;  %v12809_v24 = vld [vmem:[#allocation69_spill] sm:$0xff] }
 0x18b   :  { %8786 = vmatprep.subr.bf16.mxu0 %v9447_v13  ;;  %366 = vrot.lane.b32.xlu1 %v333_v39, %s9353_s22  ;;  %v1991_v35 = vadd.f32 %v1985_v60, %v1979_v29  ;;  %v11137_v43 = vadd.f32 %v1996_v28, %v1990_v54  ;;  %v334_v3 = vand.u32 2147483647, %v318_v22  ;;  %v12787_v28 = vld [vmem:[#allocation84_spill] sm:$0xff]  ;;  %v12789_v54 = vld [vmem:[#allocation85_spill] sm:$0xff]  ;;  %v12794_v16 = vld [vmem:[#allocation54_spill] sm:$0xff] }
 0x18c   :  { %8374 = vmatmul.mubr.f32.vlgmr.msra.gmra.mrb[32].mxu1 %v12767_v2  ;;  %8545 = vmatmul.mubr.f32.gmra.mrb[34].mxu0 %v12769_v8  ;;  %v608_v38 = vand.u32 2147483647, %v592_v40  ;;  %v277_v15 = vpop.permute.xlu0 %276  ;;  %v335_v47 = vand.u32 2147483647, %v319_v31  ;;  %v12796_v40 = vld [vmem:[#allocation31_spill] sm:$0xff]  ;;  %v12812_v17 = vld [vmem:[#allocation73_spill] sm:$0xff] }
 0x18d   :  { %12768 = vst [vmem:[#allocation38_spill] sm:$0xff] %v11137_v43  ;;  %8760 = vmatpush3.bf16.msra.mxu1 %v12729_v61  ;;  %8376 = vmatprep.mubr.f32.mxu1 %v12770_v56  ;;  %v11143_v51 = vadd.f32 %v1997_v57, %v1991_v35  ;;  %v12775_v61 = vld [vmem:[#allocation46_spill] sm:$0xff]  ;;  %v549_v52 = vpop.permute.xlu1 %548  ;;  %v320_v12 = vsub.f32 %v12782_v19, %v277_v15  ;;  %v12808_v43 = vld [vmem:[#allocation67_spill] sm:$0xff] }
 0x18e   :  { %8547 = vmatprep.mubr.f32.mxu0 %v12771_v9  ;;  %8762 = vmatprep.subr.bf16.mxu1 %v9447_v13  ;;  %v593_v4 = vsub.f32 %v12778_v37, %v549_v52 }
 0x18f   :  { %12772 = vst [vmem:[#allocation36_spill] sm:$0xff] %v11143_v51  ;;  %453 = vrot.lane.b32.xlu0 %v332_v58, %s9354_s23  ;;  %455 = vrot.lane.b32.xlu1 %v333_v39, %s9354_s23  ;;  %v12785_v58 = vld [vmem:[#allocation80_spill] sm:$0xff]  ;;  %v336_v25 = vand.u32 2147483647, %v320_v12  ;;  %v12806_v51 = vld [vmem:[#allocation51_spill] sm:$0xff] }
 0x190   :  { %8377 = vmatmul.mubr.f32.gmra.mrb[34].mxu1 %v12774_v33  ;;  %8548 = vmatmul.mubr.f32.gmra.mrb[36].mxu0 %v12775_v61  ;;  %v609_v6 = vand.u32 2147483647, %v593_v4  ;;  %v279_v39 = vpop.permute.xlu0 %278  ;;  %v12799_v4 = vld [vmem:[#allocation50_spill] sm:$0xff] }
 0x191   :  { %8379 = vmatprep.mubr.f32.mxu1 %v12776_v42  ;;  %8550 = vmatprep.mubr.f32.mxu0 %v10588_v55  ;;  %v551_v34 = vpop.permute.xlu1 %550  ;;  %v321_v29 = vsub.f32 %v12788_v50, %v279_v39 }
 0x192   :  { %v594_v60 = vsub.f32 %v12782_v19, %v551_v34  ;;  %v12800_v34 = vld [vmem:[#allocation23_spill] sm:$0xff] }
 0x193   :  { %638 = vrot.lane.b32.xlu0 %v606_v30, %s9355_s24  ;;  %640 = vrot.lane.b32.xlu1 %v607_v10, %s9355_s24  ;;  %v12792_v30 = vld [vmem:[#allocation70_spill] sm:$0xff]  ;;  %v337_v22 = vand.u32 2147483647, %v321_v29  ;;  %v12793_v10 = vld [vmem:[#allocation53_spill] sm:$0xff] }
 0x194   :  { %8380 = vmatmul.mubr.f32.gmra.mrb[36].mxu1 %v12777_v27  ;;  %8551 = vmatmul.mubr.f32.gmra.mrb[38].mxu0 %v12779_v20  ;;  %v610_v57 = vand.u32 2147483647, %v594_v60  ;;  %v281_v35 = vpop.permute.xlu0 %280  ;;  %v12802_v60 = vld [vmem:[#allocation27_spill] sm:$0xff]  ;;  %v12803_v29 = vld [vmem:[#allocation33_spill] sm:$0xff] }
 0x195   :  { %8382 = vmatprep.mubr.f32.mxu1 %v10674_v21  ;;  %8553 = vmatprep.mubr.f32.mxu0 %v10732_v59  ;;  %v553_v0 = vpop.permute.xlu1 %552  ;;  %v322_v31 = vsub.f32 %v12796_v40, %v281_v35 }
 0x196   :  { %v595_v26 = vsub.f32 %v12788_v50, %v553_v0 }
 0x197   :  { %368 = vrot.lane.b32.xlu0 %v334_v3, %s9353_s22  ;;  %457 = vrot.lane.b32.xlu1 %v334_v3, %s9354_s23  ;;  %v12795_v3 = vld [vmem:[#allocation43_spill] sm:$0xff]  ;;  %v338_v39 = vand.u32 2147483647, %v322_v31  ;;  %v12807_v31 = vld [vmem:[#allocation58_spill] sm:$0xff] }
 0x198   :  { %8383 = vmatmul.mubr.f32.gmra.mrb[38].mxu1 %v10742_v45  ;;  %8554 = vmatmul.mubr.f32.gmra.mrb[40].mxu0 %v10744_v7  ;;  %v611_v15 = vand.u32 2147483647, %v595_v26  ;;  %v283_v12 = vpop.permute.xlu0 %282  ;;  %v12805_v26 = vld [vmem:[#allocation45_spill] sm:$0xff] }
 0x199   :  { %8385 = vmatprep.mubr.f32.mxu1 %v12780_v18  ;;  %8556 = vmatprep.mubr.f32.mxu0 %v12781_v62  ;;  %v555_v52 = vpop.permute.xlu1 %554  ;;  %v323_v0 = vsub.f32 %v12803_v29, %v283_v12  ;;  %v12837_v62 = vand.u32 4294901760, %v12802_v60 }
 0x19b   :  { %642 = vrot.lane.b32.xlu0 %v608_v38, %s9355_s24  ;;  %370 = vrot.lane.b32.xlu1 %v335_v47, %s9353_s22  ;;  %v12797_v38 = vld [vmem:[#allocation59_spill] sm:$0xff] }
 0x19c   :  { %8386 = vmatmul.mubr.f32.gmra.mrb[40].mxu1 %v12783_v23  ;;  %8557 = vmatmul.mubr.f32.gmra.mrb[42].mxu0 %v12784_v32  ;;  %v285_v12 = vpop.permute.xlu0 %284  ;;  %v12829_v32 = vld [vmem:[#allocation15_spill] sm:$0xff]  ;;  %v12831_v23 = vld [vmem:[#allocation57_spill] sm:$0xff] }
 0x19d   :  { %8388 = vmatprep.mubr.f32.mxu1 %v12785_v58  ;;  %8559 = vmatprep.mubr.f32.mxu0 %v12786_v44  ;;  %v557_v35 = vpop.permute.xlu1 %556  ;;  %v12822_v44 = vld [vmem:[#allocation83_spill] sm:$0xff] }
 0x19f   :  { %459 = vrot.lane.b32.xlu0 %v335_v47, %s9354_s23  ;;  %644 = vrot.lane.b32.xlu1 %v609_v6, %s9355_s24  ;;  %v12798_v47 = vld [vmem:[#allocation14_spill] sm:$0xff]  ;;  %v12801_v6 = vld [vmem:[#allocation13_spill] sm:$0xff] }
 0x1a0   :  { %8389 = vmatmul.mubr.f32.gmra.mrb[42].mxu1 %v12787_v28  ;;  %8560 = vmatmul.mubr.f32.gmra.mrb[44].mxu0 %v12789_v54  ;;  %v12819_v54 = vld [vmem:[#allocation78_spill] sm:$0xff]  ;;  %v12820_v28 = vld [vmem:[#allocation79_spill] sm:$0xff]  ;;  %v12834_v50 = vand.u32 4294901760, %v12798_v47 }
 0x1a1   :  { %8391 = vmatprep.mubr.f32.mxu1 %v12790_v49  ;;  %8562 = vmatprep.mubr.f32.mxu0 %v12791_v11  ;;  %v559_v1 = vpop.permute.xlu1 %558  ;;  %v12816_v11 = vld [vmem:[#allocation75_spill] sm:$0xff]  ;;  %v12818_v49 = vld [vmem:[#allocation76_spill] sm:$0xff] }
 0x1a3   :  { %372 = vrot.lane.b32.xlu0 %v336_v25, %s9353_s22  ;;  %461 = vrot.lane.b32.xlu1 %v336_v25, %s9354_s23  ;;  %v596_v25 = vsub.f32 %v12796_v40, %v555_v52  ;;  %v339_v52 = vand.u32 2147483647, %v323_v0  ;;  %v12813_v0 = vld [vmem:[#allocation63_spill] sm:$0xff]  ;;  %v12826_v40 = vld [vmem:[#allocation44_spill] sm:$0xff] }
 0x1a4   :  { %8392 = vmatmul.mubr.f32.gmra.mrb[44].mxu1 %v12792_v30  ;;  %8563 = vmatmul.mubr.f32.gmra.mrb[46].mxu0 %v12793_v10  ;;  %v287_v30 = vpop.permute.xlu0 %286 }
 0x1a5   :  { %8394 = vmatprep.mubr.f32.mxu1 %v12794_v16  ;;  %8569 = vmatprep.mubr.f32.mxu0 %v12795_v3 }
 0x1a7   :  { %646 = vrot.lane.b32.xlu0 %v610_v57, %s9355_s24  ;;  %374 = vrot.lane.b32.xlu1 %v337_v22, %s9353_s22  ;;  %v12804_v57 = vld [vmem:[#allocation37_spill] sm:$0xff] }
 0x1a8   :  { %8395 = vmatmul.mubr.f32.gmra.mrb[46].mxu1 %v12797_v38  ;;  %8570 = vmatmul.mubr.f32.vlgmr.msra.gmra.mrb[32].mxu0 %v12798_v47  ;;  %v12810_v38 = vld [vmem:[#allocation60_spill] sm:$0xff]  ;;  %v12839_v19 = vand.u32 4294901760, %v12804_v57  ;;  %v12841_v47 = vand.u32 4294901760, %v12806_v51 }
 0x1a9   :  { %8401 = vmatprep.mubr.f32.mxu1 %v12799_v4  ;;  %8572 = vmatprep.mubr.f32.mxu0 %v12800_v34 }
 0x1aa   :  { %8788 = vmatpush3.bf16.msra.mxu0 %v9447_v13 }
 0x1ab   :  { %8790 = vmatprep.subr.bf16.mxu0 %v12801_v6  ;;  %463 = vrot.lane.b32.xlu0 %v337_v22, %s9354_s23  ;;  %v612_v22 = vand.u32 2147483647, %v596_v25  ;;  %v324_v25 = vsub.f32 %v12811_v36, %v285_v12 }
 0x1ac   :  { %8402 = vmatmul.mubr.f32.vlgmr.msra.gmra.mrb[32].mxu1 %v12802_v60  ;;  %648 = vrot.lane.b32.xlu1 %v611_v15, %s9355_s24  ;;  %v597_v15 = vsub.f32 %v12803_v29, %v557_v35  ;;  %v12815_v35 = vld [vmem:[#allocation12_spill] sm:$0xff] }
 0x1ad   :  { %8573 = vmatmul.mubr.f32.gmra.mrb[34].mxu0 %v12804_v57  ;;  %8764 = vmatpush3.bf16.msra.mxu1 %v9447_v13  ;;  %v340_v10 = vand.u32 2147483647, %v324_v25 }
 0x1ae   :  { %8404 = vmatprep.mubr.f32.mxu1 %v12805_v26  ;;  %8575 = vmatprep.mubr.f32.mxu0 %v12806_v51  ;;  %v613_v16 = vand.u32 2147483647, %v597_v15  ;;  %v12817_v15 = vld [vmem:[#allocation34_spill] sm:$0xff] }
 0x1af   :  { %8766 = vmatprep.subr.bf16.mxu1 %v12801_v6  ;;  %376 = vrot.lane.b32.xlu0 %v338_v39, %s9353_s22  ;;  %v325_v12 = vsub.f32 %v12817_v15, %v287_v30  ;;  %v561_v30 = vpop.permute.xlu1 %560 }
 0x1b0   :  { %8405 = vmatmul.mubr.f32.gmra.mrb[34].mxu1 %v12807_v31  ;;  %465 = vrot.lane.b32.xlu1 %v338_v39, %s9354_s23  ;;  %v12814_v39 = vld [vmem:[#allocation64_spill] sm:$0xff] }
 0x1b1   :  { %8576 = vmatmul.mubr.f32.gmra.mrb[36].mxu0 %v12808_v43  ;;  %8407 = vmatprep.mubr.f32.mxu1 %v12809_v24  ;;  %v341_v25 = vand.u32 2147483647, %v325_v12  ;;  %v12827_v12 = vld [vmem:[#allocation48_spill] sm:$0xff] }
 0x1b2   :  { %8578 = vmatprep.mubr.f32.mxu0 %v12810_v38 }
 0x1b3   :  { %650 = vrot.lane.b32.xlu0 %v612_v22, %s9355_s24  ;;  %v598_v22 = vsub.f32 %v12811_v36, %v559_v1  ;;  %v12824_v1 = vld [vmem:[#allocation88_spill] sm:$0xff]  ;;  %v12825_v36 = vld [vmem:[#allocation47_spill] sm:$0xff]  ;;  %v563_v60 = vpop.permute.xlu1 %562 }
 0x1b4   :  { %8408 = vmatmul.mubr.f32.gmra.mrb[36].mxu1 %v12812_v17  ;;  %378 = vrot.lane.b32.xlu1 %v339_v52, %s9353_s22 }
 0x1b5   :  { %8579 = vmatmul.mubr.f32.gmra.mrb[38].mxu0 %v12813_v0  ;;  %8410 = vmatprep.mubr.f32.mxu1 %v12814_v39  ;;  %v614_v29 = vand.u32 2147483647, %v598_v22  ;;  %v599_v22 = vsub.f32 %v12817_v15, %v561_v30  ;;  %v12832_v30 = vand.u32 4294901760, %v12795_v3  ;;  %v12833_v15 = vld [vmem:[#allocation61_spill] sm:$0xff] }
 0x1b6   :  { %8581 = vmatprep.mubr.f32.mxu0 %v12815_v35  ;;  %v12838_v3 = vld [vmem:[#allocation41_spill] sm:$0xff] }
 0x1b7   :  { %467 = vrot.lane.b32.xlu0 %v339_v52, %s9354_s23  ;;  %v12821_v52 = vld [vmem:[#allocation81_spill] sm:$0xff]  ;;  %v615_v58 = vand.u32 2147483647, %v599_v22  ;;  %v12835_v22 = vand.u32 4294901760, %v12799_v4  ;;  %v600_v57 = vsub.f32 %v12838_v3, %v563_v60  ;;  %v12867_v60 = vand.u32 4294901760, %v12833_v15 }
 0x1b8   :  { %8411 = vmatmul.mubr.f32.gmra.mrb[38].mxu1 %v12816_v11  ;;  %652 = vrot.lane.b32.xlu1 %v613_v16, %s9355_s24  ;;  %v12823_v16 = vld [vmem:[#allocation86_spill] sm:$0xff] }
 0x1b9   :  { %8582 = vmatmul.mubr.f32.gmra.mrb[40].mxu0 %v12818_v49  ;;  %8413 = vmatprep.mubr.f32.mxu1 %v12819_v54 }
 0x1ba   :  { %8584 = vmatprep.mubr.f32.mxu0 %v12820_v28 }
 0x1bb   :  { %380 = vrot.lane.b32.xlu0 %v340_v10, %s9353_s22 }
 0x1bc   :  { %8414 = vmatmul.mubr.f32.gmra.mrb[40].mxu1 %v12821_v52  ;;  %469 = vrot.lane.b32.xlu1 %v340_v10, %s9354_s23  ;;  %v12828_v10 = vld [vmem:[#allocation62_spill] sm:$0xff] }
 0x1bd   :  { %8585 = vmatmul.mubr.f32.gmra.mrb[42].mxu0 %v12822_v44  ;;  %8416 = vmatprep.mubr.f32.mxu1 %v12823_v16 }
 0x1be   :  { %8587 = vmatprep.mubr.f32.mxu0 %v12824_v1 }
 0x1bf   :  { %654 = vrot.lane.b32.xlu0 %v614_v29, %s9355_s24  ;;  %v12830_v29 = vld [vmem:[#allocation56_spill] sm:$0xff] }
 0x1c0   :  { %8417 = vmatmul.mubr.f32.gmra.mrb[42].mxu1 %v12825_v36  ;;  %382 = vrot.lane.b32.xlu1 %v341_v25, %s9353_s22 }
 0x1c1   :  { %8588 = vmatmul.mubr.f32.gmra.mrb[44].mxu0 %v12826_v40  ;;  %8419 = vmatprep.mubr.f32.mxu1 %v12827_v12 }
 0x1c2   :  { %8590 = vmatprep.mubr.f32.mxu0 %v12828_v10 }
 0x1c3   :  { %471 = vrot.lane.b32.xlu0 %v341_v25, %s9354_s23  ;;  %v12836_v25 = vand.u32 4294901760, %v12800_v34  ;;  %v12842_v34 = vand.u32 4294901760, %v12807_v31 }
 0x1c4   :  { %8420 = vmatmul.mubr.f32.gmra.mrb[44].mxu1 %v12829_v32  ;;  %656 = vrot.lane.b32.xlu1 %v615_v58, %s9355_s24  ;;  %v289_v58 = vpop.permute.xlu0 %288 }
 0x1c5   :  { %8591 = vmatmul.mubr.f32.gmra.mrb[46].mxu0 %v12830_v29  ;;  %8422 = vmatprep.mubr.f32.mxu1 %v12831_v23 }
 0x1c6   :  { %8597 = vmatprep.mubr.f32.mxu0 %v12832_v30  ;;  %v326_v30 = vsub.f32 %v12838_v3, %v289_v58  ;;  %v12850_v58 = vand.u32 4294901760, %v12815_v35  ;;  %v12855_v35 = vand.u32 4294901760, %v12821_v52  ;;  %v12861_v52 = vand.u32 4294901760, %v12827_v12 }
 0x1c8   :  { %8423 = vmatmul.mubr.f32.gmra.mrb[46].mxu1 %v12833_v15  ;;  %v342_v4 = vand.u32 2147483647, %v326_v30  ;;  %v291_v51 = vpop.permute.xlu0 %290  ;;  %v12851_v30 = vand.u32 4294901760, %v12816_v11  ;;  %v12857_v11 = vand.u32 4294901760, %v12823_v16 }
 0x1c9   :  { %8598 = vmatmul.mubr.f32.vlgmr.msra.gmra.mrb[32].mxu0 %v12834_v50  ;;  %8429 = vmatprep.mubr.f32.mxu1 %v12835_v22  ;;  %v12840_v50 = vand.u32 4294901760, %v12805_v26  ;;  %v12846_v26 = vld [vmem:[#allocation18_spill] sm:$0xff]  ;;  %v12847_v22 = vand.u32 4294901760, %v12812_v17  ;;  %v12852_v17 = vand.u32 4294901760, %v12818_v49  ;;  %v12858_v49 = vand.u32 4294901760, %v12824_v1 }
 0x1ca   :  { %8600 = vmatprep.mubr.f32.mxu0 %v12836_v25  ;;  %8792 = vmatpush3.bf16.msra.mxu0 %v12801_v6  ;;  %v327_v31 = vsub.f32 %v12846_v26, %v291_v51  ;;  %v616_v25 = vand.u32 2147483647, %v600_v57  ;;  %v12863_v1 = vand.u32 4294901760, %v12829_v32  ;;  %v12868_v51 = vld [vmem:[#allocation40_spill] sm:$0xff] }
 0x1cb   :  { %8794 = vmatprep.subr.bf16.mxu0 %v9447_v13  ;;  %473 = vrot.lane.b32.xlu1 %v342_v4, %s9354_s23 }
 0x1cc   :  { %8430 = vmatmul.mubr.f32.vlgmr.msra.gmra.mrb[32].mxu1 %v12837_v62  ;;  %v12843_v62 = vand.u32 4294901760, %v12808_v43  ;;  %384 = vrot.lane.b32.xlu0 %v342_v4, %s9353_s22  ;;  %v12848_v43 = vand.u32 4294901760, %v12813_v0  ;;  %v12853_v0 = vand.u32 4294901760, %v12819_v54  ;;  %v12859_v54 = vand.u32 4294901760, %v12825_v36 }
 0x1cd   :  { %8601 = vmatmul.mubr.f32.gmra.mrb[34].mxu0 %v12839_v19  ;;  %8768 = vmatpush3.bf16.msra.mxu1 %v12801_v6  ;;  %v12844_v19 = vand.u32 4294901760, %v12809_v24  ;;  %v12845_v6 = vand.u32 4294901760, %v12810_v38  ;;  %v12849_v24 = vand.u32 4294901760, %v12814_v39  ;;  %v343_v38 = vand.u32 2147483647, %v327_v31 }
 0x1ce   :  { %8432 = vmatprep.mubr.f32.mxu1 %v12840_v50  ;;  %8603 = vmatprep.mubr.f32.mxu0 %v12841_v47  ;;  %v12854_v39 = vand.u32 4294901760, %v12820_v28  ;;  %v12856_v50 = vand.u32 4294901760, %v12822_v44  ;;  %v565_v47 = vpop.permute.xlu1 %564  ;;  %v12860_v4 = vand.u32 4294901760, %v12826_v40  ;;  %v12862_v44 = vand.u32 4294901760, %v12828_v10 }
 0x1cf   :  { %8770 = vmatprep.subr.bf16.mxu1 %v9447_v13  ;;  %386 = vrot.lane.b32.xlu1 %v343_v38, %s9353_s22  ;;  %v601_v28 = vsub.f32 %v12846_v26, %v565_v47  ;;  %v12865_v36 = vand.u32 4294901760, %v12830_v29  ;;  %v12866_v40 = vand.u32 4294901760, %v12831_v23  ;;  %v106_v47 = vand.u32 2147483647, %v12773_v41 }
 0x1d0   :  { %8433 = vmatmul.mubr.f32.gmra.mrb[34].mxu1 %v12842_v34  ;;  %658 = vrot.lane.b32.xlu0 %v616_v25, %s9355_s24  ;;  %v293_v34 = vpop.permute.xlu0 %292 }
 0x1d1   :  { %8604 = vmatmul.mubr.f32.gmra.mrb[36].mxu0 %v12843_v62  ;;  %8435 = vmatprep.mubr.f32.mxu1 %v12844_v19  ;;  %v617_v16 = vand.u32 2147483647, %v601_v28  ;;  %v12864_v62 = vld [vmem:[#allocation19_spill] sm:$0xff]  ;;  %v107_v28 = vand.u32 2147483647, %v12778_v37 }
 0x1d2   :  { %8606 = vmatprep.mubr.f32.mxu0 %v12845_v6  ;;  %v328_v19 = vsub.f32 %v12864_v62, %v293_v34  ;;  %v567_v10 = vpop.permute.xlu1 %566 }
 0x1d3   :  { %660 = vrot.lane.b32.xlu1 %v617_v16, %s9355_s24  ;;  %v602_v32 = vsub.f32 %v12864_v62, %v567_v10  ;;  %v126_v10 = vsel %vm120_vm0, %v107_v28, 0.0  ;;  %v12884_v28 = vld [vmem:[#allocation42_spill] sm:$0xff] }
 0x1d4   :  { %8436 = vmatmul.mubr.f32.gmra.mrb[36].mxu1 %v12847_v22  ;;  %475 = vrot.lane.b32.xlu0 %v343_v38, %s9354_s23  ;;  %v344_v12 = vand.u32 2147483647, %v328_v19  ;;  %v295_v6 = vpop.permute.xlu0 %294 }
 0x1d5   :  { %8607 = vmatmul.mubr.f32.gmra.mrb[38].mxu0 %v12848_v43  ;;  %8438 = vmatprep.mubr.f32.mxu1 %v12849_v24  ;;  %v329_v57 = vsub.f32 %v12868_v51, %v295_v6  ;;  %v618_v29 = vand.u32 2147483647, %v602_v32  ;;  %v12869_v43 = vld [vmem:[#allocation16_spill] sm:$0xff]  ;;  %v12874_v6 = vld [vmem:[#allocation74_spill] sm:$0xff]  ;;  %v12875_v32 = vld [vmem:[#allocation77_spill] sm:$0xff] }
 0x1d6   :  { %8609 = vmatprep.mubr.f32.mxu0 %v12850_v58  ;;  %v569_v15 = vpop.permute.xlu1 %568 }
 0x1d7   :  { %477 = vrot.lane.b32.xlu1 %v344_v12, %s9354_s23  ;;  %v345_v23 = vand.u32 2147483647, %v329_v57  ;;  %v603_v31 = vsub.f32 %v12868_v51, %v569_v15  ;;  %v12876_v57 = vld [vmem:[#allocation80_spill] sm:$0xff] }
 0x1d8   :  { %8439 = vmatmul.mubr.f32.gmra.mrb[38].mxu1 %v12851_v30  ;;  %388 = vrot.lane.b32.xlu0 %v344_v12, %s9353_s22  ;;  %v297_v22 = vpop.permute.xlu0 %296 }
 0x1d9   :  { %8610 = vmatmul.mubr.f32.gmra.mrb[40].mxu0 %v12852_v17  ;;  %8441 = vmatprep.mubr.f32.mxu1 %v12853_v0  ;;  %v330_v24 = vsub.f32 %v12869_v43, %v297_v22  ;;  %v619_v25 = vand.u32 2147483647, %v603_v31  ;;  %v12878_v22 = vld [vmem:[#allocation82_spill] sm:$0xff] }
 0x1da   :  { %8612 = vmatprep.mubr.f32.mxu0 %v12854_v39  ;;  %v571_v38 = vpop.permute.xlu1 %570 }
 0x1db   :  { %390 = vrot.lane.b32.xlu1 %v345_v23, %s9353_s22  ;;  %v346_v58 = vand.u32 2147483647, %v330_v24  ;;  %v604_v0 = vsub.f32 %v12869_v43, %v571_v38  ;;  %v12879_v38 = vld [vmem:[#allocation33_spill] sm:$0xff] }
 0x1dc   :  { %8442 = vmatmul.mubr.f32.gmra.mrb[40].mxu1 %v12855_v35  ;;  %662 = vrot.lane.b32.xlu0 %v618_v29, %s9355_s24  ;;  %v299_v30 = vpop.permute.xlu0 %298  ;;  %v12877_v29 = vld [vmem:[#allocation31_spill] sm:$0xff] }
 0x1dd   :  { %8613 = vmatmul.mubr.f32.gmra.mrb[42].mxu0 %v12856_v50  ;;  %8444 = vmatprep.mubr.f32.mxu1 %v12857_v11  ;;  %v104_v11 = vand.u32 2147483647, %v12758_v63  ;;  %v110_v15 = vand.u32 2147483647, %v12877_v29 }
 0x1de   :  { %8615 = vmatprep.mubr.f32.mxu0 %v12858_v49  ;;  %v573_v39 = vpop.permute.xlu1 %572  ;;  %v105_v49 = vand.u32 2147483647, %v12759_v14 }
 0x1df   :  { %664 = vrot.lane.b32.xlu1 %v619_v25, %s9355_s24  ;;  %v121_v16 = vsel %vm120_vm0, %v104_v11, 0.0  ;;  %v12882_v11 = vld [vmem:[#allocation87_spill] sm:$0xff] }
 0x1e0   :  { %8445 = vmatmul.mubr.f32.gmra.mrb[42].mxu1 %v12859_v54  ;;  %479 = vrot.lane.b32.xlu0 %v345_v23, %s9354_s23  ;;  %v620_v54 = vand.u32 2147483647, %v604_v0  ;;  %v122_v34 = vsel %vm120_vm0, %v105_v49, 0.0 }
 0x1e1   :  { %8616 = vmatmul.mubr.f32.gmra.mrb[44].mxu0 %v12860_v4  ;;  %8447 = vmatprep.mubr.f32.mxu1 %v12861_v52  ;;  %v12871_v52 = vld [vmem:[#allocation28_spill] sm:$0xff]  ;;  %v123_v19 = vadd.f32 %v122_v34, %v121_v16  ;;  %v187_v16 = vsub.f32 %v12778_v37, %v12759_v14  ;;  %v12885_v34 = vld [vmem:[#allocation34_spill] sm:$0xff] }
 0x1e2   :  { %8618 = vmatprep.mubr.f32.mxu0 %v12862_v44  ;;  %v108_v44 = vand.u32 2147483647, %v12871_v52 }
 0x1e3   :  { %481 = vrot.lane.b32.xlu1 %v346_v58, %s9354_s23 }
 0x1e4   :  { %8448 = vmatmul.mubr.f32.gmra.mrb[44].mxu1 %v12863_v1  ;;  %392 = vrot.lane.b32.xlu0 %v346_v58, %s9353_s22  ;;  %v12872_v1 = vld [vmem:[#allocation66_spill] sm:$0xff]  ;;  %v128_v31 = vsel %vm120_vm0, %v108_v44, 0.0  ;;  %v111_v58 = vand.u32 2147483647, %v12879_v38 }
 0x1e5   :  { %8619 = vmatmul.mubr.f32.gmra.mrb[46].mxu0 %v12865_v36  ;;  %8450 = vmatprep.mubr.f32.mxu1 %v12866_v40  ;;  %v124_v36 = vsel %vm120_vm0, %v106_v47, 0.0  ;;  %v12873_v40 = vld [vmem:[#allocation29_spill] sm:$0xff]  ;;  %v12883_v47 = vld [vmem:[#allocation32_spill] sm:$0xff] }
 0x1e6   :  { %8625 = vmatprep.mubr.f32.mxu0 %v12757_v53  ;;  %v109_v12 = vand.u32 2147483647, %v12873_v40 }
 0x1e8   :  { %8451 = vmatmul.mubr.f32.gmra.mrb[46].mxu1 %v12867_v60  ;;  %666 = vrot.lane.b32.xlu0 %v620_v54, %s9355_s24  ;;  %v125_v60 = vadd.f32 %v124_v36, %v123_v19  ;;  %v112_v54 = vand.u32 2147483647, %v12883_v47  ;;  %v113_v19 = vand.u32 2147483647, %v12885_v34  ;;  %v134_v36 = vsel %vm120_vm0, %v111_v58, 0.0 }
 0x1e9   :  { %8626 = vmatmul.mubr.f32.vlgmr.msra.gmra.mrb[32].mxu0 %v12763_v48  ;;  %8457 = vmatprep.mubr.f32.mxu1 %v12764_v5 }
 0x1ea   :  { %8628 = vmatprep.mubr.f32.mxu0 %v12765_v46  ;;  %8796 = vmatpush3.bf16.msra.mxu0 %v9447_v13  ;;  %v127_v25 = vadd.f32 %v126_v10, %v125_v60  ;;  %v12886_v10 = vld [vmem:[#allocation70_spill] sm:$0xff]  ;;  %v12887_v60 = vld [vmem:[#allocation35_spill] sm:$0xff] }
 0x1ec   :  { %8458 = vmatmul.mubr.f32.vlgmr.msra.gmra.mrb[32].mxu1 %v12767_v2  ;;  %v129_v0 = vadd.f32 %v128_v31, %v127_v25  ;;  %v189_v25 = vsub.f32 %v12873_v40, %v12778_v37 }
 0x1ed   :  { %8629 = vmatmul.mubr.f32.gmra.mrb[34].mxu0 %v12769_v8  ;;  %8772 = vmatpush3.bf16.msra.mxu1 %v9447_v13  ;;  %v12870_v13 = vld [vmem:[#allocation71_spill] sm:$0xff] }
 0x1ee   :  { %8460 = vmatprep.mubr.f32.mxu1 %v12770_v56  ;;  %8631 = vmatprep.mubr.f32.mxu0 %v12771_v9  ;;  %v331_v17 = vsub.f32 %v12870_v13, %v299_v30  ;;  %v605_v50 = vsub.f32 %v12870_v13, %v573_v39  ;;  %v130_v30 = vsel %vm120_vm0, %v109_v12, 0.0  ;;  %v186_v39 = vsub.f32 %v12773_v41, %v12758_v63 }
 0x1ef   :  { %v131_v44 = vadd.f32 %v130_v30, %v129_v0  ;;  %v188_v12 = vsub.f32 %v12871_v52, %v12773_v41  ;;  %v12889_v0 = vld [vmem:[#allocation53_spill] sm:$0xff] }
 0x1f0   :  { %8461 = vmatmul.mubr.f32.gmra.mrb[34].mxu1 %v12774_v33  ;;  %v347_v35 = vand.u32 2147483647, %v331_v17  ;;  %v621_v4 = vand.u32 2147483647, %v605_v50  ;;  %v12880_v17 = vld [vmem:[#allocation84_spill] sm:$0xff]  ;;  %v12881_v50 = vld [vmem:[#allocation85_spill] sm:$0xff] }
 0x1f1   :  { %8632 = vmatmul.mubr.f32.gmra.mrb[36].mxu0 %v12775_v61  ;;  %8463 = vmatprep.mubr.f32.mxu1 %v12776_v42  ;;  %v200_v30 = vand.u32 2147483647, %v186_v39  ;;  %v12893_v41 = vld [vmem:[#allocation17_spill] sm:$0xff] }
 0x1f2   :  { %8634 = vmatprep.mubr.f32.mxu0 %v10588_v55  ;;  %394 = vrot.lane.b32.xlu1 %v347_v35, %s9353_s22 }
 0x1f3   :  { %483 = vrot.lane.b32.xlu0 %v347_v35, %s9354_s23  ;;  %v132_v35 = vsel %vm120_vm0, %v110_v15, 0.0  ;;  %v11413_v15 = vmul.f32 %v12887_v60, %v12887_v60  ;;  %v201_v60 = vand.u32 2147483647, %v187_v16  ;;  %v116_v16 = vand.u32 2147483647, %v12864_v62 }
 0x1f4   :  { %8464 = vmatmul.mubr.f32.gmra.mrb[36].mxu1 %v12777_v27  ;;  %v133_v31 = vadd.f32 %v132_v35, %v131_v44  ;;  %v114_v35 = vand.u32 2147483647, %v12838_v3  ;;  %v136_v44 = vsel %vm120_vm0, %v112_v54, 0.0  ;;  %v191_v54 = vsub.f32 %v12879_v38, %v12873_v40 }
 0x1f5   :  { %8635 = vmatmul.mubr.f32.gmra.mrb[38].mxu0 %v12779_v20  ;;  %8466 = vmatprep.mubr.f32.mxu1 %v10674_v21  ;;  %12888 = vst [vmem:[#allocation39_spill] sm:$0xff] %v11413_v15  ;;  %v202_v15 = vand.u32 2147483647, %v188_v12 }
 0x1f6   :  { %8637 = vmatprep.mubr.f32.mxu0 %v10732_v59  ;;  %668 = vrot.lane.b32.xlu1 %v621_v4, %s9355_s24  ;;  %v135_v39 = vadd.f32 %v134_v36, %v133_v31  ;;  %v203_v36 = vand.u32 2147483647, %v189_v25  ;;  %v214_v31 = vsel %vm120_vm0, %v200_v30, 0.0  ;;  %v140_v12 = vsel %vm120_vm0, %v114_v35, 0.0 }
 0x1f7   :  { %v192_v30 = vsub.f32 %v12883_v47, %v12877_v29  ;;  %v217_v35 = vsel %vm120_vm0, %v202_v15, 0.0 }
 0x1f8   :  { %8467 = vmatmul.mubr.f32.gmra.mrb[38].mxu1 %v10742_v45 }
 0x1f9   :  { %8638 = vmatmul.mubr.f32.gmra.mrb[40].mxu0 %v10744_v7  ;;  %8469 = vmatprep.mubr.f32.mxu1 %v12780_v18 }
 0x1fa   :  { %8640 = vmatprep.mubr.f32.mxu0 %v12872_v1 }
 0x1fc   :  { %8470 = vmatmul.mubr.f32.gmra.mrb[40].mxu1 %v12874_v6  ;;  %v11382_v23 = vpop.permute.xlu0 %364 }
 0x1fd   :  { %8641 = vmatmul.mubr.f32.gmra.mrb[42].mxu0 %v12875_v32  ;;  %8472 = vmatprep.mubr.f32.mxu1 %v12876_v57  ;;  %v11387_v24 = vpop.permute.xlu1 %366 }
 0x1fe   :  { %8643 = vmatprep.mubr.f32.mxu0 %v12878_v22 }
 0x200   :  { %8473 = vmatmul.mubr.f32.gmra.mrb[42].mxu1 %v12880_v17 }
 0x201   :  { %8644 = vmatmul.mubr.f32.gmra.mrb[44].mxu0 %v12881_v50  ;;  %8475 = vmatprep.mubr.f32.mxu1 %v12882_v11  ;;  %v11397_v49 = vpop.permute.xlu0 %453  ;;  %v11402_v4 = vpop.permute.xlu1 %455  ;;  %v12891_v11 = vld [vmem:[#allocation21_spill] sm:$0xff] }
 0x202   :  { %8646 = vmatprep.mubr.f32.mxu0 %v12884_v28  ;;  %v12890_v28 = vld [vmem:[#allocation54_spill] sm:$0xff]  ;;  %v11421_v58 = vmul.f32 %v12891_v11, %v12891_v11  ;;  %v190_v11 = vsub.f32 %v12877_v29, %v12871_v52  ;;  %v414_v29 = vsel %vm412_vm1, %v11387_v24, 0.0 }
 0x204   :  { %8476 = vmatmul.mubr.f32.gmra.mrb[44].mxu1 %v12886_v10  ;;  %12892 = vst [vmem:[#allocation49_spill] sm:$0xff] %v11421_v58  ;;  %v11425_v10 = vmul.f32 %v12893_v41, %v12893_v41  ;;  %v115_v58 = vand.u32 2147483647, %v12846_v26  ;;  %v138_v41 = vsel %vm120_vm0, %v113_v19, 0.0  ;;  %v117_v19 = vand.u32 2147483647, %v12868_v51 }
 0x205   :  { %8647 = vmatmul.mubr.f32.gmra.mrb[46].mxu0 %v12889_v0  ;;  %8478 = vmatprep.mubr.f32.mxu1 %v12890_v28  ;;  %v11427_v50 = vpop.permute.xlu0 %638  ;;  %v11432_v37 = vpop.permute.xlu1 %640  ;;  %v12895_v28 = vld [vmem:[#allocation59_spill] sm:$0xff] }
 0x206   :  { %12894 = vst [vmem:[#allocation52_spill] sm:$0xff] %v11425_v10  ;;  %8653 = vmatprep.mubr.f32.mxu0 %v12757_v53  ;;  %v137_v53 = vadd.f32 %v136_v44, %v135_v39  ;;  %v118_v39 = vand.u32 2147483647, %v12869_v43  ;;  %v142_v10 = vsel %vm120_vm0, %v115_v58, 0.0  ;;  %v146_v24 = vsel %vm120_vm0, %v117_v19, 0.0 }
 0x207   :  { %v502_v19 = vsel %vm412_vm1, %v11402_v4, 0.0  ;;  %v687_v4 = vsel %vm686_vm2, %v11427_v50, 0.0 }
 0x208   :  { %8479 = vmatmul.mubr.f32.gmra.mrb[46].mxu1 %v12895_v28  ;;  %v139_v25 = vadd.f32 %v138_v41, %v137_v53  ;;  %v205_v41 = vand.u32 2147483647, %v191_v54  ;;  %v219_v53 = vsel %vm120_vm0, %v203_v36, 0.0  ;;  %v194_v54 = vsub.f32 %v12838_v3, %v12883_v47 }
 0x209   :  { %8654 = vmatmul.mubr.f32.vlgmr.msra.gmra.mrb[32].mxu0 %v12763_v48  ;;  %8485 = vmatprep.mubr.f32.mxu1 %v12764_v5  ;;  %v369_v52 = vpop.permute.xlu0 %368  ;;  %v458_v40 = vpop.permute.xlu1 %457  ;;  %v204_v48 = vand.u32 2147483647, %v190_v11  ;;  %v215_v5 = vsel %vm120_vm0, %v201_v60, 0.0  ;;  %v413_v11 = vsel %vm412_vm1, %v11382_v23, 0.0  ;;  %v119_v36 = vand.u32 2147483647, %v12870_v13 }
 0x20a   :  { %8656 = vmatprep.mubr.f32.mxu0 %v12765_v46  ;;  %v216_v28 = vadd.f32 %v215_v5, %v214_v31  ;;  %v141_v44 = vadd.f32 %v140_v12, %v139_v25  ;;  %v193_v46 = vsub.f32 %v12885_v34, %v12879_v38  ;;  %v148_v23 = vsel %vm120_vm0, %v118_v39, 0.0 }
 0x20b   :  { %v415_v47 = vadd.f32 %v414_v29, %v413_v11  ;;  %v501_v12 = vsel %vm412_vm1, %v11397_v49, 0.0  ;;  %v197_v49 = vsub.f32 %v12868_v51, %v12846_v26  ;;  %v416_v39 = vsel %vm412_vm1, %v369_v52, 0.0 }
 0x20c   :  { %8486 = vmatmul.mubr.f32.vlgmr.msra.gmra.mrb[32].mxu1 %v12767_v2  ;;  %v144_v2 = vsel %vm120_vm0, %v116_v16, 0.0  ;;  %v218_v15 = vadd.f32 %v217_v35, %v216_v28  ;;  %v143_v58 = vadd.f32 %v142_v10, %v141_v44  ;;  %v207_v10 = vand.u32 2147483647, %v193_v46 }
 0x20d   :  { %8657 = vmatmul.mubr.f32.gmra.mrb[34].mxu0 %v12769_v8  ;;  %8488 = vmatprep.mubr.f32.mxu1 %v12770_v56  ;;  %v643_v60 = vpop.permute.xlu0 %642  ;;  %v371_v38 = vpop.permute.xlu1 %370  ;;  %v206_v8 = vand.u32 2147483647, %v192_v30  ;;  %v221_v56 = vsel %vm120_vm0, %v204_v48, 0.0  ;;  %v223_v16 = vsel %vm120_vm0, %v205_v41, 0.0  ;;  %v196_v30 = vsub.f32 %v12864_v62, %v12838_v3 }
 0x20e   :  { %8659 = vmatprep.mubr.f32.mxu0 %v12771_v9  ;;  %v220_v31 = vadd.f32 %v219_v53, %v218_v15  ;;  %v145_v28 = vadd.f32 %v144_v2, %v143_v58  ;;  %v195_v9 = vsub.f32 %v12846_v26, %v12885_v34  ;;  %v208_v48 = vand.u32 2147483647, %v194_v54 }
 0x20f   :  { %v227_v3 = vsel %vm120_vm0, %v207_v10, 0.0  ;;  %v150_v50 = vsel %vm120_vm0, %v119_v36, 0.0  ;;  %v198_v26 = vsub.f32 %v12869_v43, %v12864_v62  ;;  %v210_v29 = vand.u32 2147483647, %v196_v30 }
 0x210   :  { %8489 = vmatmul.mubr.f32.gmra.mrb[34].mxu1 %v12774_v33  ;;  %v222_v33 = vadd.f32 %v221_v56, %v220_v31  ;;  %v147_v34 = vadd.f32 %v146_v24, %v145_v28  ;;  %v209_v35 = vand.u32 2147483647, %v195_v9  ;;  %v229_v11 = vsel %vm120_vm0, %v208_v48, 0.0 }
 0x211   :  { %8660 = vmatmul.mubr.f32.gmra.mrb[36].mxu0 %v12775_v61  ;;  %8491 = vmatprep.mubr.f32.mxu1 %v12776_v42  ;;  %v460_v44 = vpop.permute.xlu0 %459  ;;  %v645_v25 = vpop.permute.xlu1 %644  ;;  %v225_v61 = vsel %vm120_vm0, %v206_v8, 0.0  ;;  %v688_v42 = vsel %vm686_vm2, %v11432_v37, 0.0  ;;  %v504_v37 = vsel %vm412_vm1, %v458_v40, 0.0  ;;  %v199_v40 = vsub.f32 %v12870_v13, %v12868_v51 }
 0x212   :  { %8662 = vmatprep.mubr.f32.mxu0 %v10588_v55  ;;  %v224_v5 = vadd.f32 %v223_v16, %v222_v33  ;;  %v503_v55 = vadd.f32 %v502_v19, %v501_v12  ;;  %v149_v53 = vadd.f32 %v148_v23, %v147_v34  ;;  %v418_v62 = vsel %vm412_vm1, %v371_v38, 0.0 }
 0x213   :  { %v211_v58 = vand.u32 2147483647, %v197_v49  ;;  %v506_v54 = vsel %vm412_vm1, %v460_v44, 0.0  ;;  %v692_v9 = vsel %vm686_vm2, %v645_v25, 0.0  ;;  %v213_v10 = vand.u32 2147483647, %v199_v40 }
 0x214   :  { %8492 = vmatmul.mubr.f32.gmra.mrb[36].mxu1 %v12777_v27  ;;  %v226_v41 = vadd.f32 %v225_v61, %v224_v5  ;;  %v689_v27 = vadd.f32 %v688_v42, %v687_v4  ;;  %v505_v15 = vadd.f32 %v504_v37, %v503_v55  ;;  %v151_v23 = vadd.f32 %v150_v50, %v149_v53  ;;  %v8319_v31 = vpop.f32.mrb[16].mxu0  ;;  %v12898_v25 = vld [vmem:[#allocation20_spill] sm:$0xff]  ;;  %v12900_v55 = vld [vmem:[#allocation38_spill] sm:$0xff]  ;;  %v12902_v50 = vld [vmem:[#allocation85_spill] sm:$0xff] }
 0x215   :  { %8663 = vmatmul.mubr.f32.gmra.mrb[38].mxu0 %v12779_v20  ;;  %8494 = vmatprep.mubr.f32.mxu1 %v10674_v21  ;;  %v373_v46 = vpop.permute.xlu0 %372  ;;  %v462_v52 = vpop.permute.xlu1 %461  ;;  %v417_v20 = vadd.f32 %v416_v39, %v415_v47  ;;  %v690_v21 = vsel %vm686_vm2, %v643_v60, 0.0  ;;  %v12896_v60 = vsub.f32 %v12759_v14, %v12758_v63  ;;  %v4450_v14 = vmul.f32 0.0075987587, %v8319_v31 }
 0x216   :  { %8665 = vmatprep.mubr.f32.mxu0 %v10732_v59  ;;  %v228_v2 = vadd.f32 %v227_v3, %v226_v41  ;;  %v231_v59 = vsel %vm120_vm0, %v209_v35, 0.0  ;;  %v691_v38 = vadd.f32 %v690_v21, %v689_v27  ;;  %v4350_v16 = vpop.f32.mrb[17].mxu0  ;;  %v508_v19 = vsel %vm412_vm1, %v462_v52, 0.0  ;;  %152 = vadd.xlane.f32.xlu0 %v151_v23  ;;  %v12904_v52 = vld [vmem:[#allocation36_spill] sm:$0xff] }
 0x217   :  { %v162_v51 = vand.u32 2147483647, %v12896_v60  ;;  %v419_v28 = vadd.f32 %v418_v62, %v417_v20  ;;  %v4444_v47 = vmul.f32 0.0010283802, %v4350_v16  ;;  %v239_v3 = vsel %vm120_vm0, %v213_v10, 0.0  ;;  %v12906_v20 = vld [vmem:[#allocation42_spill] sm:$0xff] }
 0x218   :  { %8495 = vmatmul.mubr.f32.gmra.mrb[38].mxu1 %v10742_v45  ;;  %v12897_v45 = vsub.f32 %v12870_v13, %v12869_v43  ;;  %v230_v36 = vadd.f32 %v229_v11, %v228_v2  ;;  %v507_v43 = vadd.f32 %v506_v54, %v505_v15  ;;  %v420_v13 = vsel %vm412_vm1, %v373_v46, 0.0  ;;  %v8151_v61 = vpop.f32.mrb[16].mxu1  ;;  %v8322_v42 = vpop.f32.mrb[18].mxu0 }
 0x219   :  { %8666 = vmatmul.mubr.f32.gmra.mrb[40].mxu0 %v10744_v7  ;;  %8497 = vmatprep.mubr.f32.mxu1 %v12780_v18  ;;  %v647_v8 = vpop.permute.xlu0 %646  ;;  %v375_v24 = vpop.permute.xlu1 %374  ;;  %v212_v7 = vand.u32 2147483647, %v198_v26  ;;  %v233_v18 = vsel %vm120_vm0, %v210_v29, 0.0  ;;  %v163_v44 = vsel %vm120_vm0, %v162_v51, 0.0  ;;  %v693_v34 = vadd.f32 %v692_v9, %v691_v38  ;;  %v12903_v26 = vld [vmem:[#allocation87_spill] sm:$0xff]  ;;  %v12908_v9 = vld [vmem:[#allocation54_spill] sm:$0xff] }
 0x21a   :  { %v174_v56 = vand.u32 2147483647, %v12897_v45  ;;  %8668 = vmatprep.mubr.f32.mxu0 %v12872_v1  ;;  %v232_v63 = vadd.f32 %v231_v59, %v230_v36  ;;  %v235_v1 = vsel %vm120_vm0, %v211_v58, 0.0  ;;  %v421_v4 = vadd.f32 %v420_v13, %v419_v28  ;;  %164 = vadd.xlane.f32.xlu1 %v163_v44  ;;  %v3062_v29 = vpop.f32.mrb[17].mxu1  ;;  %v4362_v11 = vpop.f32.mrb[19].mxu0 }
 0x21b   :  { %v694_v49 = vsel %vm686_vm2, %v647_v8, 0.0  ;;  %v509_v39 = vadd.f32 %v508_v19, %v507_v43  ;;  %v422_v35 = vsel %vm412_vm1, %v375_v24, 0.0  ;;  %v3162_v37 = vmul.f32 0.0075987587, %v8151_v61 }
 0x21c   :  { %8498 = vmatmul.mubr.f32.gmra.mrb[40].mxu1 %v12874_v6  ;;  %v234_v33 = vadd.f32 %v233_v18, %v232_v63  ;;  %v11535_v6 = vmul.f32 %v12898_v25, %v12898_v25  ;;  %v175_v48 = vsel %vm120_vm0, %v174_v56, 0.0  ;;  %v4452_v46 = vmul.f32 0.0075987587, %v8322_v42  ;;  %v8154_v51 = vpop.f32.mrb[18].mxu1  ;;  %v8325_v45 = vpop.f32.mrb[20].mxu0  ;;  %v12907_v56 = vld [vmem:[#allocation70_spill] sm:$0xff] }
 0x21d   :  { %8669 = vmatmul.mubr.f32.gmra.mrb[42].mxu0 %v12875_v32  ;;  %8500 = vmatprep.mubr.f32.mxu1 %v12876_v57  ;;  %v464_v12 = vpop.permute.xlu0 %463  ;;  %v237_v32 = vsel %vm120_vm0, %v212_v7, 0.0  ;;  %v4456_v57 = vadd.f32 %v4450_v14, %v4444_v47  ;;  %v11552_v53 = vmul.f32 %v12904_v52, %v12904_v52  ;;  %v695_v21 = vadd.f32 %v694_v49, %v693_v34  ;;  %v4374_v28 = vpop.f32.mrb[21].mxu0  ;;  %v12909_v34 = vld [vmem:[#allocation59_spill] sm:$0xff] }
 0x21e   :  { %8671 = vmatprep.mubr.f32.mxu0 %v12878_v22  ;;  %12899 = vst [vmem:[#allocation24_spill] sm:$0xff] %v11535_v6  ;;  %v649_v30 = vpop.permute.xlu1 %648  ;;  %v236_v5 = vadd.f32 %v235_v1, %v234_v33  ;;  %v11542_v22 = vmul.f32 %v12900_v55, %v12900_v55  ;;  %v510_v41 = vsel %vm412_vm1, %v464_v12, 0.0  ;;  %176 = vadd.xlane.f32.xlu0 %v175_v48  ;;  %v3156_v2 = vmul.f32 0.0010283802, %v3062_v29 }
 0x21f   :  { %12905 = vst [vmem:[#allocation22_spill] sm:$0xff] %v11552_v53  ;;  %v696_v40 = vsel %vm686_vm2, %v649_v30, 0.0  ;;  %v4446_v15 = vmul.f32 0.0010283802, %v4362_v11  ;;  %v4451_v62 = vmul.f32 0.0075987587, %v4362_v11  ;;  %v423_v58 = vadd.f32 %v422_v35, %v421_v4 }
 0x220   :  { %12901 = vst [vmem:[#allocation26_spill] sm:$0xff] %v11542_v22  ;;  %8501 = vmatmul.mubr.f32.gmra.mrb[42].mxu1 %v12880_v17  ;;  %v238_v27 = vadd.f32 %v237_v32, %v236_v5  ;;  %v4445_v17 = vmul.f32 0.0010283802, %v8319_v31  ;;  %v3157_v8 = vmul.f32 0.0010283802, %v8151_v61  ;;  %v11557_v36 = vadd.f32 %v510_v41, %v509_v39  ;;  %v3074_v31 = vpop.f32.mrb[19].mxu1 }
 0x221   :  { %8672 = vmatmul.mubr.f32.gmra.mrb[44].mxu0 %v12902_v50  ;;  %8503 = vmatprep.mubr.f32.mxu1 %v12903_v26  ;;  %v377_v54 = vpop.permute.xlu0 %376  ;;  %v4462_v60 = vmul.f32 0.036000773, %v4362_v11  ;;  %v4463_v24 = vmul.f32 0.036000773, %v8322_v42  ;;  %v3168_v23 = vadd.f32 %v3162_v37, %v3156_v2  ;;  %v4458_v18 = vadd.f32 %v4452_v46, %v4446_v15  ;;  %v8157_v46 = vpop.f32.mrb[20].mxu1 }
 0x222   :  { %8674 = vmatprep.mubr.f32.mxu0 %v12906_v20  ;;  %v466_v59 = vpop.permute.xlu1 %465  ;;  %v240_v38 = vadd.f32 %v239_v3, %v238_v27  ;;  %v4457_v7 = vadd.f32 %v4451_v62, %v4445_v17  ;;  %v4447_v10 = vmul.f32 0.0010283802, %v8322_v42  ;;  %v4474_v63 = vmul.f32 0.109360695, %v8322_v42  ;;  %v8328_v50 = vpop.f32.mrb[22].mxu0 }
 0x223   :  { %v4468_v14 = vadd.f32 %v4462_v60, %v4456_v57  ;;  %v424_v16 = vsel %vm412_vm1, %v377_v54, 0.0  ;;  %v3159_v13 = vmul.f32 0.0010283802, %v8154_v51  ;;  %v3164_v1 = vmul.f32 0.0075987587, %v8154_v51  ;;  %v3086_v29 = vpop.f32.mrb[21].mxu1 }
 0x224   :  { %8504 = vmatmul.mubr.f32.gmra.mrb[44].mxu1 %v12907_v56  ;;  %241 = vadd.xlane.f32.xlu0 %v240_v38  ;;  %v4469_v43 = vadd.f32 %v4463_v24, %v4457_v7  ;;  %v11563_v47 = vsel %vm412_vm1, %v466_v59, 0.0  ;;  %v3175_v12 = vmul.f32 0.036000773, %v8154_v51  ;;  %v3186_v44 = vmul.f32 0.109360695, %v8154_v51  ;;  %v4386_v11 = vpop.f32.mrb[23].mxu0 }
 0x225   :  { %8675 = vmatmul.mubr.f32.gmra.mrb[46].mxu0 %v12889_v0  ;;  %8506 = vmatprep.mubr.f32.mxu1 %v12908_v9  ;;  %v4480_v19 = vadd.f32 %v4474_v63, %v4468_v14  ;;  %v4454_v33 = vmul.f32 0.0075987587, %v8325_v45  ;;  %v3158_v30 = vmul.f32 0.0010283802, %v3074_v31  ;;  %v3163_v48 = vmul.f32 0.0075987587, %v3074_v31  ;;  %v11572_v5 = vpop.permute.xlu0 %650 }
 0x226   :  { %v11566_v0 = vpop.permute.xlu1 %378  ;;  %v3174_v32 = vmul.f32 0.036000773, %v3074_v31  ;;  %v11568_v57 = vadd.f32 %v696_v40, %v695_v21  ;;  %v4448_v61 = vmul.f32 0.0010283802, %v4374_v28  ;;  %v4453_v42 = vmul.f32 0.0075987587, %v4374_v28 }
 0x227   :  { %v4464_v4 = vmul.f32 0.036000773, %v4374_v28  ;;  %v11570_v49 = vadd.f32 %v424_v16, %v423_v58  ;;  %v3169_v39 = vadd.f32 %v3163_v48, %v3157_v8  ;;  %v3170_v35 = vadd.f32 %v3164_v1, %v3158_v30  ;;  %v11574_v15 = vpop.f32.mrb[22].mxu1  ;;  %v11576_v62 = vpop.f32.mrb[24].mxu0 }
 0x228   :  { %8507 = vmatmul.mubr.f32.gmra.mrb[46].mxu1 %v12909_v34  ;;  %v3180_v3 = vadd.f32 %v3174_v32, %v3168_v23  ;;  %v4475_v37 = vmul.f32 0.109360695, %v4374_v28  ;;  %v4459_v26 = vadd.f32 %v4453_v42, %v4447_v10  ;;  %v4460_v41 = vadd.f32 %v4454_v33, %v4448_v61  ;;  %v3098_v30 = vpop.f32.mrb[23].mxu1  ;;  %v4398_v48 = vpop.f32.mrb[25].mxu0 }
 0x229   :  { %v4470_v27 = vadd.f32 %v4464_v4, %v4458_v18  ;;  %v4486_v17 = vmul.f32 0.21300554, %v4374_v28  ;;  %v4465_v20 = vmul.f32 0.036000773, %v8325_v45  ;;  %v3181_v21 = vadd.f32 %v3175_v12, %v3169_v39  ;;  %v11580_v12 = vpop.permute.xlu0 %467  ;;  %v11584_v39 = vpop.f32.mrb[24].mxu1 }
 0x22a   :  { %v3192_v40 = vadd.f32 %v3186_v44, %v3180_v3  ;;  %v4481_v2 = vadd.f32 %v4475_v37, %v4469_v43  ;;  %v4449_v58 = vmul.f32 0.0010283802, %v8325_v45  ;;  %v4476_v59 = vmul.f32 0.109360695, %v8325_v45  ;;  %v11578_v60 = vpop.permute.xlu1 %652  ;;  %v11586_v3 = vpop.f32.mrb[26].mxu0 }
 0x22b   :  { %v4487_v54 = vmul.f32 0.21300554, %v8325_v45  ;;  %v4492_v8 = vadd.f32 %v4486_v17, %v4480_v19  ;;  %v4498_v51 = vmul.f32 0.26601174, %v8325_v45  ;;  %v3161_v56 = vmul.f32 0.0010283802, %v8157_v46 }
 0x22c   :  { %v3166_v38 = vmul.f32 0.0075987587, %v8157_v46  ;;  %v4471_v24 = vadd.f32 %v4465_v20, %v4459_v26  ;;  %v3177_v23 = vmul.f32 0.036000773, %v8157_v46  ;;  %v3188_v7 = vmul.f32 0.109360695, %v8157_v46 }
 0x22d   :  { %v3199_v18 = vmul.f32 0.21300554, %v8157_v46  ;;  %v4482_v31 = vadd.f32 %v4476_v59, %v4470_v27  ;;  %v3160_v28 = vmul.f32 0.0010283802, %v3086_v29  ;;  %v3165_v9 = vmul.f32 0.0075987587, %v3086_v29 }
 0x22e   :  { %v3176_v10 = vmul.f32 0.036000773, %v3086_v29  ;;  %v4493_v63 = vadd.f32 %v4487_v54, %v4481_v2  ;;  %v3187_v14 = vmul.f32 0.109360695, %v3086_v29  ;;  %v3198_v16 = vmul.f32 0.21300554, %v3086_v29  ;;  %v11582_v19 = vpop.permute.xlu1 %469 }
 0x22f   :  { %v4455_v43 = vmul.f32 0.0075987587, %v4386_v11  ;;  %v4504_v1 = vadd.f32 %v4498_v51, %v4492_v8  ;;  %v3171_v45 = vadd.f32 %v3165_v9, %v3159_v13  ;;  %v3172_v44 = vadd.f32 %v3166_v38, %v3160_v28 }
 0x230   :  { %v3182_v33 = vadd.f32 %v3176_v10, %v3170_v35  ;;  %v4466_v34 = vmul.f32 0.036000773, %v4386_v11  ;;  %v3193_v32 = vadd.f32 %v3187_v14, %v3181_v21  ;;  %v3204_v61 = vadd.f32 %v3198_v16, %v3192_v40  ;;  %v11588_v21 = vpop.f32.mrb[25].mxu1  ;;  %v11590_v40 = vpop.f32.mrb[27].mxu0 }
 0x231   :  { %v4461_v42 = vadd.f32 %v4455_v43, %v4449_v58  ;;  %v4477_v4 = vmul.f32 0.109360695, %v4386_v11  ;;  %v3210_v37 = vmul.f32 0.26601174, %v8157_v46  ;;  %v4488_v27 = vmul.f32 0.21300554, %v4386_v11 }
 0x232   :  { %v4472_v26 = vadd.f32 %v4466_v34, %v4460_v41  ;;  %v4499_v17 = vmul.f32 0.26601174, %v4386_v11  ;;  %v4467_v29 = vmul.f32 0.036000773, %v8328_v50  ;;  %v4478_v20 = vmul.f32 0.109360695, %v8328_v50  ;;  %v11600_v14 = vpop.permute.xlu1 %382 }
 0x233   :  { %v4489_v13 = vmul.f32 0.21300554, %v8328_v50  ;;  %v4483_v2 = vadd.f32 %v4477_v4, %v4471_v24  ;;  %v4500_v35 = vmul.f32 0.26601174, %v8328_v50  ;;  %v4494_v59 = vadd.f32 %v4488_v27, %v4482_v31  ;;  %v11598_v31 = vpop.permute.xlu0 %380  ;;  %12911 = vst [vmem:[#allocation46_spill] sm:$0xff] %v11600_v14  ;;  %v11602_v4 = vpop.f32.mrb[26].mxu1 }
 0x234   :  { %v4505_v54 = vadd.f32 %v4499_v17, %v4493_v63  ;;  %v4512_v8 = vadd.f32 %v4504_v1, %v4488_v27  ;;  %v11593_v58 = vmul.f32 0.036000773, %v11574_v15  ;;  %v4491_v46 = vmul.f32 0.21300554, %v11576_v62  ;;  %12910 = vst [vmem:[#allocation30_spill] sm:$0xff] %v11598_v31 }
 0x235   :  { %v4502_v41 = vmul.f32 0.26601174, %v11576_v62  ;;  %v3183_v11 = vadd.f32 %v3177_v23, %v3171_v45  ;;  %v4518_v51 = vmul.f32 0.109360695, %v11576_v62  ;;  %v3167_v38 = vmul.f32 0.0075987587, %v3098_v30 }
 0x236   :  { %v3178_v24 = vmul.f32 0.036000773, %v3098_v30  ;;  %v3194_v50 = vadd.f32 %v3188_v7, %v3182_v33  ;;  %v3189_v28 = vmul.f32 0.109360695, %v3098_v30  ;;  %v3200_v9 = vmul.f32 0.21300554, %v3098_v30 }
 0x237   :  { %v3205_v10 = vadd.f32 %v3199_v18, %v3193_v32  ;;  %v3211_v63 = vmul.f32 0.26601174, %v3098_v30  ;;  %v3173_v16 = vadd.f32 %v3167_v38, %v3161_v56  ;;  %v3216_v1 = vadd.f32 %v3210_v37, %v3204_v61  ;;  %v11604_v23 = vpop.f32.mrb[28].mxu0  ;;  %v11606_v33 = vpop.f32.mrb[27].mxu1 }
 0x238   :  { %v3184_v43 = vadd.f32 %v3178_v24, %v3172_v44  ;;  %v4473_v34 = vadd.f32 %v4467_v29, %v4461_v42  ;;  %v3195_v45 = vadd.f32 %v3189_v28, %v3183_v11  ;;  %v3206_v27 = vadd.f32 %v3200_v9, %v3194_v50  ;;  %v11608_v52 = vpop.f32.mrb[29].mxu0  ;;  %v11610_v56 = vpop.f32.mrb[28].mxu1 }
 0x239   :  { %v3217_v17 = vadd.f32 %v3211_v63, %v3205_v10  ;;  %v4479_v7 = vmul.f32 0.109360695, %v4398_v48  ;;  %v3224_v18 = vadd.f32 %v3216_v1, %v3200_v9  ;;  %v4484_v30 = vadd.f32 %v4478_v20, %v4472_v26  ;;  %v11612_v44 = vpop.f32.mrb[30].mxu0  ;;  %v11614_v11 = vpop.f32.mrb[29].mxu1 }
 0x23a   :  { %v4490_v32 = vmul.f32 0.21300554, %v4398_v48  ;;  %v4495_v14 = vadd.f32 %v4489_v13, %v4483_v2  ;;  %v4501_v42 = vmul.f32 0.26601174, %v4398_v48  ;;  %v4506_v37 = vadd.f32 %v4500_v35, %v4494_v59  ;;  %v11616_v38 = vpop.f32.mrb[31].mxu0  ;;  %v11619_v26 = vpop.f32.mrb[30].mxu1 }
 0x23b   :  { %v4485_v61 = vadd.f32 %v4479_v7, %v4473_v34  ;;  %v4513_v29 = vadd.f32 %v4505_v54, %v4489_v13  ;;  %v4529_v24 = vmul.f32 0.036000773, %v11576_v62  ;;  %v4522_v28 = vadd.f32 %v4512_v8, %v4478_v20  ;;  %v11621_v2 = vpop.permute.xlu0 %654  ;;  %v11625_v35 = vpop.f32.mrb[31].mxu1 }
 0x23c   :  { %v4496_v50 = vadd.f32 %v4490_v32, %v4484_v30  ;;  %v4528_v9 = vmul.f32 0.036000773, %v4398_v48  ;;  %12912 = vst [vmem:[#allocation55_spill] sm:$0xff] %v11621_v2  ;;  %v4507_v63 = vadd.f32 %v4501_v42, %v4495_v14  ;;  %v4514_v1 = vadd.f32 %v4506_v37, %v4490_v32  ;;  %v11639_v37 = vpop.permute.xlu1 %656 }
 0x23d   :  { %v11623_v10 = vadd.f32 %v4491_v46, %v4485_v61  ;;  %v4523_v34 = vadd.f32 %v4513_v29, %v4479_v7  ;;  %v3190_v13 = vmul.f32 0.109360695, %v11574_v15  ;;  %v4540_v59 = vmul.f32 0.0075987587, %v11576_v62  ;;  %12913 = vst [vmem:[#allocation68_spill] sm:$0xff] %v11639_v37 }
 0x23e   :  { %v11629_v54 = vadd.f32 %v4502_v41, %v4496_v50  ;;  %v4534_v30 = vadd.f32 %v4528_v9, %v4522_v28  ;;  %v3201_v48 = vmul.f32 0.21300554, %v11574_v15  ;;  %v4515_v20 = vadd.f32 %v4507_v63, %v4491_v46 }
 0x23f   :  { %v4524_v8 = vadd.f32 %v4518_v51, %v4514_v1  ;;  %v4535_v55 = vadd.f32 %v4529_v24, %v4523_v34  ;;  %v3212_v61 = vmul.f32 0.26601174, %v11574_v15  ;;  %v3203_v14 = vmul.f32 0.21300554, %v11584_v39  ;;  %v11643_v24 = vpop.permute.xlu0 %471 }
 0x240   :  { %v4546_v2 = vadd.f32 %v4540_v59, %v4534_v30  ;;  %v3214_v7 = vmul.f32 0.26601174, %v11584_v39  ;;  %v3230_v32 = vmul.f32 0.109360695, %v11584_v39  ;;  %v3241_v42 = vmul.f32 0.036000773, %v11584_v39 }
 0x241   :  { %v3252_v62 = vmul.f32 0.0075987587, %v11584_v39  ;;  %v3185_v41 = vadd.f32 %v11593_v58, %v3173_v16  ;;  %v3191_v46 = vmul.f32 0.109360695, %v11588_v21  ;;  %v3196_v51 = vadd.f32 %v3190_v13, %v3184_v43  ;;  %12914 = vst [vmem:[#allocation25_spill] sm:$0xff] %v11643_v24 }
 0x242   :  { %v3202_v15 = vmul.f32 0.21300554, %v11588_v21  ;;  %v3207_v29 = vadd.f32 %v3201_v48, %v3195_v45  ;;  %v3213_v50 = vmul.f32 0.26601174, %v11588_v21  ;;  %v3218_v28 = vadd.f32 %v3212_v61, %v3206_v27 }
 0x243   :  { %v3225_v9 = vadd.f32 %v3217_v17, %v3201_v48  ;;  %v3234_v63 = vadd.f32 %v3224_v18, %v3190_v13  ;;  %v11647_v1 = vmul.f32 0.21300554, %v11586_v3  ;;  %v3197_v39 = vadd.f32 %v3191_v46, %v3185_v41  ;;  %v11659_v41 = vpop.permute.xlu1 %473 }
 0x244   :  { %v3208_v58 = vadd.f32 %v3202_v15, %v3196_v51  ;;  %v3240_v16 = vmul.f32 0.036000773, %v11588_v21  ;;  %v11651_v34 = vmul.f32 0.109360695, %v11586_v3  ;;  %v3219_v43 = vadd.f32 %v3213_v50, %v3207_v29  ;;  %12915 = vst [vmem:[#allocation72_spill] sm:$0xff] %v11659_v41  ;;  %v11664_v29 = vpop.permute.xlu0 %384  ;;  %v12922_v41 = vld [vmem:[#allocation35_spill] sm:$0xff] }
 0x245   :  { %v3226_v59 = vadd.f32 %v3218_v28, %v3202_v15  ;;  %v3235_v45 = vadd.f32 %v3225_v9, %v3191_v46  ;;  %v11653_v30 = vadd.f32 %v3203_v14, %v3197_v39  ;;  %v4519_v17 = vmul.f32 0.109360695, %v11590_v40  ;;  %12916 = vst [vmem:[#allocation65_spill] sm:$0xff] %v11664_v29 }
 0x246   :  { %v11655_v24 = vadd.f32 %v3214_v7, %v3208_v58  ;;  %v3246_v27 = vadd.f32 %v3240_v16, %v3234_v63  ;;  %v3227_v18 = vadd.f32 %v3219_v43, %v3203_v14  ;;  %v4530_v61 = vmul.f32 0.036000773, %v11590_v40  ;;  %v12919_v43 = vld [vmem:[#allocation39_spill] sm:$0xff] }
 0x247   :  { %v3236_v13 = vadd.f32 %v3230_v32, %v3226_v59  ;;  %v3247_v48 = vadd.f32 %v3241_v42, %v3235_v45  ;;  %v4531_v21 = vmul.f32 0.036000773, %v11586_v3  ;;  %v4541_v15 = vmul.f32 0.0075987587, %v11590_v40 }
 0x248   :  { %v3258_v51 = vadd.f32 %v3252_v62, %v3246_v27  ;;  %v4552_v46 = vmul.f32 0.0010283802, %v11590_v40  ;;  %v4542_v7 = vmul.f32 0.0075987587, %v11586_v3  ;;  %v4553_v50 = vmul.f32 0.0010283802, %v11586_v3 }
 0x249   :  { %v4503_v14 = vmul.f32 0.26601174, %v11590_v40  ;;  %v4525_v32 = vadd.f32 %v4519_v17, %v4515_v20  ;;  %v4510_v42 = vmul.f32 0.21300554, %v11590_v40  ;;  %v4547_v28 = vadd.f32 %v4541_v15, %v4535_v55  ;;  %v11693_v17 = vpop.permute.xlu1 %386 }
 0x24a   :  { %v11670_v9 = vadd.f32 %v4552_v46, %v4546_v2  ;;  %v11673_v62 = vmul.f32 0.21300554, %v11602_v4  ;;  %v11676_v63 = vmul.f32 0.109360695, %v11602_v4  ;;  %v3243_v39 = vmul.f32 0.036000773, %v11602_v4 }
 0x24b   :  { %v3254_v58 = vmul.f32 0.0075987587, %v11602_v4  ;;  %v4536_v16 = vadd.f32 %v4530_v61, %v4524_v8  ;;  %v11680_v3 = vadd.f32 %v4553_v50, %v4547_v28  ;;  %v3265_v55 = vmul.f32 0.0010283802, %v11602_v4  ;;  %12920 = vst [vmem:[#allocation50_spill] sm:$0xff] %v11693_v17  ;;  %v12921_v8 = vld [vmem:[#allocation49_spill] sm:$0xff]  ;;  %v11700_v50 = vpop.permute.xlu0 %658 }
 0x24c   :  { %12917 = vst [vmem:[#allocation43_spill] sm:$0xff] %v11670_v9  ;;  %v11686_v40 = vmul.f32 0.036000773, %v11604_v23  ;;  %v11689_v2 = vmul.f32 0.0075987587, %v11604_v23  ;;  %v4537_v27 = vadd.f32 %v4531_v21, %v4525_v32 }
 0x24d   :  { %12918 = vst [vmem:[#allocation14_spill] sm:$0xff] %v11680_v3  ;;  %v3253_v59 = vmul.f32 0.0075987587, %v11606_v33  ;;  %v3264_v45 = vmul.f32 0.0010283802, %v11606_v33  ;;  %v4548_v9 = vadd.f32 %v4542_v7, %v4536_v16 }
 0x24e   :  { %v4555_v15 = vmul.f32 0.0010283802, %v11604_v23  ;;  %v3231_v4 = vmul.f32 0.109360695, %v11606_v33  ;;  %v4543_v46 = vmul.f32 0.0075987587, %v11608_v52 }
 0x24f   :  { %v3259_v28 = vadd.f32 %v3253_v59, %v3247_v48  ;;  %v3270_v20 = vadd.f32 %v3264_v45, %v3258_v51  ;;  %v4554_v29 = vmul.f32 0.0010283802, %v11608_v52  ;;  %v3215_v21 = vmul.f32 0.26601174, %v11606_v33  ;;  %v12925_v45 = vld [vmem:[#allocation21_spill] sm:$0xff] }
 0x250   :  { %v3222_v32 = vmul.f32 0.21300554, %v11606_v33  ;;  %v3242_v17 = vmul.f32 0.036000773, %v11606_v33  ;;  %v4549_v61 = vadd.f32 %v4543_v46, %v4537_v27  ;;  %v4521_v48 = vmul.f32 0.109360695, %v11608_v52 }
 0x251   :  { %v3271_v3 = vadd.f32 %v3265_v55, %v3259_v28  ;;  %v11706_v23 = vmul.f32 %v3270_v20, %v3270_v20  ;;  %v11709_v37 = vmul.f32 %v3270_v20, %v12922_v41  ;;  %v11711_v31 = vadd.f32 %v4554_v29, %v4548_v9  ;;  %v12927_v41 = vld [vmem:[#allocation52_spill] sm:$0xff]  ;;  %v11728_v9 = vpop.permute.xlu1 %660 }
 0x252   :  { %v4532_v51 = vmul.f32 0.036000773, %v11608_v52  ;;  %v11715_v7 = vadd.f32 %v4555_v15, %v4549_v61  ;;  %v3237_v16 = vadd.f32 %v3231_v4, %v3227_v18  ;;  %v3245_v20 = vmul.f32 0.036000773, %v11610_v56  ;;  %v11733_v61 = vpop.permute.xlu0 %475 }
 0x253   :  { %12923 = vst [vmem:[#allocation23_spill] sm:$0xff] %v11711_v31  ;;  %v11717_v59 = vmul.f32 %v3271_v3, %v3271_v3  ;;  %v11720_v33 = vmul.f32 %v3271_v3, %v12925_v45  ;;  %v11724_v55 = vadd.f32 %v11706_v23, %v12919_v43  ;;  %v3248_v18 = vadd.f32 %v3242_v17, %v3236_v13 }
 0x254   :  { %12924 = vst [vmem:[#allocation13_spill] sm:$0xff] %v11715_v7  ;;  %v3249_v27 = vadd.f32 %v3243_v39, %v3237_v16  ;;  %v3256_v15 = vmul.f32 0.0075987587, %v11610_v56  ;;  %v3255_v4 = vmul.f32 0.0075987587, %v11614_v11  ;;  %v4509_v52 = vadd.f32 %v4503_v14, %v11623_v10 }
 0x255   :  { %12926 = vst [vmem:[#allocation27_spill] sm:$0xff] %v11720_v33  ;;  %v11737_v3 = vadd.f32 %v11717_v59, %v12921_v8  ;;  %v3266_v46 = vmul.f32 0.0010283802, %v11614_v11  ;;  %v3267_v28 = vmul.f32 0.0010283802, %v11610_v56  ;;  %v3260_v45 = vadd.f32 %v3254_v58, %v3248_v18  ;;  %v11748_v7 = vpop.permute.xlu1 %477 }
 0x256   :  { %v4516_v13 = vadd.f32 %v4510_v42, %v11629_v54  ;;  %v3233_v39 = vmul.f32 0.109360695, %v11614_v11  ;;  %v3244_v17 = vmul.f32 0.036000773, %v11614_v11  ;;  %v3261_v16 = vadd.f32 %v3255_v4, %v3249_v27  ;;  %v12928_v42 = vld [vmem:[#allocation17_spill] sm:$0xff] }
 0x257   :  { %v4545_v29 = vmul.f32 0.0075987587, %v11616_v38  ;;  %v3272_v31 = vadd.f32 %v3266_v46, %v3260_v45  ;;  %v4517_v8 = vadd.f32 %v11647_v1, %v4509_v52  ;;  %v3221_v56 = vadd.f32 %v3215_v21, %v11653_v30  ;;  %v11761_v46 = vpop.permute.xlu0 %388 }
 0x258   :  { %v4526_v43 = vadd.f32 %v11651_v34, %v4516_v13  ;;  %v3273_v58 = vadd.f32 %v3267_v28, %v3261_v16  ;;  %v4556_v10 = vmul.f32 0.0010283802, %v11616_v38  ;;  %v3228_v54 = vadd.f32 %v3222_v32, %v11655_v24 }
 0x259   :  { %v3257_v14 = vmul.f32 0.0075987587, %v11625_v35  ;;  %v11756_v11 = vmul.f32 %v3272_v31, %v3272_v31  ;;  %v11759_v18 = vmul.f32 %v3272_v31, %v12928_v42  ;;  %v4527_v27 = vadd.f32 %v4521_v48, %v4517_v8  ;;  %v11770_v30 = vpop.permute.xlu1 %390 }
 0x25a   :  { %v4538_v4 = vadd.f32 %v4532_v51, %v4526_v43  ;;  %v11763_v1 = vmul.f32 %v3273_v58, %v3273_v58  ;;  %v11766_v34 = vmul.f32 %v3273_v58, %v12898_v25  ;;  %v3229_v38 = vadd.f32 %v11673_v62, %v3221_v56  ;;  %v12931_v56 = vld [vmem:[#allocation30_spill] sm:$0xff] }
 0x25b   :  { %v3238_v24 = vadd.f32 %v11676_v63, %v3228_v54  ;;  %v11774_v21 = vadd.f32 %v11756_v11, %v12927_v41  ;;  %v4539_v31 = vadd.f32 %v11686_v40, %v4527_v27  ;;  %v3268_v8 = vmul.f32 0.0010283802, %v11625_v35  ;;  %v12933_v54 = vld [vmem:[#allocation38_spill] sm:$0xff] }
 0x25c   :  { %v4550_v43 = vadd.f32 %v11689_v2, %v4538_v4  ;;  %v11781_v25 = vadd.f32 %v11763_v1, %v11535_v6  ;;  %v3239_v32 = vadd.f32 %v3233_v39, %v3229_v38  ;;  %v426_v63 = vsel %vm412_vm1, %v11566_v0, 0.0  ;;  %v663_v2 = vpop.permute.xlu0 %662  ;;  %v12935_v4 = vld [vmem:[#allocation46_spill] sm:$0xff] }
 0x25d   :  { %v3250_v62 = vadd.f32 %v3244_v17, %v3238_v24  ;;  %v4557_v48 = vmul.f32 0.0010283802, %v11612_v44  ;;  %v4551_v51 = vadd.f32 %v4545_v29, %v4539_v31  ;;  %v513_v40 = vadd.f32 %v11563_v47, %v11557_v36  ;;  %v665_v39 = vpop.permute.xlu1 %664  ;;  %v12936_v24 = vld [vmem:[#allocation55_spill] sm:$0xff] }
 0x25e   :  { %v11786_v52 = vadd.f32 %v4556_v10, %v4550_v43  ;;  %v3269_v35 = vmul.f32 0.0010283802, %v11619_v26  ;;  %v3251_v28 = vadd.f32 %v3245_v20, %v3239_v32  ;;  %v427_v13 = vadd.f32 %v426_v63, %v11570_v49  ;;  %v12938_v43 = vld [vmem:[#allocation36_spill] sm:$0xff] }
 0x25f   :  { %v3262_v45 = vadd.f32 %v3256_v15, %v3250_v62  ;;  %v11792_v17 = vadd.f32 %v4557_v48, %v4551_v51  ;;  %v698_v44 = vsel %vm686_vm2, %v11572_v5, 0.0  ;;  %v700_v29 = vsel %vm686_vm2, %v11578_v60, 0.0  ;;  %v12941_v48 = vld [vmem:[#allocation68_spill] sm:$0xff] }
 0x260   :  { %12929 = vst [vmem:[#allocation37_spill] sm:$0xff] %v11786_v52  ;;  %v3263_v36 = vadd.f32 %v3257_v14, %v3251_v28  ;;  %v699_v26 = vadd.f32 %v698_v44, %v11568_v57  ;;  %v514_v20 = vsel %vm412_vm1, %v11580_v12, 0.0  ;;  %v516_v16 = vsel %vm412_vm1, %v11582_v19, 0.0  ;;  %v480_v58 = vpop.permute.xlu0 %479 }
 0x261   :  { %12930 = vst [vmem:[#allocation45_spill] sm:$0xff] %v11792_v17  ;;  %v3274_v47 = vadd.f32 %v3268_v8, %v3262_v45  ;;  %v515_v15 = vadd.f32 %v514_v20, %v513_v40  ;;  %v428_v5 = vsel %vm412_vm1, %v12931_v56, 0.0  ;;  %v482_v42 = vpop.permute.xlu1 %481  ;;  %v430_v38 = vsel %vm412_vm1, %v12935_v4, 0.0  ;;  %v12942_v40 = vld [vmem:[#allocation25_spill] sm:$0xff]  ;;  %v12946_v20 = vld [vmem:[#allocation50_spill] sm:$0xff] }
 0x262   :  { %v3275_v10 = vadd.f32 %v3269_v35, %v3263_v36  ;;  %v701_v57 = vadd.f32 %v700_v29, %v699_v26  ;;  %v429_v27 = vadd.f32 %v428_v5, %v427_v13  ;;  %v702_v19 = vsel %vm686_vm2, %v12936_v24, 0.0  ;;  %v12944_v29 = vld [vmem:[#allocation72_spill] sm:$0xff] }
 0x263   :  { %v11809_v60 = vmul.f32 %v3274_v47, %v3274_v47  ;;  %v11812_v14 = vmul.f32 %v3274_v47, %v12933_v54  ;;  %v517_v12 = vadd.f32 %v516_v16, %v515_v15  ;;  %v704_v51 = vsel %vm686_vm2, %v12941_v48, 0.0  ;;  %v12945_v47 = vld [vmem:[#allocation65_spill] sm:$0xff] }
 0x264   :  { %v11818_v31 = vmul.f32 %v3275_v10, %v3275_v10  ;;  %v11821_v8 = vmul.f32 %v3275_v10, %v12938_v43  ;;  %v431_v62 = vadd.f32 %v430_v38, %v429_v27  ;;  %v703_v63 = vadd.f32 %v702_v19, %v701_v57  ;;  %v393_v28 = vpop.permute.xlu0 %392 }
 0x265   :  { %12932 = vst [vmem:[#allocation51_spill] sm:$0xff] %v11809_v60  ;;  %12934 = vst [vmem:[#allocation58_spill] sm:$0xff] %v11812_v14  ;;  %v11825_v32 = vadd.f32 %v11809_v60, %v11542_v22  ;;  %v518_v35 = vsel %vm412_vm1, %v12942_v40, 0.0  ;;  %v520_v36 = vsel %vm412_vm1, %v12944_v29, 0.0  ;;  %v432_v26 = vsel %vm412_vm1, %v12945_v47, 0.0  ;;  %v395_v10 = vpop.permute.xlu1 %394 }
 0x266   :  { %12937 = vst [vmem:[#allocation67_spill] sm:$0xff] %v11818_v31  ;;  %12939 = vst [vmem:[#allocation69_spill] sm:$0xff] %v11821_v8  ;;  %v11833_v45 = vadd.f32 %v11818_v31, %v11552_v53  ;;  %v519_v13 = vadd.f32 %v518_v35, %v517_v12  ;;  %v705_v44 = vadd.f32 %v704_v51, %v703_v63  ;;  %v434_v15 = vsel %vm412_vm1, %v12946_v20, 0.0 }
 0x267   :  { %12940 = vst [vmem:[#allocation60_spill] sm:$0xff] %v11825_v32  ;;  %v433_v56 = vadd.f32 %v432_v26, %v431_v62  ;;  %v706_v5 = vsel %vm686_vm2, %v11700_v50, 0.0  ;;  %v708_v57 = vsel %vm686_vm2, %v11728_v9, 0.0  ;;  %v522_v12 = vsel %vm412_vm1, %v11733_v61, 0.0 }
 0x268   :  { %12943 = vst [vmem:[#allocation73_spill] sm:$0xff] %v11833_v45  ;;  %v521_v16 = vadd.f32 %v520_v36, %v519_v13  ;;  %v707_v54 = vadd.f32 %v706_v5, %v705_v44  ;;  %v524_v27 = vsel %vm412_vm1, %v11748_v7, 0.0  ;;  %v667_v4 = vpop.permute.xlu0 %666  ;;  %v436_v19 = vsel %vm412_vm1, %v11761_v46, 0.0 }
 0x269   :  { %v435_v38 = vadd.f32 %v434_v15, %v433_v56  ;;  %v438_v50 = vsel %vm412_vm1, %v11770_v30, 0.0  ;;  %v710_v62 = vsel %vm686_vm2, %v663_v2, 0.0  ;;  %v526_v9 = vsel %vm412_vm1, %v480_v58, 0.0  ;;  %v669_v29 = vpop.permute.xlu1 %668 }
 0x26a   :  { %v523_v24 = vadd.f32 %v522_v12, %v521_v16  ;;  %v709_v43 = vadd.f32 %v708_v57, %v707_v54  ;;  %v712_v61 = vsel %vm686_vm2, %v665_v39, 0.0  ;;  %v528_v7 = vsel %vm412_vm1, %v482_v42, 0.0 }
 0x26b   :  { %v437_v48 = vadd.f32 %v436_v19, %v435_v38  ;;  %v440_v40 = vsel %vm412_vm1, %v393_v28, 0.0  ;;  %v714_v44 = vsel %vm686_vm2, %v667_v4, 0.0  ;;  %v442_v2 = vsel %vm412_vm1, %v395_v10, 0.0 }
 0x26c   :  { %v525_v63 = vadd.f32 %v524_v27, %v523_v24  ;;  %v711_v51 = vadd.f32 %v710_v62, %v709_v43  ;;  %v484_v35 = vpop.permute.xlu0 %483  ;;  %v716_v39 = vsel %vm686_vm2, %v669_v29, 0.0 }
 0x26d   :  { %v439_v13 = vadd.f32 %v438_v50, %v437_v48  ;;  %v530_v58 = vsel %vm412_vm1, %v484_v35, 0.0 }
 0x26e   :  { %v527_v46 = vadd.f32 %v526_v9, %v525_v63  ;;  %v713_v30 = vadd.f32 %v712_v61, %v711_v51 }
 0x26f   :  { %v441_v47 = vadd.f32 %v440_v40, %v439_v13 }
 0x270   :  { %v529_v36 = vadd.f32 %v528_v7, %v527_v46  ;;  %v715_v26 = vadd.f32 %v714_v44, %v713_v30  ;;  %v7202_v30 = vmul.f32 2.0, %v11759_v18 }
 0x271   :  { %v443_v20 = vadd.f32 %v442_v2, %v441_v47  ;;  %v7204_v2 = vmul.f32 2.0, %v11812_v14  ;;  %v7201_v47 = vmul.f32 2.0, %v11720_v33 }
 0x272   :  { %v531_v42 = vadd.f32 %v530_v58, %v529_v36  ;;  %v717_v28 = vadd.f32 %v716_v39, %v715_v26  ;;  %v7200_v58 = vmul.f32 2.0, %v11709_v37  ;;  %v7203_v26 = vmul.f32 2.0, %v11766_v34 }
 0x273   :  { %444 = vadd.xlane.f32.xlu1 %v443_v20  ;;  %v11868_v39 = vadd.f32 1.0, %v11724_v55 }
 0x274   :  { %532 = vadd.xlane.f32.xlu0 %v531_v42 }
 0x277   :  { %718 = vadd.xlane.f32.xlu1 %v717_v28  ;;  %v11871_v28 = vadd.f32 1.0, %v11737_v3 }
 0x2a3   :  { %v153_v15 = vpop.xlane.xlu0 %152 }
 0x2a4   :  { %v154_v56 = vrot.slane %v153_v15, 4 }
 0x2a6   :  { %v155_v54 = vadd.f32 %v154_v56, %v153_v15  ;;  %v11873_v15 = vadd.f32 1.0, %v7202_v30  ;;  %v7205_v56 = vmul.f32 2.0, %v11821_v8 }
 0x2a7   :  { %v165_v16 = vpop.xlane.xlu1 %164 }
 0x2a8   :  { %v166_v5 = vrot.slane %v165_v16, 4  ;;  %v156_v12 = vrot.slane %v155_v54, 2  ;;  %12947 = vst [vmem:[#allocation63_spill] sm:$0xff] %v11873_v15 }
 0x2aa   :  { %v167_v57 = vadd.f32 %v166_v5, %v165_v16  ;;  %v157_v24 = vadd.f32 %v156_v12, %v155_v54  ;;  %v11877_v5 = vadd.f32 1.0, %v11774_v21  ;;  %v11880_v54 = vadd.f32 1.0, %v11781_v25 }
 0x2ab   :  { %v177_v10 = vpop.xlane.xlu0 %176 }
 0x2ac   :  { %v168_v27 = vrot.slane %v167_v57, 2  ;;  %v178_v4 = vrot.slane %v177_v10, 4  ;;  %v158_v9 = vrot.slane %v157_v24, 1  ;;  %12948 = vst [vmem:[#allocation64_spill] sm:$0xff] %v11877_v5  ;;  %12949 = vst [vmem:[#allocation12_spill] sm:$0xff] %v11880_v54 }
 0x2ae   :  { %v179_v38 = vadd.f32 %v178_v4, %v177_v10  ;;  %v169_v19 = vadd.f32 %v168_v27, %v167_v57  ;;  %v159_v61 = vadd.f32 %v158_v9, %v157_v24  ;;  %v11882_v57 = vadd.f32 1.0, %v7204_v2 }
 0x2af   :  { %v11884_v10 = vadd.f32 1.0, %v7200_v58  ;;  %v11888_v24 = vadd.f32 1.0, %v7203_v26  ;;  %v11890_v9 = vadd.f32 1.0, %v7205_v56 }
 0x2b0   :  { %v180_v50 = vrot.slane %v179_v38, 2  ;;  %v170_v63 = vrot.slane %v169_v19, 1  ;;  %9197 = vpush %v159_v61  ;;  %12950 = vst [vmem:[#allocation75_spill] sm:$0xff] %v11882_v57 }
 0x2b1   :  { %v242_v43 = vpop.xlane.xlu0 %241  ;;  %12951 = vst [vmem:[#allocation76_spill] sm:$0xff] %v11884_v10  ;;  %12953 = vst [vmem:[#allocation79_spill] sm:$0xff] %v11888_v24 }
 0x2b2   :  { %v243_v62 = vrot.slane %v242_v43, 4  ;;  %v171_v51 = vadd.f32 %v170_v63, %v169_v19  ;;  %v181_v7 = vadd.f32 %v180_v50, %v179_v38  ;;  %v11886_v38 = vadd.f32 1.0, %v7201_v47  ;;  %12954 = vst [vmem:[#allocation81_spill] sm:$0xff] %v11890_v9 }
 0x2b4   :  { %v244_v48 = vadd.f32 %v243_v62, %v242_v43  ;;  %v182_v35 = vrot.slane %v181_v7, 1  ;;  %9199 = vpush %v171_v51  ;;  %12952 = vst [vmem:[#allocation78_spill] sm:$0xff] %v11886_v38 }
 0x2b6   :  { %v245_v40 = vrot.slane %v244_v48, 2  ;;  %v183_v13 = vadd.f32 %v182_v35, %v181_v7 }
 0x2b8   :  { %v246_v46 = vadd.f32 %v245_v40, %v244_v48  ;;  %9201 = vpush %v183_v13 }
 0x2ba   :  { %v247_v44 = vrot.slane %v246_v46, 1 }
 0x2bc   :  { %v248_v29 = vadd.f32 %v247_v44, %v246_v46 }
 0x2be   :  { %9203 = vpush %v248_v29 }
 0x2dc   :  { %v8655_v36 = vpop.f32.mrb[32].mxu0 }
 0x2dd   :  { %v7026_v20 = vmul.f32 0.0075987587, %v8655_v36  ;;  %v6926_v42 = vpop.f32.mrb[33].mxu0  ;;  %v7021_v19 = vmul.f32 0.0010283802, %v8655_v36 }
 0x2de   :  { %v7020_v16 = vmul.f32 0.0010283802, %v6926_v42 }
 0x2df   :  { %v8487_v55 = vpop.f32.mrb[32].mxu1 }
 0x2e0   :  { %v7032_v12 = vadd.f32 %v7026_v20, %v7020_v16  ;;  %v5738_v27 = vmul.f32 0.0075987587, %v8487_v55  ;;  %v8658_v3 = vpop.f32.mrb[34].mxu0  ;;  %v5638_v4 = vpop.f32.mrb[33].mxu1  ;;  %v5733_v43 = vmul.f32 0.0010283802, %v8487_v55 }
 0x2e1   :  { %v7028_v21 = vmul.f32 0.0075987587, %v8658_v3  ;;  %v7023_v50 = vmul.f32 0.0010283802, %v8658_v3  ;;  %v5732_v62 = vmul.f32 0.0010283802, %v5638_v4  ;;  %s9198_s25 = spop %9197 }
 0x2e2   :  { %v6938_v25 = vpop.f32.mrb[35].mxu0  ;;  %v7039_v51 = vmul.f32 0.036000773, %v8658_v3  ;;  %v7050_v7 = vmul.f32 0.109360695, %v8658_v3 }
 0x2e3   :  { %v7022_v63 = vmul.f32 0.0010283802, %v6938_v25  ;;  %v7027_v48 = vmul.f32 0.0075987587, %v6938_v25  ;;  %v7038_v61 = vmul.f32 0.036000773, %v6938_v25  ;;  %v5744_v40 = vadd.f32 %v5738_v27, %v5732_v62 }
 0x2e4   :  { %v8490_v35 = vpop.f32.mrb[34].mxu1  ;;  %v8661_v13 = vpop.f32.mrb[36].mxu0 }
 0x2e5   :  { %v7033_v46 = vadd.f32 %v7027_v48, %v7021_v19  ;;  %v7034_v44 = vadd.f32 %v7028_v21, %v7022_v63  ;;  %v7044_v29 = vadd.f32 %v7038_v61, %v7032_v12  ;;  %v5735_v30 = vmul.f32 0.0010283802, %v8490_v35  ;;  %v5650_v2 = vpop.f32.mrb[35].mxu1  ;;  %v6950_v58 = vpop.f32.mrb[37].mxu0  ;;  %s9200_s26 = spop %9199 }
 0x2e6   :  { %v5740_v36 = vmul.f32 0.0075987587, %v8490_v35  ;;  %v5751_v47 = vmul.f32 0.036000773, %v8490_v35  ;;  %v5762_v26 = vmul.f32 0.109360695, %v8490_v35 }
 0x2e7   :  { %v7045_v20 = vadd.f32 %v7039_v51, %v7033_v46  ;;  %v7056_v42 = vadd.f32 %v7050_v7, %v7044_v29  ;;  %v11892_v16 = vmul.f32 0.0010283802, %v8661_v13  ;;  %v7030_v56 = vmul.f32 0.0075987587, %v8661_v13  ;;  %v8493_v55 = vpop.f32.mrb[36].mxu1 }
 0x2e8   :  { %v7041_v4 = vmul.f32 0.036000773, %v8661_v13  ;;  %v7052_v3 = vmul.f32 0.109360695, %v8661_v13  ;;  %v7063_v27 = vmul.f32 0.21300554, %v8661_v13 }
 0x2e9   :  { %v7074_v62 = vmul.f32 0.26601174, %v8661_v13  ;;  %v5734_v25 = vmul.f32 0.0010283802, %v5650_v2  ;;  %v5739_v19 = vmul.f32 0.0075987587, %v5650_v2  ;;  %s9202_s27 = spop %9201 }
 0x2ea   :  { %v5750_v21 = vmul.f32 0.036000773, %v5650_v2  ;;  %v7024_v12 = vmul.f32 0.0010283802, %v6950_v58  ;;  %v7029_v63 = vmul.f32 0.0075987587, %v6950_v58  ;;  %s185_s5 = sadd.f32 %s9202_s27, %s9200_s26 }
 0x2eb   :  { %v5745_v48 = vadd.f32 %v5739_v19, %v5733_v43  ;;  %v5746_v61 = vadd.f32 %v5740_v36, %v5734_v25  ;;  %v7040_v49 = vmul.f32 0.036000773, %v6950_v58  ;;  %v7051_v0 = vmul.f32 0.109360695, %v6950_v58  ;;  %v8664_v35 = vpop.f32.mrb[38].mxu0  ;;  %v5662_v51 = vpop.f32.mrb[37].mxu1 }
 0x2ec   :  { %v5756_v7 = vadd.f32 %v5750_v21, %v5744_v40  ;;  %v7035_v46 = vadd.f32 %v7029_v63, %v7023_v50  ;;  %v7036_v29 = vadd.f32 %v7030_v56, %v7024_v12  ;;  %v7062_v45 = vmul.f32 0.21300554, %v6950_v58  ;;  %v6962_v53 = vpop.f32.mrb[39].mxu0  ;;  %v8496_v17 = vpop.f32.mrb[38].mxu1 }
 0x2ed   :  { %v5757_v9 = vadd.f32 %v5751_v47, %v5745_v48  ;;  %v7046_v22 = vadd.f32 %v7040_v49, %v7034_v44  ;;  %v7057_v13 = vadd.f32 %v7051_v0, %v7045_v20  ;;  %v11894_v52 = vmul.f32 0.0010283802, %v8493_v55  ;;  %v8667_v2 = vpop.f32.mrb[40].mxu0  ;;  %v11896_v31 = vpop.f32.mrb[39].mxu1 }
 0x2ee   :  { %v5768_v43 = vadd.f32 %v5762_v26, %v5756_v7  ;;  %v7068_v36 = vadd.f32 %v7062_v45, %v7056_v42  ;;  %v5742_v25 = vmul.f32 0.0075987587, %v8493_v55  ;;  %v5753_v19 = vmul.f32 0.036000773, %v8493_v55  ;;  %v11898_v32 = vpop.f32.mrb[41].mxu0 }
 0x2ef   :  { %v5764_v40 = vmul.f32 0.109360695, %v8493_v55  ;;  %v5775_v50 = vmul.f32 0.21300554, %v8493_v55  ;;  %v5786_v56 = vmul.f32 0.26601174, %v8493_v55  ;;  %v7047_v58 = vadd.f32 %v7041_v4, %v7035_v46  ;;  %s9204_s28 = spop %9203 }
 0x2f0   :  { %v7043_v21 = vmul.f32 0.036000773, %v8664_v35  ;;  %v11900_v12 = vmul.f32 0.109360695, %v8664_v35  ;;  %v11902_v49 = vmul.f32 0.21300554, %v8664_v35  ;;  %v7058_v0 = vadd.f32 %v7052_v3, %v7046_v22 }
 0x2f1   :  { %v11904_v44 = vmul.f32 0.26601174, %v8664_v35  ;;  %v5736_v47 = vmul.f32 0.0010283802, %v5662_v51  ;;  %v5741_v20 = vmul.f32 0.0075987587, %v5662_v51  ;;  %v7069_v26 = vadd.f32 %v7063_v27, %v7057_v13 }
 0x2f2   :  { %v5752_v45 = vmul.f32 0.036000773, %v5662_v51  ;;  %v5763_v42 = vmul.f32 0.109360695, %v5662_v51  ;;  %v5774_v63 = vmul.f32 0.21300554, %v5662_v51  ;;  %v7080_v48 = vadd.f32 %v7074_v62, %v7068_v36 }
 0x2f3   :  { %v5747_v7 = vadd.f32 %v5741_v20, %v5735_v30  ;;  %v5748_v60 = vadd.f32 %v5742_v25, %v5736_v47  ;;  %v7031_v57 = vmul.f32 0.0075987587, %v6962_v53  ;;  %v7042_v55 = vmul.f32 0.036000773, %v6962_v53  ;;  %v11906_v4 = vpop.f32.mrb[40].mxu1  ;;  %v11908_v46 = vpop.f32.mrb[42].mxu0 }
 0x2f4   :  { %v5758_v38 = vadd.f32 %v5752_v45, %v5746_v61  ;;  %v5769_v24 = vadd.f32 %v5763_v42, %v5757_v9  ;;  %v5780_v22 = vadd.f32 %v5774_v63, %v5768_v43  ;;  %v7053_v3 = vmul.f32 0.109360695, %v6962_v53  ;;  %v11910_v35 = vpop.f32.mrb[41].mxu1  ;;  %v11912_v15 = vpop.f32.mrb[43].mxu0  ;;  %s250_s6 = smul.f32 0.5, %s9204_s28 }
 0x2f5   :  { %v7037_v27 = vadd.f32 %v7031_v57, %v11892_v16  ;;  %v7048_v51 = vadd.f32 %v7042_v55, %v7036_v29  ;;  %v7064_v62 = vmul.f32 0.21300554, %v6962_v53  ;;  %v7075_v30 = vmul.f32 0.26601174, %v6962_v53  ;;  %v11915_v13 = vpop.f32.mrb[42].mxu1  ;;  %v11917_v36 = vpop.f32.mrb[44].mxu0 }
 0x2f6   :  { %v7059_v25 = vadd.f32 %v7053_v3, %v7047_v58  ;;  %v11919_v47 = vmul.f32 0.036000773, %v8496_v17  ;;  %v11921_v61 = vmul.f32 0.109360695, %v8496_v17  ;;  %v11923_v9 = vmul.f32 0.21300554, %v8496_v17  ;;  %s251_s1 = sadd.f32 %s250_s6, %s185_s5 }
 0x2f7   :  { %v7070_v43 = vadd.f32 %v7064_v62, %v7058_v0  ;;  %v7081_v20 = vadd.f32 %v7075_v30, %v7069_v26  ;;  %v7088_v45 = vadd.f32 %v7080_v48, %v7064_v62  ;;  %v11925_v42 = vmul.f32 0.26601174, %v8496_v17  ;;  %v11927_v57 = vpop.f32.mrb[43].mxu1  ;;  %v11929_v16 = vpop.f32.mrb[45].mxu0 }
 0x2f8   :  { %v7067_v53 = vmul.f32 0.21300554, %v8667_v2  ;;  %v7078_v29 = vmul.f32 0.26601174, %v8667_v2  ;;  %v7094_v63 = vmul.f32 0.109360695, %v8667_v2  ;;  %v5759_v55 = vadd.f32 %v5753_v19, %v5747_v7 }
 0x2f9   :  { %v7105_v58 = vmul.f32 0.036000773, %v8667_v2  ;;  %v7116_v3 = vmul.f32 0.0075987587, %v8667_v2  ;;  %v5743_v10 = vmul.f32 0.0075987587, %v11896_v31  ;;  %v5770_v8 = vadd.f32 %v5764_v40, %v5758_v38 }
 0x2fa   :  { %v5754_v14 = vmul.f32 0.036000773, %v11896_v31  ;;  %v5765_v0 = vmul.f32 0.109360695, %v11896_v31  ;;  %v5776_v17 = vmul.f32 0.21300554, %v11896_v31  ;;  %v5781_v26 = vadd.f32 %v5775_v50, %v5769_v24 }
 0x2fb   :  { %v5749_v48 = vadd.f32 %v5743_v10, %v11894_v52  ;;  %v5787_v62 = vmul.f32 0.26601174, %v11896_v31  ;;  %v5792_v30 = vadd.f32 %v5786_v56, %v5780_v22  ;;  %v7049_v54 = vadd.f32 %v7043_v21, %v7037_v27  ;;  %v11937_v33 = vpop.f32.mrb[44].mxu1  ;;  %v11939_v19 = vpop.f32.mrb[46].mxu0 }
 0x2fc   :  { %v5760_v2 = vadd.f32 %v5754_v14, %v5748_v60  ;;  %v5771_v7 = vadd.f32 %v5765_v0, %v5759_v55  ;;  %v5782_v38 = vadd.f32 %v5776_v17, %v5770_v8  ;;  %v7055_v40 = vmul.f32 0.109360695, %v11898_v32  ;;  %v11942_v5 = vpop.f32.mrb[45].mxu1  ;;  %v11944_v6 = vpop.f32.mrb[47].mxu0 }
 0x2fd   :  { %v5793_v24 = vadd.f32 %v5787_v62, %v5781_v26  ;;  %v5800_v50 = vadd.f32 %v5792_v30, %v5776_v17  ;;  %v7060_v52 = vadd.f32 %v11900_v12, %v7048_v51  ;;  %v7066_v31 = vmul.f32 0.21300554, %v11898_v32  ;;  %v11948_v10 = vpop.f32.mrb[46].mxu1 }
 0x2fe   :  { %v7061_v56 = vadd.f32 %v7055_v40, %v7049_v54  ;;  %v7071_v21 = vadd.f32 %v11902_v49, %v7059_v25  ;;  %v7077_v60 = vmul.f32 0.26601174, %v11898_v32  ;;  %v7082_v14 = vadd.f32 %v11904_v44, %v7070_v43  ;;  %v11953_v8 = vpop.f32.mrb[47].mxu1 }
 0x2ff   :  { %v7072_v22 = vadd.f32 %v7066_v31, %v7060_v52  ;;  %v7089_v27 = vadd.f32 %v7081_v20, %v11902_v49  ;;  %v7098_v55 = vadd.f32 %v7088_v45, %v11900_v12  ;;  %v7104_v51 = vmul.f32 0.036000773, %v11898_v32 }
 0x300   :  { %v11958_v0 = vadd.f32 %v7067_v53, %v7061_v56  ;;  %v7083_v17 = vadd.f32 %v7077_v60, %v7071_v21  ;;  %v7090_v26 = vadd.f32 %v7082_v14, %v7066_v31  ;;  %v5779_v54 = vmul.f32 0.21300554, %v11906_v4 }
 0x301   :  { %v11961_v25 = vadd.f32 %v7078_v29, %v7072_v22  ;;  %v7099_v62 = vadd.f32 %v7089_v27, %v7055_v40  ;;  %v7110_v30 = vadd.f32 %v7104_v51, %v7098_v55  ;;  %v5790_v44 = vmul.f32 0.26601174, %v11906_v4 }
 0x302   :  { %v7091_v43 = vadd.f32 %v7083_v17, %v7067_v53  ;;  %v7100_v52 = vadd.f32 %v7094_v63, %v7090_v26  ;;  %v5806_v49 = vmul.f32 0.109360695, %v11906_v4  ;;  %v5817_v12 = vmul.f32 0.036000773, %v11906_v4 }
 0x303   :  { %v7111_v20 = vadd.f32 %v7105_v58, %v7099_v62  ;;  %v7122_v32 = vadd.f32 %v7116_v3, %v7110_v30  ;;  %v5828_v45 = vmul.f32 0.0075987587, %v11906_v4  ;;  %v11968_v31 = vmul.f32 0.21300554, %v11908_v46 }
 0x304   :  { %v11971_v29 = vmul.f32 0.109360695, %v11908_v46  ;;  %v7107_v40 = vmul.f32 0.036000773, %v11908_v46  ;;  %v7118_v56 = vmul.f32 0.0075987587, %v11908_v46  ;;  %v5761_v53 = vadd.f32 %v11919_v47, %v5749_v48 }
 0x305   :  { %v7129_v63 = vmul.f32 0.0010283802, %v11908_v46  ;;  %v5767_v21 = vmul.f32 0.109360695, %v11910_v35  ;;  %v5772_v58 = vadd.f32 %v11921_v61, %v5760_v2  ;;  %v5778_v4 = vmul.f32 0.21300554, %v11910_v35 }
 0x306   :  { %v5783_v3 = vadd.f32 %v11923_v9, %v5771_v7  ;;  %v5789_v60 = vmul.f32 0.26601174, %v11910_v35  ;;  %v5794_v14 = vadd.f32 %v11925_v42, %v5782_v38  ;;  %v5801_v22 = vadd.f32 %v5793_v24, %v11923_v9 }
 0x307   :  { %v5773_v27 = vadd.f32 %v5767_v21, %v5761_v53  ;;  %v5784_v55 = vadd.f32 %v5778_v4, %v5772_v58  ;;  %v5810_v47 = vadd.f32 %v5800_v50, %v11921_v61  ;;  %v5816_v46 = vmul.f32 0.036000773, %v11910_v35 }
 0x308   :  { %v5795_v48 = vadd.f32 %v5789_v60, %v5783_v3  ;;  %v5802_v51 = vadd.f32 %v5794_v14, %v5778_v4  ;;  %v5811_v17 = vadd.f32 %v5801_v22, %v5767_v21  ;;  %v11987_v2 = vmul.f32 0.26601174, %v11912_v15 }
 0x309   :  { %v11989_v26 = vadd.f32 %v5779_v54, %v5773_v27  ;;  %v11991_v7 = vadd.f32 %v5790_v44, %v5784_v55  ;;  %v5822_v62 = vadd.f32 %v5816_v46, %v5810_v47  ;;  %v11994_v42 = vmul.f32 0.21300554, %v11912_v15 }
 0x30a   :  { %v5803_v9 = vadd.f32 %v5795_v48, %v5779_v54  ;;  %v5812_v38 = vadd.f32 %v5806_v49, %v5802_v51  ;;  %v5823_v24 = vadd.f32 %v5817_v12, %v5811_v17  ;;  %v7095_v61 = vmul.f32 0.109360695, %v11912_v15 }
 0x30b   :  { %v5834_v35 = vadd.f32 %v5828_v45, %v5822_v62  ;;  %v7106_v50 = vmul.f32 0.036000773, %v11912_v15  ;;  %v7117_v30 = vmul.f32 0.0075987587, %v11912_v15  ;;  %v7128_v53 = vmul.f32 0.0010283802, %v11912_v15 }
 0x30c   :  { %v12001_v21 = vmul.f32 0.21300554, %v11915_v13  ;;  %v12004_v44 = vmul.f32 0.109360695, %v11915_v13  ;;  %v5819_v58 = vmul.f32 0.036000773, %v11915_v13  ;;  %v7101_v54 = vadd.f32 %v7095_v61, %v7091_v43 }
 0x30d   :  { %v7123_v49 = vadd.f32 %v7117_v30, %v7111_v20  ;;  %v7134_v12 = vadd.f32 %v7128_v53, %v7122_v32  ;;  %v5830_v4 = vmul.f32 0.0075987587, %v11915_v13  ;;  %v5841_v45 = vmul.f32 0.0010283802, %v11915_v13 }
 0x30e   :  { %v12010_v3 = vmul.f32 0.036000773, %v11917_v36  ;;  %v12013_v15 = vmul.f32 0.0075987587, %v11917_v36  ;;  %v7131_v60 = vmul.f32 0.0010283802, %v11917_v36  ;;  %v7112_v14 = vadd.f32 %v7106_v50, %v7100_v52 }
 0x30f   :  { %v12016_v22 = vadd.f32 %v7129_v63, %v7123_v49  ;;  %v7170_v27 = vsub.f32 %v7134_v12, %v11709_v37  ;;  %v5791_v43 = vmul.f32 0.26601174, %v11927_v57  ;;  %v12021_v20 = vmul.f32 0.21300554, %v11927_v57 }
 0x310   :  { %v5807_v13 = vmul.f32 0.109360695, %v11927_v57  ;;  %v5818_v32 = vmul.f32 0.036000773, %v11927_v57  ;;  %v5829_v55 = vmul.f32 0.0075987587, %v11927_v57  ;;  %v7113_v47 = vadd.f32 %v7107_v40, %v7101_v54 }
 0x311   :  { %v12026_v46 = vmul.f32 2.0, %v7170_v27  ;;  %v5840_v36 = vmul.f32 0.0010283802, %v11927_v57  ;;  %v7097_v52 = vmul.f32 0.109360695, %v11929_v16  ;;  %v7124_v63 = vadd.f32 %v7118_v56, %v7112_v14 }
 0x312   :  { %v5835_v37 = vadd.f32 %v5829_v55, %v5823_v24  ;;  %v7108_v48 = vmul.f32 0.036000773, %v11929_v16  ;;  %v7119_v51 = vmul.f32 0.0075987587, %v11929_v16  ;;  %v7130_v17 = vmul.f32 0.0010283802, %v11929_v16 }
 0x313   :  { %v5846_v62 = vadd.f32 %v5840_v36, %v5834_v35  ;;  %v12034_v61 = vmul.f32 0.036000773, %v11937_v33  ;;  %v12037_v40 = vmul.f32 0.0075987587, %v11937_v33  ;;  %v5843_v50 = vmul.f32 0.0010283802, %v11937_v33 }
 0x314   :  { %v5847_v57 = vadd.f32 %v5841_v45, %v5835_v37  ;;  %v7125_v30 = vadd.f32 %v7119_v51, %v7113_v47  ;;  %v7136_v53 = vadd.f32 %v7130_v17, %v7124_v63  ;;  %v7133_v56 = vmul.f32 0.0010283802, %v11939_v19  ;;  %v12955_v55 = vld [vmem:[#allocation43_spill] sm:$0xff]  ;;  %v12958_v63 = vld [vmem:[#allocation14_spill] sm:$0xff]  ;;  %v12959_v37 = vld [vmem:[#allocation49_spill] sm:$0xff] }
 0x315   :  { %v7164_v24 = vsub.f32 %v5846_v62, %v11706_v23  ;;  %v5809_v54 = vmul.f32 0.109360695, %v11942_v5  ;;  %v5813_v49 = vadd.f32 %v5807_v13, %v5803_v9  ;;  %v5820_v16 = vmul.f32 0.036000773, %v11942_v5  ;;  %v12956_v33 = vld [vmem:[#allocation39_spill] sm:$0xff] }
 0x316   :  { %v7165_v35 = vsub.f32 %v5847_v57, %v11717_v59  ;;  %v7137_v12 = vadd.f32 %v7131_v60, %v7125_v30  ;;  %v7172_v14 = vsub.f32 %v7136_v53, %v11759_v18  ;;  %v5824_v27 = vadd.f32 %v5818_v32, %v5812_v38 }
 0x317   :  { %v12957_v45 = vsub.f32 %v12955_v55, %v12956_v33  ;;  %v5825_v36 = vadd.f32 %v5819_v58, %v5813_v49  ;;  %v5831_v19 = vmul.f32 0.0075987587, %v11942_v5  ;;  %v5842_v23 = vmul.f32 0.0010283802, %v11942_v5  ;;  %v445_v33 = vpop.xlane.xlu1 %444 }
 0x318   :  { %v12960_v9 = vsub.f32 %v12958_v63, %v12959_v37  ;;  %v7173_v51 = vsub.f32 %v7137_v12, %v11766_v34  ;;  %v7178_v59 = vmul.f32 2.0, %v7172_v14  ;;  %v5836_v60 = vadd.f32 %v5830_v4, %v5824_v27  ;;  %v12963_v12 = vld [vmem:[#allocation13_spill] sm:$0xff]  ;;  %v12969_v37 = vld [vmem:[#allocation58_spill] sm:$0xff] }
 0x319   :  { %v7188_v47 = vadd.f32 %v7164_v24, %v12957_v45  ;;  %v5837_v18 = vadd.f32 %v5831_v19, %v5825_v36  ;;  %v7085_v38 = vadd.f32 %v11987_v2, %v11958_v0  ;;  %v7092_v58 = vadd.f32 %v11994_v42, %v11961_v25  ;;  %v12967_v19 = vld [vmem:[#allocation27_spill] sm:$0xff] }
 0x31a   :  { %v7189_v13 = vadd.f32 %v7165_v35, %v12960_v9  ;;  %v7179_v62 = vmul.f32 2.0, %v7173_v51  ;;  %v7184_v57 = vadd.f32 9.0, %v7178_v59  ;;  %v5848_v5 = vadd.f32 %v5842_v23, %v5836_v60  ;;  %v12970_v59 = vld [vmem:[#allocation69_spill] sm:$0xff] }
 0x31b   :  { %v7194_v17 = vadd.f32 9.0, %v7188_v47  ;;  %v5849_v53 = vadd.f32 %v5843_v50, %v5837_v18  ;;  %v7093_v24 = vadd.f32 %v11968_v31, %v7085_v38  ;;  %v7102_v34 = vadd.f32 %v11971_v29, %v7092_v58  ;;  %v12972_v58 = vld [vmem:[#allocation63_spill] sm:$0xff] }
 0x31c   :  { %v7195_v32 = vadd.f32 9.0, %v7189_v13  ;;  %v7166_v49 = vsub.f32 %v5848_v5, %v11756_v11  ;;  %v7121_v0 = vmul.f32 0.0075987587, %v11944_v6  ;;  %v7132_v2 = vmul.f32 0.0010283802, %v11944_v6  ;;  %v12964_v11 = vld [vmem:[#allocation24_spill] sm:$0xff] }
 0x31d   :  { %v7230_v30 = vmul.f32 %v11868_v39, %v7194_v17  ;;  %v7167_v25 = vsub.f32 %v5849_v53, %v11763_v1  ;;  %v7103_v42 = vadd.f32 %v7097_v52, %v7093_v24  ;;  %v7114_v35 = vadd.f32 %v7108_v48, %v7102_v34  ;;  %v12961_v39 = vld [vmem:[#allocation23_spill] sm:$0xff] }
 0x31e   :  { %v7231_v4 = vmul.f32 %v11871_v28, %v7195_v32  ;;  %v12962_v50 = vsub.f32 %v12961_v39, %v12927_v41  ;;  %v5845_v29 = vmul.f32 0.0010283802, %v11948_v10  ;;  %v5797_v28 = vadd.f32 %v5791_v43, %v11989_v26  ;;  %v719_v32 = vpop.xlane.xlu1 %718  ;;  %v12976_v39 = vld [vmem:[#allocation51_spill] sm:$0xff] }
 0x31f   :  { %9224 = vrcp.f32 %v7230_v30  ;;  %v12965_v14 = vsub.f32 %v12963_v12, %v12964_v11  ;;  %v7115_v6 = vadd.f32 %v12010_v3, %v7103_v42  ;;  %v7126_v55 = vadd.f32 %v12013_v15, %v7114_v35  ;;  %v12966_v3 = vld [vmem:[#allocation64_spill] sm:$0xff]  ;;  %v12975_v42 = vld [vmem:[#allocation75_spill] sm:$0xff] }
 0x320   :  { %9226 = vrcp.f32 %v7231_v4  ;;  %v7190_v31 = vadd.f32 %v7166_v49, %v12962_v50  ;;  %v5804_v1 = vadd.f32 %v12021_v20, %v11991_v7  ;;  %v5805_v48 = vadd.f32 %v12001_v21, %v5797_v28  ;;  %v12968_v21 = vld [vmem:[#allocation12_spill] sm:$0xff]  ;;  %v12974_v4 = vld [vmem:[#allocation78_spill] sm:$0xff]  ;;  %v12978_v12 = vld [vmem:[#allocation67_spill] sm:$0xff] }
 0x321   :  { %v7191_v27 = vadd.f32 %v7167_v25, %v12965_v14  ;;  %v5833_v41 = vmul.f32 0.0075987587, %v11953_v8  ;;  %v5844_v10 = vmul.f32 0.0010283802, %v11953_v8  ;;  %v7127_v43 = vadd.f32 %v7121_v0, %v7115_v6  ;;  %v12979_v6 = vld [vmem:[#allocation37_spill] sm:$0xff] }
 0x322   :  { %v7196_v52 = vadd.f32 9.0, %v7190_v31  ;;  %v7138_v45 = vadd.f32 %v7132_v2, %v7126_v55  ;;  %v5814_v47 = vadd.f32 %v12004_v44, %v5804_v1  ;;  %v5815_v15 = vadd.f32 %v5809_v54, %v5805_v48  ;;  %v12977_v31 = vld [vmem:[#allocation60_spill] sm:$0xff]  ;;  %v12980_v55 = vld [vmem:[#allocation26_spill] sm:$0xff] }
 0x323   :  { %v7197_v26 = vadd.f32 9.0, %v7191_v27  ;;  %v7171_v7 = vsub.f32 %v12016_v22, %v12967_v19  ;;  %v7182_v20 = vadd.f32 9.0, %v12026_v46  ;;  %v7139_v63 = vadd.f32 %v7133_v56, %v7127_v43  ;;  %v12971_v46 = vld [vmem:[#allocation76_spill] sm:$0xff]  ;;  %v12984_v43 = vld [vmem:[#allocation22_spill] sm:$0xff] }
 0x324   :  { %v7232_v36 = vmul.f32 %v12966_v3, %v7196_v52  ;;  %v7174_v8 = vsub.f32 %v7138_v45, %v12969_v37  ;;  %v5826_v9 = vadd.f32 %v5820_v16, %v5814_v47  ;;  %v5827_v13 = vadd.f32 %v12034_v61, %v5815_v15  ;;  %v12973_v61 = vld [vmem:[#allocation79_spill] sm:$0xff]  ;;  %v12982_v52 = vld [vmem:[#allocation81_spill] sm:$0xff] }
 0x325   :  { %v7233_v23 = vmul.f32 %v12968_v21, %v7197_v26  ;;  %v7177_v51 = vmul.f32 2.0, %v7171_v7  ;;  %v7185_v44 = vadd.f32 9.0, %v7179_v62  ;;  %v7175_v60 = vsub.f32 %v7139_v63, %v12970_v59  ;;  %v12983_v26 = vld [vmem:[#allocation45_spill] sm:$0xff] }
 0x326   :  { %9228 = vrcp.f32 %v7232_v36  ;;  %v7180_v54 = vmul.f32 2.0, %v7174_v8  ;;  %v5838_v17 = vadd.f32 %v12037_v40, %v5826_v9  ;;  %v5839_v22 = vadd.f32 %v5833_v41, %v5827_v13  ;;  %v533_v40 = vpop.xlane.xlu0 %532 }
 0x327   :  { %9230 = vrcp.f32 %v7233_v23  ;;  %v7183_v18 = vadd.f32 9.0, %v7177_v51  ;;  %v7212_v38 = vmul.f32 %v12971_v46, %v7182_v20  ;;  %v7214_v56 = vmul.f32 %v12972_v58, %v7184_v57  ;;  %v12986_v23 = vld [vmem:[#allocation73_spill] sm:$0xff] }
 0x328   :  { %v7181_v16 = vmul.f32 2.0, %v7175_v60  ;;  %v7186_v30 = vadd.f32 9.0, %v7180_v54  ;;  %v5850_v53 = vadd.f32 %v5844_v10, %v5838_v17  ;;  %v7215_v24 = vmul.f32 %v12973_v61, %v7185_v44 }
 0x329   :  { %v9225_v5 = vpop.eup %9224  ;;  %v5851_v34 = vadd.f32 %v5845_v29, %v5839_v22  ;;  %v7213_v49 = vmul.f32 %v12974_v4, %v7183_v18  ;;  %v446_v2 = vrot.slane %v445_v33, 4  ;;  %v720_v57 = vrot.slane %v719_v32, 4 }
 0x32a   :  { %v9227_v62 = vpop.eup %9226  ;;  %v7242_v0 = vmul.f32 %v9225_v5, %v7212_v38  ;;  %v7187_v25 = vadd.f32 9.0, %v7181_v16  ;;  %v7216_v35 = vmul.f32 %v12975_v42, %v7186_v30  ;;  %v7168_v50 = vsub.f32 %v5850_v53, %v12976_v39 }
 0x32b   :  { %v7228_v28 = vadd.f32 1.0, %v12977_v31  ;;  %v7169_v11 = vsub.f32 %v5851_v34, %v12978_v12  ;;  %v7243_v14 = vmul.f32 %v9227_v62, %v7213_v49  ;;  %v447_v27 = vadd.f32 %v446_v2, %v445_v33 }
 0x32c   :  { %v12981_v29 = vsub.f32 %v12979_v6, %v12980_v55  ;;  %v7217_v48 = vmul.f32 %v12982_v52, %v7187_v25  ;;  %v721_v41 = vadd.f32 %v720_v57, %v719_v32  ;;  %v534_v10 = vrot.slane %v533_v40, 4 }
 0x32d   :  { %v12985_v45 = vsub.f32 %v12983_v26, %v12984_v43  ;;  %v7249_v3 = vsel %vm7248_vm3, %v7242_v0, 0.0  ;;  %v7250_v36 = vsel %vm7248_vm3, %v7243_v14, 0.0  ;;  %v448_v15 = vrot.slane %v447_v27, 2 }
 0x32e   :  { %v7192_v1 = vadd.f32 %v7168_v50, %v12981_v29  ;;  %v7251_v7 = vadd.f32 %v7250_v36, %v7249_v3  ;;  %v722_v33 = vrot.slane %v721_v41, 2  ;;  %v535_v20 = vadd.f32 %v534_v10, %v533_v40 }
 0x32f   :  { %v7193_v47 = vadd.f32 %v7169_v11, %v12985_v45  ;;  %v7229_v63 = vadd.f32 1.0, %v12986_v23  ;;  %v449_v8 = vadd.f32 %v448_v15, %v447_v27  ;;  %v7278_v14 = vstv %s9198_s25 }
 0x330   :  { %v7198_v19 = vadd.f32 9.0, %v7192_v1  ;;  %v9229_v21 = vpop.eup %9228  ;;  %v723_v44 = vadd.f32 %v722_v33, %v721_v41  ;;  %v536_v59 = vrot.slane %v535_v20, 2 }
 0x331   :  { %v7199_v37 = vadd.f32 9.0, %v7193_v47  ;;  %v9231_v9 = vpop.eup %9230  ;;  %v7244_v51 = vmul.f32 %v9229_v21, %v7214_v56  ;;  %v450_v17 = vrot.slane %v449_v8, 1 }
 0x332   :  { %v7234_v13 = vmul.f32 %v7228_v28, %v7198_v19  ;;  %v7245_v54 = vmul.f32 %v9231_v9, %v7215_v24  ;;  %v537_v18 = vadd.f32 %v536_v59, %v535_v20  ;;  %v724_v46 = vrot.slane %v723_v44, 1 }
 0x333   :  { %v7235_v60 = vmul.f32 %v7229_v63, %v7199_v37  ;;  %v7252_v22 = vsel %vm7248_vm3, %v7244_v51, 0.0  ;;  %v451_v32 = vadd.f32 %v450_v17, %v449_v8 }
 0x334   :  { %9232 = vrcp.f32 %v7234_v13  ;;  %v7253_v38 = vadd.f32 %v7252_v22, %v7251_v7  ;;  %v7254_v58 = vsel %vm7248_vm3, %v7245_v54, 0.0  ;;  %v538_v5 = vrot.slane %v537_v18, 1 }
 0x335   :  { %9234 = vrcp.f32 %v7235_v60  ;;  %9205 = vpush %v451_v32  ;;  %v725_v30 = vadd.f32 %v724_v46, %v723_v44 }
 0x336   :  { %v7255_v16 = vadd.f32 %v7254_v58, %v7253_v38  ;;  %v539_v56 = vadd.f32 %v538_v5, %v537_v18 }
 0x338   :  { %9207 = vpush %v539_v56 }
 0x339   :  { %9209 = vpush %v725_v30 }
 0x33e   :  { %v9233_v53 = vpop.eup %9232 }
 0x33f   :  { %v9235_v61 = vpop.eup %9234  ;;  %v7246_v24 = vmul.f32 %v9233_v53, %v7216_v35  ;;  %v7269_v35 = vlaneseq }
 0x340   :  { %v7247_v62 = vmul.f32 %v9235_v61, %v7217_v48 }
 0x341   :  { %v7256_v34 = vsel %vm7248_vm3, %v7246_v24, 0.0  ;;  %v7270_v31 = vand.u32 127, %v7269_v35 }
 0x342   :  { %v7257_v4 = vadd.f32 %v7256_v34, %v7255_v16  ;;  %v7258_v49 = vsel %vm7248_vm3, %v7247_v62, 0.0 }
 0x343   :  { %vm7273_vm4 = vcmp.eq.s32.totalorder %v7270_v31, 2  ;;  %vm7272_vm5 = vcmp.eq.s32.totalorder %v7270_v31, 1  ;;  %vm7271_vm6 = vcmp.eq.s32.totalorder %v7270_v31, 0 }
 0x344   :  { %v7259_v0 = vadd.f32 %v7258_v49, %v7257_v4 }
 0x346   :  { %7260 = vadd.xlane.f32.xlu0 %v7259_v0 }
 0x366   :  { %s9206_s29 = spop %9205 }
 0x369   :  { %s9208_s30 = spop %9207 }
 0x36a   :  { %s9210_s4 = spop %9209  ;;  %s541_s7 = sadd.f32 %s9208_s30, %s9206_s29 }
 0x36b   :  { %s727_s8 = smul.f32 0.5, %s9210_s4 }
 0x36d   :  { %s728_s9 = sadd.f32 %s727_s8, %s541_s7 }
 0x36f   :  { %s729_s10 = sadd.f32 %s728_s9, %s251_s1 }
 0x371   :  { %v7276_v12 = vstv %s729_s10 }
 0x3d3   :  { %v7261_v2 = vpop.xlane.xlu0 %7260 }
 0x3d4   :  { %v7262_v40 = vrot.slane %v7261_v2, 4 }
 0x3d6   :  { %v7263_v25 = vadd.f32 %v7262_v40, %v7261_v2 }
 0x3d8   :  { %v7264_v42 = vrot.slane %v7263_v25, 2 }
 0x3da   :  { %v7265_v39 = vadd.f32 %v7264_v42, %v7263_v25 }
 0x3dc   :  { %v7266_v50 = vrot.slane %v7265_v39, 1 }
 0x3de   :  { %v7267_v57 = vadd.f32 %v7266_v50, %v7265_v39 }
 0x3e0   :  { %9211 = vpush %v7267_v57 }
 0x411   :  { %s9212_s11 = spop %9211 }
 0x412   :  { %v7274_v28 = vstv %s9212_s11 }
 0x413   :  { %v7275_v11 = vsel %vm7273_vm4, %v7274_v28, 0.0 }
 0x414   :  { %v7277_v27 = vsel %vm7272_vm5, %v7276_v12, %v7275_v11 }
 0x415   :  { %v7279_v6 = vsel %vm7271_vm6, %v7278_v14, %v7277_v27 }
 0x416   :  { %7280 = vst [vmem:[#allocation8] sm:$0xff] %v7279_v6 }
 0x417   :  { %9329 = shalt.err (!%p9326_p0)
}
 0x418   :  { %s9330_s18 = scalar_lea.hbm %s12129_s3, 128 }
 0x419   :  { %p9331_p1 = scmp.ne.s32.totalorder %s12129_s3, %s9330_s18  ;;  %p9334_p2 = scmp.lt.u32.totalorder %s9330_s18, %s12129_s3 }
 0x41b   :  { %p9336_p3 = pnand %p9334_p2, %p9331_p1 }
 0x41d   :  { %9339 = shalt.err (!%p9336_p3)
}
 0x41e   :  { %7290 = dma.vmem_to_hbm [thread:$0]  %s7288_s13, 128, %s12129_s3, [#allocation4]  }
 0x41f   :  { %9344 = dma.done.wait [#allocation4], 128  }
 0x420   :  { %9345 = vsyncadd [#allocation4], 4294967168 }
 0x421   :  { %7294 = vsyncpa [#allocation3], 1 }
 0x422   :  { %7295 = vsyncpa [#allocation6], 1 }
 0x423   :  { %7296 = vsyncpa [#allocation4], 1 }

</bundles_post_ra>
